<compile_context>
chip_gen: v6e
topology: v6e:2x2x1
jax: 0.10.0
libtpu: 0.0.40
codegen_flags: <defaults>
</compile_context>

<pallas_src>
import math
from functools import partial

import jax
import jax.numpy as jnp
from jax.experimental import pallas as pl
from jax.experimental.pallas import tpu as pltpu

_LN_EPS = 1e-5  # torch.nn.LayerNorm default


def _gelu_tanh(x):
    # TODO(synk): PyTorch nn.GELU() defaults to the exact erf formulation; the
    # tanh approximation is used here (guaranteed Mosaic lowering via EUP tanh)
    # and differs from erf-GELU by < ~3e-3 per activation.
    c = math.sqrt(2.0 / math.pi)
    return 0.5 * x * (1.0 + jnp.tanh(c * (x + 0.044715 * x * x * x)))


def _layer_norm(x, gamma, beta):
    mu = jnp.mean(x, axis=-1, keepdims=True)
    var = jnp.mean((x - mu) ** 2, axis=-1, keepdims=True)
    return (x - mu) * jax.lax.rsqrt(var + _LN_EPS) * gamma + beta


def _make_stack_kernel(depth, heads, dim_head):
    scale = dim_head ** (-0.5)

    def kernel(x_ref, g1_ref, b1_ref, wq_ref, wk_ref, wv_ref, wo_ref, bo_ref,
               g2_ref, b2_ref, w1_ref, bf1_ref, w2_ref, bf2_ref, o_ref):
        x = x_ref[0].astype(jnp.float32)                     # (N, D)

        for l in range(depth):                               # static unroll
            # ---- PreNorm + multi-head self-attention + residual ------------
            xn = _layer_norm(x, g1_ref[l], b1_ref[l])
            proj = jnp.zeros(x.shape, jnp.float32)
            for h in range(heads):                           # static unroll
                qh = jnp.dot(xn, wq_ref[l, h],
                             preferred_element_type=jnp.float32)
                kh = jnp.dot(xn, wk_ref[l, h],
                             preferred_element_type=jnp.float32)
                vh = jnp.dot(xn, wv_ref[l, h],
                             preferred_element_type=jnp.float32)
                dots = jnp.dot(qh, kh.T,
                               preferred_element_type=jnp.float32) * scale
                dots = dots - jnp.max(dots, axis=-1, keepdims=True)
                p = jnp.exp(dots)
                inv = pl.reciprocal(jnp.sum(p, axis=-1, keepdims=True),
                                    approx=True)
                attn = p * inv
                oh = jnp.dot(attn, vh, preferred_element_type=jnp.float32)
                # Fold this head's slice of the output projection in here; this
                # avoids an explicit concatenate of the heads.
                proj = proj + jnp.dot(oh, wo_ref[l, h],
                                      preferred_element_type=jnp.float32)
            x = x + proj + bo_ref[l]                         # residual

            # ---- PreNorm + FeedForward (Linear -> GELU -> Linear) + residual
            xn2 = _layer_norm(x, g2_ref[l], b2_ref[l])
            hid = _gelu_tanh(
                jnp.dot(xn2, w1_ref[l], preferred_element_type=jnp.float32)
                + bf1_ref[l])
            x = x + jnp.dot(hid, w2_ref[l],
                            preferred_element_type=jnp.float32) + bf2_ref[l]

        o_ref[0] = x.astype(o_ref.dtype)

    return kernel


def _stack_params(params, heads, dim_head):
    """Stack per-layer weights along a leading depth axis; split QKV per head."""
    D = params[0]["wq"].shape[0]

    def per_head_in(w):   # (D, inner) -> (H, D, dh)
        return w.reshape(D, heads, dim_head).transpose(1, 0, 2)

    def per_head_out(w):  # (inner, D) -> (H, dh, D)
        return w.reshape(heads, dim_head, D)

    st = lambda name: jnp.stack([p[name] for p in params], axis=0)
    return dict(
        g1=st("g1"), b1=st("b1"),
        wq=jnp.stack([per_head_in(p["wq"]) for p in params], axis=0),
        wk=jnp.stack([per_head_in(p["wk"]) for p in params], axis=0),
        wv=jnp.stack([per_head_in(p["wv"]) for p in params], axis=0),
        wo=jnp.stack([per_head_out(p["wo"]) for p in params], axis=0),
        bo=st("bo"), g2=st("g2"), b2=st("b2"),
        w1=st("w1"), bf1=st("bf1"), w2=st("w2"), bf2=st("bf2"),
    )


@partial(jax.jit, static_argnames=("heads", "dim_head"))
def transformer_pallas(x, params, *, heads, dim_head):
    B, N, D = x.shape
    depth = len(params)
    mlp = params[0]["w1"].shape[1]
    sp = _stack_params(params, heads, dim_head)
    L = depth

    def full(shape):
        return pl.BlockSpec(shape, lambda b, _n=len(shape): (0,) * _n)

    return pl.pallas_call(
        _make_stack_kernel(depth, heads, dim_head),
        out_shape=jax.ShapeDtypeStruct((B, N, D), x.dtype),
        grid_spec=pltpu.PrefetchScalarGridSpec(
            num_scalar_prefetch=0,
            grid=(B,),
            in_specs=[
                pl.BlockSpec((1, N, D), lambda b: (b, 0, 0)),   # x
                full((L, 1, D)), full((L, 1, D)),               # ln1 gamma/beta
                full((L, heads, D, dim_head)),                  # Wq
                full((L, heads, D, dim_head)),                  # Wk
                full((L, heads, D, dim_head)),                  # Wv
                full((L, heads, dim_head, D)),                  # Wo
                full((L, 1, D)),                                # bo
                full((L, 1, D)), full((L, 1, D)),               # ln2 gamma/beta
                full((L, D, mlp)), full((L, 1, mlp)),           # W1, b1
                full((L, mlp, D)), full((L, 1, D)),             # W2, b2
            ],
            out_specs=pl.BlockSpec((1, N, D), lambda b: (b, 0, 0)),
        ),
        compiler_params=pltpu.CompilerParams(
            dimension_semantics=("parallel",)),
    )(x, sp["g1"], sp["b1"], sp["wq"], sp["wk"], sp["wv"], sp["wo"], sp["bo"],
      sp["g2"], sp["b2"], sp["w1"], sp["bf1"], sp["w2"], sp["bf2"])


def transformer_ref(x, params, *, heads, dim_head):
    """Pure-JAX reference matching the PyTorch forward semantics.
    Weights are stored in (in, out) layout (i.e. already transposed relative to
    torch.nn.Linear.weight); nn.Dropout(p=0) is an identity in the forward.
    """
    scale = dim_head ** (-0.5)
    for p in params:
        B, N, D = x.shape
        xn = _layer_norm(x, p["g1"], p["b1"])
        q = (xn @ p["wq"]).reshape(B, N, heads, dim_head).transpose(0, 2, 1, 3)
        k = (xn @ p["wk"]).reshape(B, N, heads, dim_head).transpose(0, 2, 1, 3)
        v = (xn @ p["wv"]).reshape(B, N, heads, dim_head).transpose(0, 2, 1, 3)
        dots = jnp.einsum("bhnd,bhmd->bhnm", q, k) * scale
        attn = jax.nn.softmax(dots, axis=-1)
        out = jnp.einsum("bhnm,bhmd->bhnd", attn, v)
        out = out.transpose(0, 2, 1, 3).reshape(B, N, heads * dim_head)
        x = x + out @ p["wo"] + p["bo"]
        xn2 = _layer_norm(x, p["g2"], p["b2"])
        x = x + _gelu_tanh(xn2 @ p["w1"] + p["bf1"]) @ p["w2"] + p["bf2"]
    return x


if __name__ == "__main__":
    B, N, D = 2, 16, 128            # batch, sequence length, model dim (lane-dense)
    heads, dim_head = 4, 32
    mlp_dim, depth = 256, 2
    inner = heads * dim_head

    key = jax.random.PRNGKey(0)
    kx, key = jax.random.split(key)
    x = jax.random.normal(kx, (B, N, D), jnp.float32)

    params = []
    s = 0.08
    for _ in range(depth):
        keys = jax.random.split(key, 13)
        key = keys[0]
        params.append(dict(
            g1=1.0 + 0.1 * jax.random.normal(keys[1], (1, D), jnp.float32),
            b1=0.1 * jax.random.normal(keys[2], (1, D), jnp.float32),
            wq=s * jax.random.normal(keys[3], (D, inner), jnp.float32),
            wk=s * jax.random.normal(keys[4], (D, inner), jnp.float32),
            wv=s * jax.random.normal(keys[5], (D, inner), jnp.float32),
            wo=s * jax.random.normal(keys[6], (inner, D), jnp.float32),
            bo=0.05 * jax.random.normal(keys[7], (1, D), jnp.float32),
            g2=1.0 + 0.1 * jax.random.normal(keys[8], (1, D), jnp.float32),
            b2=0.1 * jax.random.normal(keys[9], (1, D), jnp.float32),
            w1=s * jax.random.normal(keys[10], (D, mlp_dim), jnp.float32),
            bf1=0.05 * jax.random.normal(keys[11], (1, mlp_dim), jnp.float32),
            w2=s * jax.random.normal(keys[12], (mlp_dim, D), jnp.float32),
            bf2=jnp.zeros((1, D), jnp.float32),
        ))

    out = transformer_pallas(x, params, heads=heads, dim_head=dim_head)
    jax.block_until_ready(out)

    ref = transformer_ref(x, params, heads=heads, dim_head=dim_head)
    err = float(jnp.max(jnp.abs(out - ref)))
    assert out.shape == (B, N, D)
    assert err < 5e-2, f"max abs error too large: {err}"
    print("KERNEL_OK")
</pallas_src>

<mosaic_0001>
module attributes {stable_mosaic.version = 11 : i64} {
  func.func @kernel(%arg0: i32, %arg1: memref<1x16x128xf32, #tpu.memory_space<vmem>>, %arg2: memref<2x1x128xf32, #tpu.memory_space<vmem>>, %arg3: memref<2x1x128xf32, #tpu.memory_space<vmem>>, %arg4: memref<2x4x128x32xf32, #tpu.memory_space<vmem>>, %arg5: memref<2x4x128x32xf32, #tpu.memory_space<vmem>>, %arg6: memref<2x4x128x32xf32, #tpu.memory_space<vmem>>, %arg7: memref<2x4x32x128xf32, #tpu.memory_space<vmem>>, %arg8: memref<2x1x128xf32, #tpu.memory_space<vmem>>, %arg9: memref<2x1x128xf32, #tpu.memory_space<vmem>>, %arg10: memref<2x1x128xf32, #tpu.memory_space<vmem>>, %arg11: memref<2x128x256xf32, #tpu.memory_space<vmem>>, %arg12: memref<2x1x256xf32, #tpu.memory_space<vmem>>, %arg13: memref<2x256x128xf32, #tpu.memory_space<vmem>>, %arg14: memref<2x1x128xf32, #tpu.memory_space<vmem>>, %arg15: memref<1x16x128xf32, #tpu.memory_space<vmem>>) attributes {dimension_semantics = [#tpu.dimension_semantics<parallel>], iteration_bounds = array<i64: 2>, scalar_prefetch = 0 : i64, scratch_operands = 0 : i64, tpu.core_type = #tpu.core_type<tc>, window_params = [{transform_indices = @transform_0, window_bounds = array<i64: 1, 16, 128>}, {pipeline_mode = #tpu.pipeline_mode<synchronous>, transform_indices = @transform_1, window_bounds = array<i64: 2, 1, 128>}, {pipeline_mode = #tpu.pipeline_mode<synchronous>, transform_indices = @transform_2, window_bounds = array<i64: 2, 1, 128>}, {pipeline_mode = #tpu.pipeline_mode<synchronous>, transform_indices = @transform_3, window_bounds = array<i64: 2, 4, 128, 32>}, {pipeline_mode = #tpu.pipeline_mode<synchronous>, transform_indices = @transform_4, window_bounds = array<i64: 2, 4, 128, 32>}, {pipeline_mode = #tpu.pipeline_mode<synchronous>, transform_indices = @transform_5, window_bounds = array<i64: 2, 4, 128, 32>}, {pipeline_mode = #tpu.pipeline_mode<synchronous>, transform_indices = @transform_6, window_bounds = array<i64: 2, 4, 32, 128>}, {pipeline_mode = #tpu.pipeline_mode<synchronous>, transform_indices = @transform_7, window_bounds = array<i64: 2, 1, 128>}, {pipeline_mode = #tpu.pipeline_mode<synchronous>, transform_indices = @transform_8, window_bounds = array<i64: 2, 1, 128>}, {pipeline_mode = #tpu.pipeline_mode<synchronous>, transform_indices = @transform_9, window_bounds = array<i64: 2, 1, 128>}, {pipeline_mode = #tpu.pipeline_mode<synchronous>, transform_indices = @transform_10, window_bounds = array<i64: 2, 128, 256>}, {pipeline_mode = #tpu.pipeline_mode<synchronous>, transform_indices = @transform_11, window_bounds = array<i64: 2, 1, 256>}, {pipeline_mode = #tpu.pipeline_mode<synchronous>, transform_indices = @transform_12, window_bounds = array<i64: 2, 256, 128>}, {pipeline_mode = #tpu.pipeline_mode<synchronous>, transform_indices = @transform_13, window_bounds = array<i64: 2, 1, 128>}, {transform_indices = @transform_14, window_bounds = array<i64: 1, 16, 128>}]} {
    %c0 = arith.constant 0 : index
    %c0_0 = arith.constant 0 : index
    %c0_1 = arith.constant 0 : index
    %0 = vector.load %arg1[%c0, %c0_0, %c0_1] : memref<1x16x128xf32, #tpu.memory_space<vmem>>, vector<1x16x128xf32>
    %1 = vector.shape_cast %0 : vector<1x16x128xf32> to vector<16x128xf32>
    %c0_2 = arith.constant 0 : index
    %c0_3 = arith.constant 0 : index
    %c0_4 = arith.constant 0 : index
    %2 = vector.load %arg2[%c0_2, %c0_3, %c0_4] : memref<2x1x128xf32, #tpu.memory_space<vmem>>, vector<1x1x128xf32>
    %3 = vector.shape_cast %2 : vector<1x1x128xf32> to vector<1x128xf32>
    %c0_5 = arith.constant 0 : index
    %c0_6 = arith.constant 0 : index
    %c0_7 = arith.constant 0 : index
    %4 = vector.load %arg3[%c0_5, %c0_6, %c0_7] : memref<2x1x128xf32, #tpu.memory_space<vmem>>, vector<1x1x128xf32>
    %5 = vector.shape_cast %4 : vector<1x1x128xf32> to vector<1x128xf32>
    %cst = arith.constant dense<0.000000e+00> : vector<16xf32>
    %6 = vector.multi_reduction <add>, %1, %cst [1] : vector<16x128xf32> to vector<16xf32>
    %7 = vector.shape_cast %6 : vector<16xf32> to vector<16x1xf32>
    %cst_8 = arith.constant 1.280000e+02 : f32
    %8 = vector.broadcast %cst_8 : f32 to vector<16x1xf32>
    %9 = arith.divf %7, %8 : vector<16x1xf32>
    %10 = vector.broadcast %9 : vector<16x1xf32> to vector<16x128xf32>
    %11 = arith.subf %1, %10 : vector<16x128xf32>
    %12 = arith.mulf %11, %11 : vector<16x128xf32>
    %cst_9 = arith.constant dense<0.000000e+00> : vector<16xf32>
    %13 = vector.multi_reduction <add>, %12, %cst_9 [1] : vector<16x128xf32> to vector<16xf32>
    %14 = vector.shape_cast %13 : vector<16xf32> to vector<16x1xf32>
    %cst_10 = arith.constant 1.280000e+02 : f32
    %15 = vector.broadcast %cst_10 : f32 to vector<16x1xf32>
    %16 = arith.divf %14, %15 : vector<16x1xf32>
    %17 = vector.broadcast %9 : vector<16x1xf32> to vector<16x128xf32>
    %18 = arith.subf %1, %17 : vector<16x128xf32>
    %cst_11 = arith.constant 9.99999974E-6 : f32
    %19 = vector.broadcast %cst_11 : f32 to vector<16x1xf32>
    %20 = arith.addf %16, %19 : vector<16x1xf32>
    %21 = math.rsqrt %20 : vector<16x1xf32>
    %22 = vector.broadcast %21 : vector<16x1xf32> to vector<16x128xf32>
    %23 = arith.mulf %18, %22 : vector<16x128xf32>
    %24 = vector.broadcast %3 : vector<1x128xf32> to vector<16x128xf32>
    %25 = arith.mulf %23, %24 : vector<16x128xf32>
    %26 = vector.broadcast %5 : vector<1x128xf32> to vector<16x128xf32>
    %27 = arith.addf %25, %26 : vector<16x128xf32>
    %cst_12 = arith.constant 0.000000e+00 : f32
    %28 = vector.broadcast %cst_12 : f32 to vector<16x128xf32>
    %c0_13 = arith.constant 0 : index
    %c0_14 = arith.constant 0 : index
    %c0_15 = arith.constant 0 : index
    %c0_16 = arith.constant 0 : index
    %29 = vector.load %arg4[%c0_13, %c0_14, %c0_15, %c0_16] : memref<2x4x128x32xf32, #tpu.memory_space<vmem>>, vector<1x1x128x32xf32>
    %30 = vector.shape_cast %29 : vector<1x1x128x32xf32> to vector<128x32xf32>
    %cst_17 = arith.constant dense<0.000000e+00> : vector<16x32xf32>
    %31 = tpu.matmul %27, %30, %cst_17 {dimension_numbers = #tpu.dot_dimension_numbers<[1], [0], [0], [1], [0, 0, 1, 1], [], []>} : vector<16x128xf32>, vector<128x32xf32>, vector<16x32xf32> -> vector<16x32xf32>
    %c0_18 = arith.constant 0 : index
    %c0_19 = arith.constant 0 : index
    %c0_20 = arith.constant 0 : index
    %c0_21 = arith.constant 0 : index
    %32 = vector.load %arg5[%c0_18, %c0_19, %c0_20, %c0_21] : memref<2x4x128x32xf32, #tpu.memory_space<vmem>>, vector<1x1x128x32xf32>
    %33 = vector.shape_cast %32 : vector<1x1x128x32xf32> to vector<128x32xf32>
    %cst_22 = arith.constant dense<0.000000e+00> : vector<16x32xf32>
    %34 = tpu.matmul %27, %33, %cst_22 {dimension_numbers = #tpu.dot_dimension_numbers<[1], [0], [0], [1], [0, 0, 1, 1], [], []>} : vector<16x128xf32>, vector<128x32xf32>, vector<16x32xf32> -> vector<16x32xf32>
    %c0_23 = arith.constant 0 : index
    %c0_24 = arith.constant 0 : index
    %c0_25 = arith.constant 0 : index
    %c0_26 = arith.constant 0 : index
    %35 = vector.load %arg6[%c0_23, %c0_24, %c0_25, %c0_26] : memref<2x4x128x32xf32, #tpu.memory_space<vmem>>, vector<1x1x128x32xf32>
    %36 = vector.shape_cast %35 : vector<1x1x128x32xf32> to vector<128x32xf32>
    %cst_27 = arith.constant dense<0.000000e+00> : vector<16x32xf32>
    %37 = tpu.matmul %27, %36, %cst_27 {dimension_numbers = #tpu.dot_dimension_numbers<[1], [0], [0], [1], [0, 0, 1, 1], [], []>} : vector<16x128xf32>, vector<128x32xf32>, vector<16x32xf32> -> vector<16x32xf32>
    %38 = tpu.transpose %34, [1, 0] : vector<16x32xf32> -> vector<32x16xf32>
    %cst_28 = arith.constant dense<0.000000e+00> : vector<16x16xf32>
    %39 = tpu.matmul %31, %38, %cst_28 {dimension_numbers = #tpu.dot_dimension_numbers<[1], [0], [0], [1], [0, 0, 1, 1], [], []>} : vector<16x32xf32>, vector<32x16xf32>, vector<16x16xf32> -> vector<16x16xf32>
    %cst_29 = arith.constant 0.176776692 : f32
    %40 = vector.broadcast %cst_29 : f32 to vector<16x16xf32>
    %41 = arith.mulf %39, %40 : vector<16x16xf32>
    %cst_30 = arith.constant dense<0xFF800000> : vector<16xf32>
    %42 = vector.multi_reduction <maximumf>, %41, %cst_30 [1] : vector<16x16xf32> to vector<16xf32>
    %43 = vector.shape_cast %42 : vector<16xf32> to vector<16x1xf32>
    %44 = vector.broadcast %43 : vector<16x1xf32> to vector<16x16xf32>
    %45 = arith.subf %41, %44 : vector<16x16xf32>
    %46 = math.exp %45 : vector<16x16xf32>
    %cst_31 = arith.constant dense<0.000000e+00> : vector<16xf32>
    %47 = vector.multi_reduction <add>, %46, %cst_31 [1] : vector<16x16xf32> to vector<16xf32>
    %48 = vector.shape_cast %47 : vector<16xf32> to vector<16x1xf32>
    %49 = tpu.reciprocal %48 {approx = true} : vector<16x1xf32> -> vector<16x1xf32>
    %50 = vector.broadcast %49 : vector<16x1xf32> to vector<16x16xf32>
    %51 = arith.mulf %46, %50 : vector<16x16xf32>
    %cst_32 = arith.constant dense<0.000000e+00> : vector<16x32xf32>
    %52 = tpu.matmul %51, %37, %cst_32 {dimension_numbers = #tpu.dot_dimension_numbers<[1], [0], [0], [1], [0, 0, 1, 1], [], []>} : vector<16x16xf32>, vector<16x32xf32>, vector<16x32xf32> -> vector<16x32xf32>
    %c0_33 = arith.constant 0 : index
    %c0_34 = arith.constant 0 : index
    %c0_35 = arith.constant 0 : index
    %c0_36 = arith.constant 0 : index
    %53 = vector.load %arg7[%c0_33, %c0_34, %c0_35, %c0_36] : memref<2x4x32x128xf32, #tpu.memory_space<vmem>>, vector<1x1x32x128xf32>
    %54 = vector.shape_cast %53 : vector<1x1x32x128xf32> to vector<32x128xf32>
    %cst_37 = arith.constant dense<0.000000e+00> : vector<16x128xf32>
    %55 = tpu.matmul %52, %54, %cst_37 {dimension_numbers = #tpu.dot_dimension_numbers<[1], [0], [0], [1], [0, 0, 1, 1], [], []>} : vector<16x32xf32>, vector<32x128xf32>, vector<16x128xf32> -> vector<16x128xf32>
    %56 = arith.addf %28, %55 : vector<16x128xf32>
    %c0_38 = arith.constant 0 : index
    %c1 = arith.constant 1 : index
    %c0_39 = arith.constant 0 : index
    %c0_40 = arith.constant 0 : index
    %57 = vector.load %arg4[%c0_38, %c1, %c0_39, %c0_40] : memref<2x4x128x32xf32, #tpu.memory_space<vmem>>, vector<1x1x128x32xf32>
    %58 = vector.shape_cast %57 : vector<1x1x128x32xf32> to vector<128x32xf32>
    %cst_41 = arith.constant dense<0.000000e+00> : vector<16x32xf32>
    %59 = tpu.matmul %27, %58, %cst_41 {dimension_numbers = #tpu.dot_dimension_numbers<[1], [0], [0], [1], [0, 0, 1, 1], [], []>} : vector<16x128xf32>, vector<128x32xf32>, vector<16x32xf32> -> vector<16x32xf32>
    %c0_42 = arith.constant 0 : index
    %c1_43 = arith.constant 1 : index
    %c0_44 = arith.constant 0 : index
    %c0_45 = arith.constant 0 : index
    %60 = vector.load %arg5[%c0_42, %c1_43, %c0_44, %c0_45] : memref<2x4x128x32xf32, #tpu.memory_space<vmem>>, vector<1x1x128x32xf32>
    %61 = vector.shape_cast %60 : vector<1x1x128x32xf32> to vector<128x32xf32>
    %cst_46 = arith.constant dense<0.000000e+00> : vector<16x32xf32>
    %62 = tpu.matmul %27, %61, %cst_46 {dimension_numbers = #tpu.dot_dimension_numbers<[1], [0], [0], [1], [0, 0, 1, 1], [], []>} : vector<16x128xf32>, vector<128x32xf32>, vector<16x32xf32> -> vector<16x32xf32>
    %c0_47 = arith.constant 0 : index
    %c1_48 = arith.constant 1 : index
    %c0_49 = arith.constant 0 : index
    %c0_50 = arith.constant 0 : index
    %63 = vector.load %arg6[%c0_47, %c1_48, %c0_49, %c0_50] : memref<2x4x128x32xf32, #tpu.memory_space<vmem>>, vector<1x1x128x32xf32>
    %64 = vector.shape_cast %63 : vector<1x1x128x32xf32> to vector<128x32xf32>
    %cst_51 = arith.constant dense<0.000000e+00> : vector<16x32xf32>
    %65 = tpu.matmul %27, %64, %cst_51 {dimension_numbers = #tpu.dot_dimension_numbers<[1], [0], [0], [1], [0, 0, 1, 1], [], []>} : vector<16x128xf32>, vector<128x32xf32>, vector<16x32xf32> -> vector<16x32xf32>
    %66 = tpu.transpose %62, [1, 0] : vector<16x32xf32> -> vector<32x16xf32>
    %cst_52 = arith.constant dense<0.000000e+00> : vector<16x16xf32>
    %67 = tpu.matmul %59, %66, %cst_52 {dimension_numbers = #tpu.dot_dimension_numbers<[1], [0], [0], [1], [0, 0, 1, 1], [], []>} : vector<16x32xf32>, vector<32x16xf32>, vector<16x16xf32> -> vector<16x16xf32>
    %cst_53 = arith.constant 0.176776692 : f32
    %68 = vector.broadcast %cst_53 : f32 to vector<16x16xf32>
    %69 = arith.mulf %67, %68 : vector<16x16xf32>
    %cst_54 = arith.constant dense<0xFF800000> : vector<16xf32>
    %70 = vector.multi_reduction <maximumf>, %69, %cst_54 [1] : vector<16x16xf32> to vector<16xf32>
    %71 = vector.shape_cast %70 : vector<16xf32> to vector<16x1xf32>
    %72 = vector.broadcast %71 : vector<16x1xf32> to vector<16x16xf32>
    %73 = arith.subf %69, %72 : vector<16x16xf32>
    %74 = math.exp %73 : vector<16x16xf32>
    %cst_55 = arith.constant dense<0.000000e+00> : vector<16xf32>
    %75 = vector.multi_reduction <add>, %74, %cst_55 [1] : vector<16x16xf32> to vector<16xf32>
    %76 = vector.shape_cast %75 : vector<16xf32> to vector<16x1xf32>
    %77 = tpu.reciprocal %76 {approx = true} : vector<16x1xf32> -> vector<16x1xf32>
    %78 = vector.broadcast %77 : vector<16x1xf32> to vector<16x16xf32>
    %79 = arith.mulf %74, %78 : vector<16x16xf32>
    %cst_56 = arith.constant dense<0.000000e+00> : vector<16x32xf32>
    %80 = tpu.matmul %79, %65, %cst_56 {dimension_numbers = #tpu.dot_dimension_numbers<[1], [0], [0], [1], [0, 0, 1, 1], [], []>} : vector<16x16xf32>, vector<16x32xf32>, vector<16x32xf32> -> vector<16x32xf32>
    %c0_57 = arith.constant 0 : index
    %c1_58 = arith.constant 1 : index
    %c0_59 = arith.constant 0 : index
    %c0_60 = arith.constant 0 : index
    %81 = vector.load %arg7[%c0_57, %c1_58, %c0_59, %c0_60] : memref<2x4x32x128xf32, #tpu.memory_space<vmem>>, vector<1x1x32x128xf32>
    %82 = vector.shape_cast %81 : vector<1x1x32x128xf32> to vector<32x128xf32>
    %cst_61 = arith.constant dense<0.000000e+00> : vector<16x128xf32>
    %83 = tpu.matmul %80, %82, %cst_61 {dimension_numbers = #tpu.dot_dimension_numbers<[1], [0], [0], [1], [0, 0, 1, 1], [], []>} : vector<16x32xf32>, vector<32x128xf32>, vector<16x128xf32> -> vector<16x128xf32>
    %84 = arith.addf %56, %83 : vector<16x128xf32>
    %c0_62 = arith.constant 0 : index
    %c2 = arith.constant 2 : index
    %c0_63 = arith.constant 0 : index
    %c0_64 = arith.constant 0 : index
    %85 = vector.load %arg4[%c0_62, %c2, %c0_63, %c0_64] : memref<2x4x128x32xf32, #tpu.memory_space<vmem>>, vector<1x1x128x32xf32>
    %86 = vector.shape_cast %85 : vector<1x1x128x32xf32> to vector<128x32xf32>
    %cst_65 = arith.constant dense<0.000000e+00> : vector<16x32xf32>
    %87 = tpu.matmul %27, %86, %cst_65 {dimension_numbers = #tpu.dot_dimension_numbers<[1], [0], [0], [1], [0, 0, 1, 1], [], []>} : vector<16x128xf32>, vector<128x32xf32>, vector<16x32xf32> -> vector<16x32xf32>
    %c0_66 = arith.constant 0 : index
    %c2_67 = arith.constant 2 : index
    %c0_68 = arith.constant 0 : index
    %c0_69 = arith.constant 0 : index
    %88 = vector.load %arg5[%c0_66, %c2_67, %c0_68, %c0_69] : memref<2x4x128x32xf32, #tpu.memory_space<vmem>>, vector<1x1x128x32xf32>
    %89 = vector.shape_cast %88 : vector<1x1x128x32xf32> to vector<128x32xf32>
    %cst_70 = arith.constant dense<0.000000e+00> : vector<16x32xf32>
    %90 = tpu.matmul %27, %89, %cst_70 {dimension_numbers = #tpu.dot_dimension_numbers<[1], [0], [0], [1], [0, 0, 1, 1], [], []>} : vector<16x128xf32>, vector<128x32xf32>, vector<16x32xf32> -> vector<16x32xf32>
    %c0_71 = arith.constant 0 : index
    %c2_72 = arith.constant 2 : index
    %c0_73 = arith.constant 0 : index
    %c0_74 = arith.constant 0 : index
    %91 = vector.load %arg6[%c0_71, %c2_72, %c0_73, %c0_74] : memref<2x4x128x32xf32, #tpu.memory_space<vmem>>, vector<1x1x128x32xf32>
    %92 = vector.shape_cast %91 : vector<1x1x128x32xf32> to vector<128x32xf32>
    %cst_75 = arith.constant dense<0.000000e+00> : vector<16x32xf32>
    %93 = tpu.matmul %27, %92, %cst_75 {dimension_numbers = #tpu.dot_dimension_numbers<[1], [0], [0], [1], [0, 0, 1, 1], [], []>} : vector<16x128xf32>, vector<128x32xf32>, vector<16x32xf32> -> vector<16x32xf32>
    %94 = tpu.transpose %90, [1, 0] : vector<16x32xf32> -> vector<32x16xf32>
    %cst_76 = arith.constant dense<0.000000e+00> : vector<16x16xf32>
    %95 = tpu.matmul %87, %94, %cst_76 {dimension_numbers = #tpu.dot_dimension_numbers<[1], [0], [0], [1], [0, 0, 1, 1], [], []>} : vector<16x32xf32>, vector<32x16xf32>, vector<16x16xf32> -> vector<16x16xf32>
    %cst_77 = arith.constant 0.176776692 : f32
    %96 = vector.broadcast %cst_77 : f32 to vector<16x16xf32>
    %97 = arith.mulf %95, %96 : vector<16x16xf32>
    %cst_78 = arith.constant dense<0xFF800000> : vector<16xf32>
    %98 = vector.multi_reduction <maximumf>, %97, %cst_78 [1] : vector<16x16xf32> to vector<16xf32>
    %99 = vector.shape_cast %98 : vector<16xf32> to vector<16x1xf32>
    %100 = vector.broadcast %99 : vector<16x1xf32> to vector<16x16xf32>
    %101 = arith.subf %97, %100 : vector<16x16xf32>
    %102 = math.exp %101 : vector<16x16xf32>
    %cst_79 = arith.constant dense<0.000000e+00> : vector<16xf32>
    %103 = vector.multi_reduction <add>, %102, %cst_79 [1] : vector<16x16xf32> to vector<16xf32>
    %104 = vector.shape_cast %103 : vector<16xf32> to vector<16x1xf32>
    %105 = tpu.reciprocal %104 {approx = true} : vector<16x1xf32> -> vector<16x1xf32>
    %106 = vector.broadcast %105 : vector<16x1xf32> to vector<16x16xf32>
    %107 = arith.mulf %102, %106 : vector<16x16xf32>
    %cst_80 = arith.constant dense<0.000000e+00> : vector<16x32xf32>
    %108 = tpu.matmul %107, %93, %cst_80 {dimension_numbers = #tpu.dot_dimension_numbers<[1], [0], [0], [1], [0, 0, 1, 1], [], []>} : vector<16x16xf32>, vector<16x32xf32>, vector<16x32xf32> -> vector<16x32xf32>
    %c0_81 = arith.constant 0 : index
    %c2_82 = arith.constant 2 : index
    %c0_83 = arith.constant 0 : index
    %c0_84 = arith.constant 0 : index
    %109 = vector.load %arg7[%c0_81, %c2_82, %c0_83, %c0_84] : memref<2x4x32x128xf32, #tpu.memory_space<vmem>>, vector<1x1x32x128xf32>
    %110 = vector.shape_cast %109 : vector<1x1x32x128xf32> to vector<32x128xf32>
    %cst_85 = arith.constant dense<0.000000e+00> : vector<16x128xf32>
    %111 = tpu.matmul %108, %110, %cst_85 {dimension_numbers = #tpu.dot_dimension_numbers<[1], [0], [0], [1], [0, 0, 1, 1], [], []>} : vector<16x32xf32>, vector<32x128xf32>, vector<16x128xf32> -> vector<16x128xf32>
    %112 = arith.addf %84, %111 : vector<16x128xf32>
    %c0_86 = arith.constant 0 : index
    %c3 = arith.constant 3 : index
    %c0_87 = arith.constant 0 : index
    %c0_88 = arith.constant 0 : index
    %113 = vector.load %arg4[%c0_86, %c3, %c0_87, %c0_88] : memref<2x4x128x32xf32, #tpu.memory_space<vmem>>, vector<1x1x128x32xf32>
    %114 = vector.shape_cast %113 : vector<1x1x128x32xf32> to vector<128x32xf32>
    %cst_89 = arith.constant dense<0.000000e+00> : vector<16x32xf32>
    %115 = tpu.matmul %27, %114, %cst_89 {dimension_numbers = #tpu.dot_dimension_numbers<[1], [0], [0], [1], [0, 0, 1, 1], [], []>} : vector<16x128xf32>, vector<128x32xf32>, vector<16x32xf32> -> vector<16x32xf32>
    %c0_90 = arith.constant 0 : index
    %c3_91 = arith.constant 3 : index
    %c0_92 = arith.constant 0 : index
    %c0_93 = arith.constant 0 : index
    %116 = vector.load %arg5[%c0_90, %c3_91, %c0_92, %c0_93] : memref<2x4x128x32xf32, #tpu.memory_space<vmem>>, vector<1x1x128x32xf32>
    %117 = vector.shape_cast %116 : vector<1x1x128x32xf32> to vector<128x32xf32>
    %cst_94 = arith.constant dense<0.000000e+00> : vector<16x32xf32>
    %118 = tpu.matmul %27, %117, %cst_94 {dimension_numbers = #tpu.dot_dimension_numbers<[1], [0], [0], [1], [0, 0, 1, 1], [], []>} : vector<16x128xf32>, vector<128x32xf32>, vector<16x32xf32> -> vector<16x32xf32>
    %c0_95 = arith.constant 0 : index
    %c3_96 = arith.constant 3 : index
    %c0_97 = arith.constant 0 : index
    %c0_98 = arith.constant 0 : index
    %119 = vector.load %arg6[%c0_95, %c3_96, %c0_97, %c0_98] : memref<2x4x128x32xf32, #tpu.memory_space<vmem>>, vector<1x1x128x32xf32>
    %120 = vector.shape_cast %119 : vector<1x1x128x32xf32> to vector<128x32xf32>
    %cst_99 = arith.constant dense<0.000000e+00> : vector<16x32xf32>
    %121 = tpu.matmul %27, %120, %cst_99 {dimension_numbers = #tpu.dot_dimension_numbers<[1], [0], [0], [1], [0, 0, 1, 1], [], []>} : vector<16x128xf32>, vector<128x32xf32>, vector<16x32xf32> -> vector<16x32xf32>
    %122 = tpu.transpose %118, [1, 0] : vector<16x32xf32> -> vector<32x16xf32>
    %cst_100 = arith.constant dense<0.000000e+00> : vector<16x16xf32>
    %123 = tpu.matmul %115, %122, %cst_100 {dimension_numbers = #tpu.dot_dimension_numbers<[1], [0], [0], [1], [0, 0, 1, 1], [], []>} : vector<16x32xf32>, vector<32x16xf32>, vector<16x16xf32> -> vector<16x16xf32>
    %cst_101 = arith.constant 0.176776692 : f32
    %124 = vector.broadcast %cst_101 : f32 to vector<16x16xf32>
    %125 = arith.mulf %123, %124 : vector<16x16xf32>
    %cst_102 = arith.constant dense<0xFF800000> : vector<16xf32>
    %126 = vector.multi_reduction <maximumf>, %125, %cst_102 [1] : vector<16x16xf32> to vector<16xf32>
    %127 = vector.shape_cast %126 : vector<16xf32> to vector<16x1xf32>
    %128 = vector.broadcast %127 : vector<16x1xf32> to vector<16x16xf32>
    %129 = arith.subf %125, %128 : vector<16x16xf32>
    %130 = math.exp %129 : vector<16x16xf32>
    %cst_103 = arith.constant dense<0.000000e+00> : vector<16xf32>
    %131 = vector.multi_reduction <add>, %130, %cst_103 [1] : vector<16x16xf32> to vector<16xf32>
    %132 = vector.shape_cast %131 : vector<16xf32> to vector<16x1xf32>
    %133 = tpu.reciprocal %132 {approx = true} : vector<16x1xf32> -> vector<16x1xf32>
    %134 = vector.broadcast %133 : vector<16x1xf32> to vector<16x16xf32>
    %135 = arith.mulf %130, %134 : vector<16x16xf32>
    %cst_104 = arith.constant dense<0.000000e+00> : vector<16x32xf32>
    %136 = tpu.matmul %135, %121, %cst_104 {dimension_numbers = #tpu.dot_dimension_numbers<[1], [0], [0], [1], [0, 0, 1, 1], [], []>} : vector<16x16xf32>, vector<16x32xf32>, vector<16x32xf32> -> vector<16x32xf32>
    %c0_105 = arith.constant 0 : index
    %c3_106 = arith.constant 3 : index
    %c0_107 = arith.constant 0 : index
    %c0_108 = arith.constant 0 : index
    %137 = vector.load %arg7[%c0_105, %c3_106, %c0_107, %c0_108] : memref<2x4x32x128xf32, #tpu.memory_space<vmem>>, vector<1x1x32x128xf32>
    %138 = vector.shape_cast %137 : vector<1x1x32x128xf32> to vector<32x128xf32>
    %cst_109 = arith.constant dense<0.000000e+00> : vector<16x128xf32>
    %139 = tpu.matmul %136, %138, %cst_109 {dimension_numbers = #tpu.dot_dimension_numbers<[1], [0], [0], [1], [0, 0, 1, 1], [], []>} : vector<16x32xf32>, vector<32x128xf32>, vector<16x128xf32> -> vector<16x128xf32>
    %140 = arith.addf %112, %139 : vector<16x128xf32>
    %141 = arith.addf %1, %140 : vector<16x128xf32>
    %c0_110 = arith.constant 0 : index
    %c0_111 = arith.constant 0 : index
    %c0_112 = arith.constant 0 : index
    %142 = vector.load %arg8[%c0_110, %c0_111, %c0_112] : memref<2x1x128xf32, #tpu.memory_space<vmem>>, vector<1x1x128xf32>
    %143 = vector.shape_cast %142 : vector<1x1x128xf32> to vector<1x128xf32>
    %144 = vector.broadcast %143 : vector<1x128xf32> to vector<16x128xf32>
    %145 = arith.addf %141, %144 : vector<16x128xf32>
    %c0_113 = arith.constant 0 : index
    %c0_114 = arith.constant 0 : index
    %c0_115 = arith.constant 0 : index
    %146 = vector.load %arg9[%c0_113, %c0_114, %c0_115] : memref<2x1x128xf32, #tpu.memory_space<vmem>>, vector<1x1x128xf32>
    %147 = vector.shape_cast %146 : vector<1x1x128xf32> to vector<1x128xf32>
    %c0_116 = arith.constant 0 : index
    %c0_117 = arith.constant 0 : index
    %c0_118 = arith.constant 0 : index
    %148 = vector.load %arg10[%c0_116, %c0_117, %c0_118] : memref<2x1x128xf32, #tpu.memory_space<vmem>>, vector<1x1x128xf32>
    %149 = vector.shape_cast %148 : vector<1x1x128xf32> to vector<1x128xf32>
    %cst_119 = arith.constant dense<0.000000e+00> : vector<16xf32>
    %150 = vector.multi_reduction <add>, %145, %cst_119 [1] : vector<16x128xf32> to vector<16xf32>
    %151 = vector.shape_cast %150 : vector<16xf32> to vector<16x1xf32>
    %cst_120 = arith.constant 1.280000e+02 : f32
    %152 = vector.broadcast %cst_120 : f32 to vector<16x1xf32>
    %153 = arith.divf %151, %152 : vector<16x1xf32>
    %154 = vector.broadcast %153 : vector<16x1xf32> to vector<16x128xf32>
    %155 = arith.subf %145, %154 : vector<16x128xf32>
    %156 = arith.mulf %155, %155 : vector<16x128xf32>
    %cst_121 = arith.constant dense<0.000000e+00> : vector<16xf32>
    %157 = vector.multi_reduction <add>, %156, %cst_121 [1] : vector<16x128xf32> to vector<16xf32>
    %158 = vector.shape_cast %157 : vector<16xf32> to vector<16x1xf32>
    %cst_122 = arith.constant 1.280000e+02 : f32
    %159 = vector.broadcast %cst_122 : f32 to vector<16x1xf32>
    %160 = arith.divf %158, %159 : vector<16x1xf32>
    %161 = vector.broadcast %153 : vector<16x1xf32> to vector<16x128xf32>
    %162 = arith.subf %145, %161 : vector<16x128xf32>
    %cst_123 = arith.constant 9.99999974E-6 : f32
    %163 = vector.broadcast %cst_123 : f32 to vector<16x1xf32>
    %164 = arith.addf %160, %163 : vector<16x1xf32>
    %165 = math.rsqrt %164 : vector<16x1xf32>
    %166 = vector.broadcast %165 : vector<16x1xf32> to vector<16x128xf32>
    %167 = arith.mulf %162, %166 : vector<16x128xf32>
    %168 = vector.broadcast %147 : vector<1x128xf32> to vector<16x128xf32>
    %169 = arith.mulf %167, %168 : vector<16x128xf32>
    %170 = vector.broadcast %149 : vector<1x128xf32> to vector<16x128xf32>
    %171 = arith.addf %169, %170 : vector<16x128xf32>
    %c0_124 = arith.constant 0 : index
    %c0_125 = arith.constant 0 : index
    %c0_126 = arith.constant 0 : index
    %172 = vector.load %arg11[%c0_124, %c0_125, %c0_126] : memref<2x128x256xf32, #tpu.memory_space<vmem>>, vector<1x128x256xf32>
    %173 = vector.shape_cast %172 : vector<1x128x256xf32> to vector<128x256xf32>
    %cst_127 = arith.constant dense<0.000000e+00> : vector<16x256xf32>
    %174 = tpu.matmul %171, %173, %cst_127 {dimension_numbers = #tpu.dot_dimension_numbers<[1], [0], [0], [1], [0, 0, 1, 1], [], []>} : vector<16x128xf32>, vector<128x256xf32>, vector<16x256xf32> -> vector<16x256xf32>
    %c0_128 = arith.constant 0 : index
    %c0_129 = arith.constant 0 : index
    %c0_130 = arith.constant 0 : index
    %175 = vector.load %arg12[%c0_128, %c0_129, %c0_130] : memref<2x1x256xf32, #tpu.memory_space<vmem>>, vector<1x1x256xf32>
    %176 = vector.shape_cast %175 : vector<1x1x256xf32> to vector<1x256xf32>
    %177 = vector.broadcast %176 : vector<1x256xf32> to vector<16x256xf32>
    %178 = arith.addf %174, %177 : vector<16x256xf32>
    %cst_131 = arith.constant 5.000000e-01 : f32
    %179 = vector.broadcast %cst_131 : f32 to vector<16x256xf32>
    %180 = arith.mulf %179, %178 : vector<16x256xf32>
    %cst_132 = arith.constant 4.471500e-02 : f32
    %181 = vector.broadcast %cst_132 : f32 to vector<16x256xf32>
    %182 = arith.mulf %181, %178 : vector<16x256xf32>
    %183 = arith.mulf %182, %178 : vector<16x256xf32>
    %184 = arith.mulf %183, %178 : vector<16x256xf32>
    %185 = arith.addf %178, %184 : vector<16x256xf32>
    %cst_133 = arith.constant 0.797884583 : f32
    %186 = vector.broadcast %cst_133 : f32 to vector<16x256xf32>
    %187 = arith.mulf %186, %185 : vector<16x256xf32>
    %188 = math.tanh %187 : vector<16x256xf32>
    %cst_134 = arith.constant 1.000000e+00 : f32
    %189 = vector.broadcast %cst_134 : f32 to vector<16x256xf32>
    %190 = arith.addf %189, %188 : vector<16x256xf32>
    %191 = arith.mulf %180, %190 : vector<16x256xf32>
    %c0_135 = arith.constant 0 : index
    %c0_136 = arith.constant 0 : index
    %c0_137 = arith.constant 0 : index
    %192 = vector.load %arg13[%c0_135, %c0_136, %c0_137] : memref<2x256x128xf32, #tpu.memory_space<vmem>>, vector<1x256x128xf32>
    %193 = vector.shape_cast %192 : vector<1x256x128xf32> to vector<256x128xf32>
    %cst_138 = arith.constant dense<0.000000e+00> : vector<16x128xf32>
    %194 = tpu.matmul %191, %193, %cst_138 {dimension_numbers = #tpu.dot_dimension_numbers<[1], [0], [0], [1], [0, 0, 1, 1], [], []>} : vector<16x256xf32>, vector<256x128xf32>, vector<16x128xf32> -> vector<16x128xf32>
    %195 = arith.addf %145, %194 : vector<16x128xf32>
    %c0_139 = arith.constant 0 : index
    %c0_140 = arith.constant 0 : index
    %c0_141 = arith.constant 0 : index
    %196 = vector.load %arg14[%c0_139, %c0_140, %c0_141] : memref<2x1x128xf32, #tpu.memory_space<vmem>>, vector<1x1x128xf32>
    %197 = vector.shape_cast %196 : vector<1x1x128xf32> to vector<1x128xf32>
    %198 = vector.broadcast %197 : vector<1x128xf32> to vector<16x128xf32>
    %199 = arith.addf %195, %198 : vector<16x128xf32>
    %c1_142 = arith.constant 1 : index
    %c0_143 = arith.constant 0 : index
    %c0_144 = arith.constant 0 : index
    %200 = vector.load %arg2[%c1_142, %c0_143, %c0_144] : memref<2x1x128xf32, #tpu.memory_space<vmem>>, vector<1x1x128xf32>
    %201 = vector.shape_cast %200 : vector<1x1x128xf32> to vector<1x128xf32>
    %c1_145 = arith.constant 1 : index
    %c0_146 = arith.constant 0 : index
    %c0_147 = arith.constant 0 : index
    %202 = vector.load %arg3[%c1_145, %c0_146, %c0_147] : memref<2x1x128xf32, #tpu.memory_space<vmem>>, vector<1x1x128xf32>
    %203 = vector.shape_cast %202 : vector<1x1x128xf32> to vector<1x128xf32>
    %cst_148 = arith.constant dense<0.000000e+00> : vector<16xf32>
    %204 = vector.multi_reduction <add>, %199, %cst_148 [1] : vector<16x128xf32> to vector<16xf32>
    %205 = vector.shape_cast %204 : vector<16xf32> to vector<16x1xf32>
    %cst_149 = arith.constant 1.280000e+02 : f32
    %206 = vector.broadcast %cst_149 : f32 to vector<16x1xf32>
    %207 = arith.divf %205, %206 : vector<16x1xf32>
    %208 = vector.broadcast %207 : vector<16x1xf32> to vector<16x128xf32>
    %209 = arith.subf %199, %208 : vector<16x128xf32>
    %210 = arith.mulf %209, %209 : vector<16x128xf32>
    %cst_150 = arith.constant dense<0.000000e+00> : vector<16xf32>
    %211 = vector.multi_reduction <add>, %210, %cst_150 [1] : vector<16x128xf32> to vector<16xf32>
    %212 = vector.shape_cast %211 : vector<16xf32> to vector<16x1xf32>
    %cst_151 = arith.constant 1.280000e+02 : f32
    %213 = vector.broadcast %cst_151 : f32 to vector<16x1xf32>
    %214 = arith.divf %212, %213 : vector<16x1xf32>
    %215 = vector.broadcast %207 : vector<16x1xf32> to vector<16x128xf32>
    %216 = arith.subf %199, %215 : vector<16x128xf32>
    %cst_152 = arith.constant 9.99999974E-6 : f32
    %217 = vector.broadcast %cst_152 : f32 to vector<16x1xf32>
    %218 = arith.addf %214, %217 : vector<16x1xf32>
    %219 = math.rsqrt %218 : vector<16x1xf32>
    %220 = vector.broadcast %219 : vector<16x1xf32> to vector<16x128xf32>
    %221 = arith.mulf %216, %220 : vector<16x128xf32>
    %222 = vector.broadcast %201 : vector<1x128xf32> to vector<16x128xf32>
    %223 = arith.mulf %221, %222 : vector<16x128xf32>
    %224 = vector.broadcast %203 : vector<1x128xf32> to vector<16x128xf32>
    %225 = arith.addf %223, %224 : vector<16x128xf32>
    %cst_153 = arith.constant 0.000000e+00 : f32
    %226 = vector.broadcast %cst_153 : f32 to vector<16x128xf32>
    %c1_154 = arith.constant 1 : index
    %c0_155 = arith.constant 0 : index
    %c0_156 = arith.constant 0 : index
    %c0_157 = arith.constant 0 : index
    %227 = vector.load %arg4[%c1_154, %c0_155, %c0_156, %c0_157] : memref<2x4x128x32xf32, #tpu.memory_space<vmem>>, vector<1x1x128x32xf32>
    %228 = vector.shape_cast %227 : vector<1x1x128x32xf32> to vector<128x32xf32>
    %cst_158 = arith.constant dense<0.000000e+00> : vector<16x32xf32>
    %229 = tpu.matmul %225, %228, %cst_158 {dimension_numbers = #tpu.dot_dimension_numbers<[1], [0], [0], [1], [0, 0, 1, 1], [], []>} : vector<16x128xf32>, vector<128x32xf32>, vector<16x32xf32> -> vector<16x32xf32>
    %c1_159 = arith.constant 1 : index
    %c0_160 = arith.constant 0 : index
    %c0_161 = arith.constant 0 : index
    %c0_162 = arith.constant 0 : index
    %230 = vector.load %arg5[%c1_159, %c0_160, %c0_161, %c0_162] : memref<2x4x128x32xf32, #tpu.memory_space<vmem>>, vector<1x1x128x32xf32>
    %231 = vector.shape_cast %230 : vector<1x1x128x32xf32> to vector<128x32xf32>
    %cst_163 = arith.constant dense<0.000000e+00> : vector<16x32xf32>
    %232 = tpu.matmul %225, %231, %cst_163 {dimension_numbers = #tpu.dot_dimension_numbers<[1], [0], [0], [1], [0, 0, 1, 1], [], []>} : vector<16x128xf32>, vector<128x32xf32>, vector<16x32xf32> -> vector<16x32xf32>
    %c1_164 = arith.constant 1 : index
    %c0_165 = arith.constant 0 : index
    %c0_166 = arith.constant 0 : index
    %c0_167 = arith.constant 0 : index
    %233 = vector.load %arg6[%c1_164, %c0_165, %c0_166, %c0_167] : memref<2x4x128x32xf32, #tpu.memory_space<vmem>>, vector<1x1x128x32xf32>
    %234 = vector.shape_cast %233 : vector<1x1x128x32xf32> to vector<128x32xf32>
    %cst_168 = arith.constant dense<0.000000e+00> : vector<16x32xf32>
    %235 = tpu.matmul %225, %234, %cst_168 {dimension_numbers = #tpu.dot_dimension_numbers<[1], [0], [0], [1], [0, 0, 1, 1], [], []>} : vector<16x128xf32>, vector<128x32xf32>, vector<16x32xf32> -> vector<16x32xf32>
    %236 = tpu.transpose %232, [1, 0] : vector<16x32xf32> -> vector<32x16xf32>
    %cst_169 = arith.constant dense<0.000000e+00> : vector<16x16xf32>
    %237 = tpu.matmul %229, %236, %cst_169 {dimension_numbers = #tpu.dot_dimension_numbers<[1], [0], [0], [1], [0, 0, 1, 1], [], []>} : vector<16x32xf32>, vector<32x16xf32>, vector<16x16xf32> -> vector<16x16xf32>
    %cst_170 = arith.constant 0.176776692 : f32
    %238 = vector.broadcast %cst_170 : f32 to vector<16x16xf32>
    %239 = arith.mulf %237, %238 : vector<16x16xf32>
    %cst_171 = arith.constant dense<0xFF800000> : vector<16xf32>
    %240 = vector.multi_reduction <maximumf>, %239, %cst_171 [1] : vector<16x16xf32> to vector<16xf32>
    %241 = vector.shape_cast %240 : vector<16xf32> to vector<16x1xf32>
    %242 = vector.broadcast %241 : vector<16x1xf32> to vector<16x16xf32>
    %243 = arith.subf %239, %242 : vector<16x16xf32>
    %244 = math.exp %243 : vector<16x16xf32>
    %cst_172 = arith.constant dense<0.000000e+00> : vector<16xf32>
    %245 = vector.multi_reduction <add>, %244, %cst_172 [1] : vector<16x16xf32> to vector<16xf32>
    %246 = vector.shape_cast %245 : vector<16xf32> to vector<16x1xf32>
    %247 = tpu.reciprocal %246 {approx = true} : vector<16x1xf32> -> vector<16x1xf32>
    %248 = vector.broadcast %247 : vector<16x1xf32> to vector<16x16xf32>
    %249 = arith.mulf %244, %248 : vector<16x16xf32>
    %cst_173 = arith.constant dense<0.000000e+00> : vector<16x32xf32>
    %250 = tpu.matmul %249, %235, %cst_173 {dimension_numbers = #tpu.dot_dimension_numbers<[1], [0], [0], [1], [0, 0, 1, 1], [], []>} : vector<16x16xf32>, vector<16x32xf32>, vector<16x32xf32> -> vector<16x32xf32>
    %c1_174 = arith.constant 1 : index
    %c0_175 = arith.constant 0 : index
    %c0_176 = arith.constant 0 : index
    %c0_177 = arith.constant 0 : index
    %251 = vector.load %arg7[%c1_174, %c0_175, %c0_176, %c0_177] : memref<2x4x32x128xf32, #tpu.memory_space<vmem>>, vector<1x1x32x128xf32>
    %252 = vector.shape_cast %251 : vector<1x1x32x128xf32> to vector<32x128xf32>
    %cst_178 = arith.constant dense<0.000000e+00> : vector<16x128xf32>
    %253 = tpu.matmul %250, %252, %cst_178 {dimension_numbers = #tpu.dot_dimension_numbers<[1], [0], [0], [1], [0, 0, 1, 1], [], []>} : vector<16x32xf32>, vector<32x128xf32>, vector<16x128xf32> -> vector<16x128xf32>
    %254 = arith.addf %226, %253 : vector<16x128xf32>
    %c1_179 = arith.constant 1 : index
    %c1_180 = arith.constant 1 : index
    %c0_181 = arith.constant 0 : index
    %c0_182 = arith.constant 0 : index
    %255 = vector.load %arg4[%c1_179, %c1_180, %c0_181, %c0_182] : memref<2x4x128x32xf32, #tpu.memory_space<vmem>>, vector<1x1x128x32xf32>
    %256 = vector.shape_cast %255 : vector<1x1x128x32xf32> to vector<128x32xf32>
    %cst_183 = arith.constant dense<0.000000e+00> : vector<16x32xf32>
    %257 = tpu.matmul %225, %256, %cst_183 {dimension_numbers = #tpu.dot_dimension_numbers<[1], [0], [0], [1], [0, 0, 1, 1], [], []>} : vector<16x128xf32>, vector<128x32xf32>, vector<16x32xf32> -> vector<16x32xf32>
    %c1_184 = arith.constant 1 : index
    %c1_185 = arith.constant 1 : index
    %c0_186 = arith.constant 0 : index
    %c0_187 = arith.constant 0 : index
    %258 = vector.load %arg5[%c1_184, %c1_185, %c0_186, %c0_187] : memref<2x4x128x32xf32, #tpu.memory_space<vmem>>, vector<1x1x128x32xf32>
    %259 = vector.shape_cast %258 : vector<1x1x128x32xf32> to vector<128x32xf32>
    %cst_188 = arith.constant dense<0.000000e+00> : vector<16x32xf32>
    %260 = tpu.matmul %225, %259, %cst_188 {dimension_numbers = #tpu.dot_dimension_numbers<[1], [0], [0], [1], [0, 0, 1, 1], [], []>} : vector<16x128xf32>, vector<128x32xf32>, vector<16x32xf32> -> vector<16x32xf32>
    %c1_189 = arith.constant 1 : index
    %c1_190 = arith.constant 1 : index
    %c0_191 = arith.constant 0 : index
    %c0_192 = arith.constant 0 : index
    %261 = vector.load %arg6[%c1_189, %c1_190, %c0_191, %c0_192] : memref<2x4x128x32xf32, #tpu.memory_space<vmem>>, vector<1x1x128x32xf32>
    %262 = vector.shape_cast %261 : vector<1x1x128x32xf32> to vector<128x32xf32>
    %cst_193 = arith.constant dense<0.000000e+00> : vector<16x32xf32>
    %263 = tpu.matmul %225, %262, %cst_193 {dimension_numbers = #tpu.dot_dimension_numbers<[1], [0], [0], [1], [0, 0, 1, 1], [], []>} : vector<16x128xf32>, vector<128x32xf32>, vector<16x32xf32> -> vector<16x32xf32>
    %264 = tpu.transpose %260, [1, 0] : vector<16x32xf32> -> vector<32x16xf32>
    %cst_194 = arith.constant dense<0.000000e+00> : vector<16x16xf32>
    %265 = tpu.matmul %257, %264, %cst_194 {dimension_numbers = #tpu.dot_dimension_numbers<[1], [0], [0], [1], [0, 0, 1, 1], [], []>} : vector<16x32xf32>, vector<32x16xf32>, vector<16x16xf32> -> vector<16x16xf32>
    %cst_195 = arith.constant 0.176776692 : f32
    %266 = vector.broadcast %cst_195 : f32 to vector<16x16xf32>
    %267 = arith.mulf %265, %266 : vector<16x16xf32>
    %cst_196 = arith.constant dense<0xFF800000> : vector<16xf32>
    %268 = vector.multi_reduction <maximumf>, %267, %cst_196 [1] : vector<16x16xf32> to vector<16xf32>
    %269 = vector.shape_cast %268 : vector<16xf32> to vector<16x1xf32>
    %270 = vector.broadcast %269 : vector<16x1xf32> to vector<16x16xf32>
    %271 = arith.subf %267, %270 : vector<16x16xf32>
    %272 = math.exp %271 : vector<16x16xf32>
    %cst_197 = arith.constant dense<0.000000e+00> : vector<16xf32>
    %273 = vector.multi_reduction <add>, %272, %cst_197 [1] : vector<16x16xf32> to vector<16xf32>
    %274 = vector.shape_cast %273 : vector<16xf32> to vector<16x1xf32>
    %275 = tpu.reciprocal %274 {approx = true} : vector<16x1xf32> -> vector<16x1xf32>
    %276 = vector.broadcast %275 : vector<16x1xf32> to vector<16x16xf32>
    %277 = arith.mulf %272, %276 : vector<16x16xf32>
    %cst_198 = arith.constant dense<0.000000e+00> : vector<16x32xf32>
    %278 = tpu.matmul %277, %263, %cst_198 {dimension_numbers = #tpu.dot_dimension_numbers<[1], [0], [0], [1], [0, 0, 1, 1], [], []>} : vector<16x16xf32>, vector<16x32xf32>, vector<16x32xf32> -> vector<16x32xf32>
    %c1_199 = arith.constant 1 : index
    %c1_200 = arith.constant 1 : index
    %c0_201 = arith.constant 0 : index
    %c0_202 = arith.constant 0 : index
    %279 = vector.load %arg7[%c1_199, %c1_200, %c0_201, %c0_202] : memref<2x4x32x128xf32, #tpu.memory_space<vmem>>, vector<1x1x32x128xf32>
    %280 = vector.shape_cast %279 : vector<1x1x32x128xf32> to vector<32x128xf32>
    %cst_203 = arith.constant dense<0.000000e+00> : vector<16x128xf32>
    %281 = tpu.matmul %278, %280, %cst_203 {dimension_numbers = #tpu.dot_dimension_numbers<[1], [0], [0], [1], [0, 0, 1, 1], [], []>} : vector<16x32xf32>, vector<32x128xf32>, vector<16x128xf32> -> vector<16x128xf32>
    %282 = arith.addf %254, %281 : vector<16x128xf32>
    %c1_204 = arith.constant 1 : index
    %c2_205 = arith.constant 2 : index
    %c0_206 = arith.constant 0 : index
    %c0_207 = arith.constant 0 : index
    %283 = vector.load %arg4[%c1_204, %c2_205, %c0_206, %c0_207] : memref<2x4x128x32xf32, #tpu.memory_space<vmem>>, vector<1x1x128x32xf32>
    %284 = vector.shape_cast %283 : vector<1x1x128x32xf32> to vector<128x32xf32>
    %cst_208 = arith.constant dense<0.000000e+00> : vector<16x32xf32>
    %285 = tpu.matmul %225, %284, %cst_208 {dimension_numbers = #tpu.dot_dimension_numbers<[1], [0], [0], [1], [0, 0, 1, 1], [], []>} : vector<16x128xf32>, vector<128x32xf32>, vector<16x32xf32> -> vector<16x32xf32>
    %c1_209 = arith.constant 1 : index
    %c2_210 = arith.constant 2 : index
    %c0_211 = arith.constant 0 : index
    %c0_212 = arith.constant 0 : index
    %286 = vector.load %arg5[%c1_209, %c2_210, %c0_211, %c0_212] : memref<2x4x128x32xf32, #tpu.memory_space<vmem>>, vector<1x1x128x32xf32>
    %287 = vector.shape_cast %286 : vector<1x1x128x32xf32> to vector<128x32xf32>
    %cst_213 = arith.constant dense<0.000000e+00> : vector<16x32xf32>
    %288 = tpu.matmul %225, %287, %cst_213 {dimension_numbers = #tpu.dot_dimension_numbers<[1], [0], [0], [1], [0, 0, 1, 1], [], []>} : vector<16x128xf32>, vector<128x32xf32>, vector<16x32xf32> -> vector<16x32xf32>
    %c1_214 = arith.constant 1 : index
    %c2_215 = arith.constant 2 : index
    %c0_216 = arith.constant 0 : index
    %c0_217 = arith.constant 0 : index
    %289 = vector.load %arg6[%c1_214, %c2_215, %c0_216, %c0_217] : memref<2x4x128x32xf32, #tpu.memory_space<vmem>>, vector<1x1x128x32xf32>
    %290 = vector.shape_cast %289 : vector<1x1x128x32xf32> to vector<128x32xf32>
    %cst_218 = arith.constant dense<0.000000e+00> : vector<16x32xf32>
    %291 = tpu.matmul %225, %290, %cst_218 {dimension_numbers = #tpu.dot_dimension_numbers<[1], [0], [0], [1], [0, 0, 1, 1], [], []>} : vector<16x128xf32>, vector<128x32xf32>, vector<16x32xf32> -> vector<16x32xf32>
    %292 = tpu.transpose %288, [1, 0] : vector<16x32xf32> -> vector<32x16xf32>
    %cst_219 = arith.constant dense<0.000000e+00> : vector<16x16xf32>
    %293 = tpu.matmul %285, %292, %cst_219 {dimension_numbers = #tpu.dot_dimension_numbers<[1], [0], [0], [1], [0, 0, 1, 1], [], []>} : vector<16x32xf32>, vector<32x16xf32>, vector<16x16xf32> -> vector<16x16xf32>
    %cst_220 = arith.constant 0.176776692 : f32
    %294 = vector.broadcast %cst_220 : f32 to vector<16x16xf32>
    %295 = arith.mulf %293, %294 : vector<16x16xf32>
    %cst_221 = arith.constant dense<0xFF800000> : vector<16xf32>
    %296 = vector.multi_reduction <maximumf>, %295, %cst_221 [1] : vector<16x16xf32> to vector<16xf32>
    %297 = vector.shape_cast %296 : vector<16xf32> to vector<16x1xf32>
    %298 = vector.broadcast %297 : vector<16x1xf32> to vector<16x16xf32>
    %299 = arith.subf %295, %298 : vector<16x16xf32>
    %300 = math.exp %299 : vector<16x16xf32>
    %cst_222 = arith.constant dense<0.000000e+00> : vector<16xf32>
    %301 = vector.multi_reduction <add>, %300, %cst_222 [1] : vector<16x16xf32> to vector<16xf32>
    %302 = vector.shape_cast %301 : vector<16xf32> to vector<16x1xf32>
    %303 = tpu.reciprocal %302 {approx = true} : vector<16x1xf32> -> vector<16x1xf32>
    %304 = vector.broadcast %303 : vector<16x1xf32> to vector<16x16xf32>
    %305 = arith.mulf %300, %304 : vector<16x16xf32>
    %cst_223 = arith.constant dense<0.000000e+00> : vector<16x32xf32>
    %306 = tpu.matmul %305, %291, %cst_223 {dimension_numbers = #tpu.dot_dimension_numbers<[1], [0], [0], [1], [0, 0, 1, 1], [], []>} : vector<16x16xf32>, vector<16x32xf32>, vector<16x32xf32> -> vector<16x32xf32>
    %c1_224 = arith.constant 1 : index
    %c2_225 = arith.constant 2 : index
    %c0_226 = arith.constant 0 : index
    %c0_227 = arith.constant 0 : index
    %307 = vector.load %arg7[%c1_224, %c2_225, %c0_226, %c0_227] : memref<2x4x32x128xf32, #tpu.memory_space<vmem>>, vector<1x1x32x128xf32>
    %308 = vector.shape_cast %307 : vector<1x1x32x128xf32> to vector<32x128xf32>
    %cst_228 = arith.constant dense<0.000000e+00> : vector<16x128xf32>
    %309 = tpu.matmul %306, %308, %cst_228 {dimension_numbers = #tpu.dot_dimension_numbers<[1], [0], [0], [1], [0, 0, 1, 1], [], []>} : vector<16x32xf32>, vector<32x128xf32>, vector<16x128xf32> -> vector<16x128xf32>
    %310 = arith.addf %282, %309 : vector<16x128xf32>
    %c1_229 = arith.constant 1 : index
    %c3_230 = arith.constant 3 : index
    %c0_231 = arith.constant 0 : index
    %c0_232 = arith.constant 0 : index
    %311 = vector.load %arg4[%c1_229, %c3_230, %c0_231, %c0_232] : memref<2x4x128x32xf32, #tpu.memory_space<vmem>>, vector<1x1x128x32xf32>
    %312 = vector.shape_cast %311 : vector<1x1x128x32xf32> to vector<128x32xf32>
    %cst_233 = arith.constant dense<0.000000e+00> : vector<16x32xf32>
    %313 = tpu.matmul %225, %312, %cst_233 {dimension_numbers = #tpu.dot_dimension_numbers<[1], [0], [0], [1], [0, 0, 1, 1], [], []>} : vector<16x128xf32>, vector<128x32xf32>, vector<16x32xf32> -> vector<16x32xf32>
    %c1_234 = arith.constant 1 : index
    %c3_235 = arith.constant 3 : index
    %c0_236 = arith.constant 0 : index
    %c0_237 = arith.constant 0 : index
    %314 = vector.load %arg5[%c1_234, %c3_235, %c0_236, %c0_237] : memref<2x4x128x32xf32, #tpu.memory_space<vmem>>, vector<1x1x128x32xf32>
    %315 = vector.shape_cast %314 : vector<1x1x128x32xf32> to vector<128x32xf32>
    %cst_238 = arith.constant dense<0.000000e+00> : vector<16x32xf32>
    %316 = tpu.matmul %225, %315, %cst_238 {dimension_numbers = #tpu.dot_dimension_numbers<[1], [0], [0], [1], [0, 0, 1, 1], [], []>} : vector<16x128xf32>, vector<128x32xf32>, vector<16x32xf32> -> vector<16x32xf32>
    %c1_239 = arith.constant 1 : index
    %c3_240 = arith.constant 3 : index
    %c0_241 = arith.constant 0 : index
    %c0_242 = arith.constant 0 : index
    %317 = vector.load %arg6[%c1_239, %c3_240, %c0_241, %c0_242] : memref<2x4x128x32xf32, #tpu.memory_space<vmem>>, vector<1x1x128x32xf32>
    %318 = vector.shape_cast %317 : vector<1x1x128x32xf32> to vector<128x32xf32>
    %cst_243 = arith.constant dense<0.000000e+00> : vector<16x32xf32>
    %319 = tpu.matmul %225, %318, %cst_243 {dimension_numbers = #tpu.dot_dimension_numbers<[1], [0], [0], [1], [0, 0, 1, 1], [], []>} : vector<16x128xf32>, vector<128x32xf32>, vector<16x32xf32> -> vector<16x32xf32>
    %320 = tpu.transpose %316, [1, 0] : vector<16x32xf32> -> vector<32x16xf32>
    %cst_244 = arith.constant dense<0.000000e+00> : vector<16x16xf32>
    %321 = tpu.matmul %313, %320, %cst_244 {dimension_numbers = #tpu.dot_dimension_numbers<[1], [0], [0], [1], [0, 0, 1, 1], [], []>} : vector<16x32xf32>, vector<32x16xf32>, vector<16x16xf32> -> vector<16x16xf32>
    %cst_245 = arith.constant 0.176776692 : f32
    %322 = vector.broadcast %cst_245 : f32 to vector<16x16xf32>
    %323 = arith.mulf %321, %322 : vector<16x16xf32>
    %cst_246 = arith.constant dense<0xFF800000> : vector<16xf32>
    %324 = vector.multi_reduction <maximumf>, %323, %cst_246 [1] : vector<16x16xf32> to vector<16xf32>
    %325 = vector.shape_cast %324 : vector<16xf32> to vector<16x1xf32>
    %326 = vector.broadcast %325 : vector<16x1xf32> to vector<16x16xf32>
    %327 = arith.subf %323, %326 : vector<16x16xf32>
    %328 = math.exp %327 : vector<16x16xf32>
    %cst_247 = arith.constant dense<0.000000e+00> : vector<16xf32>
    %329 = vector.multi_reduction <add>, %328, %cst_247 [1] : vector<16x16xf32> to vector<16xf32>
    %330 = vector.shape_cast %329 : vector<16xf32> to vector<16x1xf32>
    %331 = tpu.reciprocal %330 {approx = true} : vector<16x1xf32> -> vector<16x1xf32>
    %332 = vector.broadcast %331 : vector<16x1xf32> to vector<16x16xf32>
    %333 = arith.mulf %328, %332 : vector<16x16xf32>
    %cst_248 = arith.constant dense<0.000000e+00> : vector<16x32xf32>
    %334 = tpu.matmul %333, %319, %cst_248 {dimension_numbers = #tpu.dot_dimension_numbers<[1], [0], [0], [1], [0, 0, 1, 1], [], []>} : vector<16x16xf32>, vector<16x32xf32>, vector<16x32xf32> -> vector<16x32xf32>
    %c1_249 = arith.constant 1 : index
    %c3_250 = arith.constant 3 : index
    %c0_251 = arith.constant 0 : index
    %c0_252 = arith.constant 0 : index
    %335 = vector.load %arg7[%c1_249, %c3_250, %c0_251, %c0_252] : memref<2x4x32x128xf32, #tpu.memory_space<vmem>>, vector<1x1x32x128xf32>
    %336 = vector.shape_cast %335 : vector<1x1x32x128xf32> to vector<32x128xf32>
    %cst_253 = arith.constant dense<0.000000e+00> : vector<16x128xf32>
    %337 = tpu.matmul %334, %336, %cst_253 {dimension_numbers = #tpu.dot_dimension_numbers<[1], [0], [0], [1], [0, 0, 1, 1], [], []>} : vector<16x32xf32>, vector<32x128xf32>, vector<16x128xf32> -> vector<16x128xf32>
    %338 = arith.addf %310, %337 : vector<16x128xf32>
    %339 = arith.addf %199, %338 : vector<16x128xf32>
    %c1_254 = arith.constant 1 : index
    %c0_255 = arith.constant 0 : index
    %c0_256 = arith.constant 0 : index
    %340 = vector.load %arg8[%c1_254, %c0_255, %c0_256] : memref<2x1x128xf32, #tpu.memory_space<vmem>>, vector<1x1x128xf32>
    %341 = vector.shape_cast %340 : vector<1x1x128xf32> to vector<1x128xf32>
    %342 = vector.broadcast %341 : vector<1x128xf32> to vector<16x128xf32>
    %343 = arith.addf %339, %342 : vector<16x128xf32>
    %c1_257 = arith.constant 1 : index
    %c0_258 = arith.constant 0 : index
    %c0_259 = arith.constant 0 : index
    %344 = vector.load %arg9[%c1_257, %c0_258, %c0_259] : memref<2x1x128xf32, #tpu.memory_space<vmem>>, vector<1x1x128xf32>
    %345 = vector.shape_cast %344 : vector<1x1x128xf32> to vector<1x128xf32>
    %c1_260 = arith.constant 1 : index
    %c0_261 = arith.constant 0 : index
    %c0_262 = arith.constant 0 : index
    %346 = vector.load %arg10[%c1_260, %c0_261, %c0_262] : memref<2x1x128xf32, #tpu.memory_space<vmem>>, vector<1x1x128xf32>
    %347 = vector.shape_cast %346 : vector<1x1x128xf32> to vector<1x128xf32>
    %cst_263 = arith.constant dense<0.000000e+00> : vector<16xf32>
    %348 = vector.multi_reduction <add>, %343, %cst_263 [1] : vector<16x128xf32> to vector<16xf32>
    %349 = vector.shape_cast %348 : vector<16xf32> to vector<16x1xf32>
    %cst_264 = arith.constant 1.280000e+02 : f32
    %350 = vector.broadcast %cst_264 : f32 to vector<16x1xf32>
    %351 = arith.divf %349, %350 : vector<16x1xf32>
    %352 = vector.broadcast %351 : vector<16x1xf32> to vector<16x128xf32>
    %353 = arith.subf %343, %352 : vector<16x128xf32>
    %354 = arith.mulf %353, %353 : vector<16x128xf32>
    %cst_265 = arith.constant dense<0.000000e+00> : vector<16xf32>
    %355 = vector.multi_reduction <add>, %354, %cst_265 [1] : vector<16x128xf32> to vector<16xf32>
    %356 = vector.shape_cast %355 : vector<16xf32> to vector<16x1xf32>
    %cst_266 = arith.constant 1.280000e+02 : f32
    %357 = vector.broadcast %cst_266 : f32 to vector<16x1xf32>
    %358 = arith.divf %356, %357 : vector<16x1xf32>
    %359 = vector.broadcast %351 : vector<16x1xf32> to vector<16x128xf32>
    %360 = arith.subf %343, %359 : vector<16x128xf32>
    %cst_267 = arith.constant 9.99999974E-6 : f32
    %361 = vector.broadcast %cst_267 : f32 to vector<16x1xf32>
    %362 = arith.addf %358, %361 : vector<16x1xf32>
    %363 = math.rsqrt %362 : vector<16x1xf32>
    %364 = vector.broadcast %363 : vector<16x1xf32> to vector<16x128xf32>
    %365 = arith.mulf %360, %364 : vector<16x128xf32>
    %366 = vector.broadcast %345 : vector<1x128xf32> to vector<16x128xf32>
    %367 = arith.mulf %365, %366 : vector<16x128xf32>
    %368 = vector.broadcast %347 : vector<1x128xf32> to vector<16x128xf32>
    %369 = arith.addf %367, %368 : vector<16x128xf32>
    %c1_268 = arith.constant 1 : index
    %c0_269 = arith.constant 0 : index
    %c0_270 = arith.constant 0 : index
    %370 = vector.load %arg11[%c1_268, %c0_269, %c0_270] : memref<2x128x256xf32, #tpu.memory_space<vmem>>, vector<1x128x256xf32>
    %371 = vector.shape_cast %370 : vector<1x128x256xf32> to vector<128x256xf32>
    %cst_271 = arith.constant dense<0.000000e+00> : vector<16x256xf32>
    %372 = tpu.matmul %369, %371, %cst_271 {dimension_numbers = #tpu.dot_dimension_numbers<[1], [0], [0], [1], [0, 0, 1, 1], [], []>} : vector<16x128xf32>, vector<128x256xf32>, vector<16x256xf32> -> vector<16x256xf32>
    %c1_272 = arith.constant 1 : index
    %c0_273 = arith.constant 0 : index
    %c0_274 = arith.constant 0 : index
    %373 = vector.load %arg12[%c1_272, %c0_273, %c0_274] : memref<2x1x256xf32, #tpu.memory_space<vmem>>, vector<1x1x256xf32>
    %374 = vector.shape_cast %373 : vector<1x1x256xf32> to vector<1x256xf32>
    %375 = vector.broadcast %374 : vector<1x256xf32> to vector<16x256xf32>
    %376 = arith.addf %372, %375 : vector<16x256xf32>
    %cst_275 = arith.constant 5.000000e-01 : f32
    %377 = vector.broadcast %cst_275 : f32 to vector<16x256xf32>
    %378 = arith.mulf %377, %376 : vector<16x256xf32>
    %cst_276 = arith.constant 4.471500e-02 : f32
    %379 = vector.broadcast %cst_276 : f32 to vector<16x256xf32>
    %380 = arith.mulf %379, %376 : vector<16x256xf32>
    %381 = arith.mulf %380, %376 : vector<16x256xf32>
    %382 = arith.mulf %381, %376 : vector<16x256xf32>
    %383 = arith.addf %376, %382 : vector<16x256xf32>
    %cst_277 = arith.constant 0.797884583 : f32
    %384 = vector.broadcast %cst_277 : f32 to vector<16x256xf32>
    %385 = arith.mulf %384, %383 : vector<16x256xf32>
    %386 = math.tanh %385 : vector<16x256xf32>
    %cst_278 = arith.constant 1.000000e+00 : f32
    %387 = vector.broadcast %cst_278 : f32 to vector<16x256xf32>
    %388 = arith.addf %387, %386 : vector<16x256xf32>
    %389 = arith.mulf %378, %388 : vector<16x256xf32>
    %c1_279 = arith.constant 1 : index
    %c0_280 = arith.constant 0 : index
    %c0_281 = arith.constant 0 : index
    %390 = vector.load %arg13[%c1_279, %c0_280, %c0_281] : memref<2x256x128xf32, #tpu.memory_space<vmem>>, vector<1x256x128xf32>
    %391 = vector.shape_cast %390 : vector<1x256x128xf32> to vector<256x128xf32>
    %cst_282 = arith.constant dense<0.000000e+00> : vector<16x128xf32>
    %392 = tpu.matmul %389, %391, %cst_282 {dimension_numbers = #tpu.dot_dimension_numbers<[1], [0], [0], [1], [0, 0, 1, 1], [], []>} : vector<16x256xf32>, vector<256x128xf32>, vector<16x128xf32> -> vector<16x128xf32>
    %393 = arith.addf %343, %392 : vector<16x128xf32>
    %c1_283 = arith.constant 1 : index
    %c0_284 = arith.constant 0 : index
    %c0_285 = arith.constant 0 : index
    %394 = vector.load %arg14[%c1_283, %c0_284, %c0_285] : memref<2x1x128xf32, #tpu.memory_space<vmem>>, vector<1x1x128xf32>
    %395 = vector.shape_cast %394 : vector<1x1x128xf32> to vector<1x128xf32>
    %396 = vector.broadcast %395 : vector<1x128xf32> to vector<16x128xf32>
    %397 = arith.addf %393, %396 : vector<16x128xf32>
    %c0_286 = arith.constant 0 : index
    %c0_287 = arith.constant 0 : index
    %c0_288 = arith.constant 0 : index
    %398 = vector.load %arg15[%c0_286, %c0_287, %c0_288] : memref<1x16x128xf32, #tpu.memory_space<vmem>>, vector<1x16x128xf32>
    %399 = vector.shape_cast %398 : vector<1x16x128xf32> to vector<16x128xf32>
    %400 = vector.shape_cast %397 : vector<16x128xf32> to vector<1x16x128xf32>
    tpu.vector_store %arg15[%c0_286, %c0_287, %c0_288], %400 {strides = array<i32>} : memref<1x16x128xf32, #tpu.memory_space<vmem>>, vector<1x16x128xf32>,
    return
  }
  func.func @transform_0(%arg0: i32) -> (i32, i32, i32) {
    %c0_i32 = arith.constant 0 : i32
    %c0_i32_0 = arith.constant 0 : i32
    %c0_i32_1 = arith.constant 0 : i32
    return %arg0, %c0_i32, %c0_i32_0 : i32, i32, i32
  }
  func.func @transform_1(%arg0: i32) -> (i32, i32, i32) {
    %c0_i32 = arith.constant 0 : i32
    %c0_i32_0 = arith.constant 0 : i32
    %c0_i32_1 = arith.constant 0 : i32
    %c0_i32_2 = arith.constant 0 : i32
    return %c0_i32, %c0_i32_0, %c0_i32_1 : i32, i32, i32
  }
  func.func @transform_2(%arg0: i32) -> (i32, i32, i32) {
    %c0_i32 = arith.constant 0 : i32
    %c0_i32_0 = arith.constant 0 : i32
    %c0_i32_1 = arith.constant 0 : i32
    %c0_i32_2 = arith.constant 0 : i32
    return %c0_i32, %c0_i32_0, %c0_i32_1 : i32, i32, i32
  }
  func.func @transform_3(%arg0: i32) -> (i32, i32, i32, i32) {
    %c0_i32 = arith.constant 0 : i32
    %c0_i32_0 = arith.constant 0 : i32
    %c0_i32_1 = arith.constant 0 : i32
    %c0_i32_2 = arith.constant 0 : i32
    %c0_i32_3 = arith.constant 0 : i32
    return %c0_i32, %c0_i32_0, %c0_i32_1, %c0_i32_2 : i32, i32, i32, i32
  }
  func.func @transform_4(%arg0: i32) -> (i32, i32, i32, i32) {
    %c0_i32 = arith.constant 0 : i32
    %c0_i32_0 = arith.constant 0 : i32
    %c0_i32_1 = arith.constant 0 : i32
    %c0_i32_2 = arith.constant 0 : i32
    %c0_i32_3 = arith.constant 0 : i32
    return %c0_i32, %c0_i32_0, %c0_i32_1, %c0_i32_2 : i32, i32, i32, i32
  }
  func.func @transform_5(%arg0: i32) -> (i32, i32, i32, i32) {
    %c0_i32 = arith.constant 0 : i32
    %c0_i32_0 = arith.constant 0 : i32
    %c0_i32_1 = arith.constant 0 : i32
    %c0_i32_2 = arith.constant 0 : i32
    %c0_i32_3 = arith.constant 0 : i32
    return %c0_i32, %c0_i32_0, %c0_i32_1, %c0_i32_2 : i32, i32, i32, i32
  }
  func.func @transform_6(%arg0: i32) -> (i32, i32, i32, i32) {
    %c0_i32 = arith.constant 0 : i32
    %c0_i32_0 = arith.constant 0 : i32
    %c0_i32_1 = arith.constant 0 : i32
    %c0_i32_2 = arith.constant 0 : i32
    %c0_i32_3 = arith.constant 0 : i32
    return %c0_i32, %c0_i32_0, %c0_i32_1, %c0_i32_2 : i32, i32, i32, i32
  }
  func.func @transform_7(%arg0: i32) -> (i32, i32, i32) {
    %c0_i32 = arith.constant 0 : i32
    %c0_i32_0 = arith.constant 0 : i32
    %c0_i32_1 = arith.constant 0 : i32
    %c0_i32_2 = arith.constant 0 : i32
    return %c0_i32, %c0_i32_0, %c0_i32_1 : i32, i32, i32
  }
  func.func @transform_8(%arg0: i32) -> (i32, i32, i32) {
    %c0_i32 = arith.constant 0 : i32
    %c0_i32_0 = arith.constant 0 : i32
    %c0_i32_1 = arith.constant 0 : i32
    %c0_i32_2 = arith.constant 0 : i32
    return %c0_i32, %c0_i32_0, %c0_i32_1 : i32, i32, i32
  }
  func.func @transform_9(%arg0: i32) -> (i32, i32, i32) {
    %c0_i32 = arith.constant 0 : i32
    %c0_i32_0 = arith.constant 0 : i32
    %c0_i32_1 = arith.constant 0 : i32
    %c0_i32_2 = arith.constant 0 : i32
    return %c0_i32, %c0_i32_0, %c0_i32_1 : i32, i32, i32
  }
  func.func @transform_10(%arg0: i32) -> (i32, i32, i32) {
    %c0_i32 = arith.constant 0 : i32
    %c0_i32_0 = arith.constant 0 : i32
    %c0_i32_1 = arith.constant 0 : i32
    %c0_i32_2 = arith.constant 0 : i32
    return %c0_i32, %c0_i32_0, %c0_i32_1 : i32, i32, i32
  }
  func.func @transform_11(%arg0: i32) -> (i32, i32, i32) {
    %c0_i32 = arith.constant 0 : i32
    %c0_i32_0 = arith.constant 0 : i32
    %c0_i32_1 = arith.constant 0 : i32
    %c0_i32_2 = arith.constant 0 : i32
    return %c0_i32, %c0_i32_0, %c0_i32_1 : i32, i32, i32
  }
  func.func @transform_12(%arg0: i32) -> (i32, i32, i32) {
    %c0_i32 = arith.constant 0 : i32
    %c0_i32_0 = arith.constant 0 : i32
    %c0_i32_1 = arith.constant 0 : i32
    %c0_i32_2 = arith.constant 0 : i32
    return %c0_i32, %c0_i32_0, %c0_i32_1 : i32, i32, i32
  }
  func.func @transform_13(%arg0: i32) -> (i32, i32, i32) {
    %c0_i32 = arith.constant 0 : i32
    %c0_i32_0 = arith.constant 0 : i32
    %c0_i32_1 = arith.constant 0 : i32
    %c0_i32_2 = arith.constant 0 : i32
    return %c0_i32, %c0_i32_0, %c0_i32_1 : i32, i32, i32
  }
  func.func @transform_14(%arg0: i32) -> (i32, i32, i32) {
    %c0_i32 = arith.constant 0 : i32
    %c0_i32_0 = arith.constant 0 : i32
    %c0_i32_1 = arith.constant 0 : i32
    return %arg0, %c0_i32, %c0_i32_0 : i32, i32, i32
  }
}

</mosaic_0001>

<bundles_post_ra>
// kernel: transformer_pallas.1
= control target key start
LH: loop header
LB: loop body
LE: loop exit
PB: predicated region body
PF: predicated region fallthrough
CT: control target
= control target key end

     0   :  { %s10261_s0 = inlined_call_operand.vmem [shape: f32[2,16,128], index: 0, kind: input, shape index: {}]   ;;  %s10262_s1 = inlined_call_operand.vmem [shape: f32[2,1,128], index: 1, kind: input, shape index: {}]   ;;  %s10263_s2 = inlined_call_operand.vmem [shape: f32[2,1,128], index: 2, kind: input, shape index: {}]   ;;  %s10264_s3 = inlined_call_operand.vmem [shape: f32[2,4,128,32], index: 3, kind: input, shape index: {}]   ;;  %s10265_s4 = inlined_call_operand.vmem [shape: f32[2,4,128,32], index: 4, kind: input, shape index: {}]   ;;  %s10266_s5 = inlined_call_operand.vmem [shape: f32[2,4,128,32], index: 5, kind: input, shape index: {}]   ;;  %s10267_s6 = inlined_call_operand.vmem [shape: f32[2,4,32,128], index: 6, kind: input, shape index: {}]   ;;  %s10268_s7 = inlined_call_operand.vmem [shape: f32[2,1,128], index: 7, kind: input, shape index: {}]   ;;  %s10269_s8 = inlined_call_operand.vmem [shape: f32[2,1,128], index: 8, kind: input, shape index: {}]   ;;  %s10270_s9 = inlined_call_operand.vmem [shape: f32[2,1,128], index: 9, kind: input, shape index: {}]   ;;  %s10271_s10 = inlined_call_operand.vmem [shape: f32[2,128,256], index: 10, kind: input, shape index: {}]   ;;  %s10272_s11 = inlined_call_operand.vmem [shape: f32[2,1,256], index: 11, kind: input, shape index: {}]   ;;  %s10273_s12 = inlined_call_operand.vmem [shape: f32[2,256,128], index: 12, kind: input, shape index: {}]   ;;  %s10274_s13 = inlined_call_operand.vmem [shape: f32[2,1,128], index: 13, kind: input, shape index: {}]   ;;  %s10275_s14 = inlined_call_operand.hbm [shape: f32[2,16,128], index: 14, kind: output, shape index: {}]  }
   0x1   :  { %10279 = sst [smem:[#allocation8_spill]] %s10261_s0 }
   0x2   :  { %19 = vsyncpa [#allocation3], 0 }
   0x3   :  { %21 = vsyncpa [#allocation3 + $0x1], 0  ;;  %s8192_s29 = smov 0   ;;  %s8194_s30 = smov 0  }
   0x4   :  { %s8196_s15 = smov 0   ;;  %s8198_s16 = smov 0  }
   0x5 LB: > { %10280 = sst [smem:[#allocation5_spill]] %s8107_s15  ;;  %s8213_s17 = sadd.s32 4294967295, %s8111_s16   ;;  %s8111_s16 = sphi %s8198_s16, %s10286_s16   ;;  %s8107_s15 = sphi %s8196_s15, %s10288_s15   ;;  %s8103_s30 = sphi %s8194_s30, %s10290_s30   ;;  %s8099_s29 = sphi %s8192_s29, %s10289_s29  }
   0x6   : > { %s5726_s18 = sadd.s32 4294967294, %s8111_s16   ;;  %s8217_s19 = sadd.s32 1, %s8111_s16  }
   0x7   : > { %10281 = sst [smem:[#allocation6_spill]] %s8217_s19  ;;  %s333_s20 = sadd.s32 1, %s8107_s15 }
   0x8   : > { %s330_s21 = ssub.s32 %s8111_s16, %s8217_s19  ;;  %p343_p0 = scmp.ne.s32.totalorder %s8107_s15, %s8103_s30 }
   0x9   : > { %p331_p1 = scmp.eq.s32.totalorder %s330_s21, 0  ;;  %p344_p2 = scmp.eq.s32.totalorder %s8213_s17, 1 }
   0xa   : > { %p349_p3 = scmp.ne.s32.totalorder %s8103_s30, %s8099_s29  ;;  %p350_p4 = scmp.eq.s32.totalorder %s5726_s18, 1 }
   0xb   : > { %s8228_s22 = scalar_select %p331_p1, %s8107_s15, %s333_s20  }
   0xc   : > { %p8230_p5 = por %p344_p2, %p343_p0  ;;  %p8234_p6 = por %p350_p4, %p349_p3 }
   0xd   : > { %10282 = sst [smem:[#allocation7_spill]] %s8228_s22  ;;  %p5729_p7 = scmp.ge.s32.totalorder %s8111_s16, 1 }
   0xe   : > { %p415_p8 = scmp.lt.s32.totalorder %s8111_s16, 3 }
  0x10   : > { %p416_p9 = pnand %p5729_p7, %p415_p8 }
  0x11   : > { %p461_p10 = scmp.lt.s32.totalorder (!%p416_p9), %s8213_s17, 1  ;;  %s10285_s0 = sld [smem:[#allocation8_spill]] (!%p416_p9) }
  0x12   : > { %419 = sbr.rel (%p416_p9) target bundleno = 9560 (0x2558), region = 76  ;;  %s458_s15 = sand.u32 (!%p416_p9), 1, %s8103_s30  }
  0x13   : > { %s5730_s19 = sshll.u32 (!%p416_p9), %s458_s15, 4 }
  0x14   : > { %s460_s21 = scalar_lea.vmem (!%p416_p9), [#allocation2], %s5730_s19 }
  0x17   : > { %s462_s25 = scalar_select %p461_p10, %s8213_s17, 1  ;;  %v524_v2 = vld [vmem:[%s10264_s3 + $0x78] sm:$0xff]  ;;  %v523_v4 = vld [vmem:[%s10264_s3 + $0x70] sm:$0xff]  ;;  %v522_v6 = vld [vmem:[%s10264_s3 + $0x68] sm:$0xff]  ;;  %vm782_vm0 = vcmask 261120   ;;  %vm872_vm1 = vcmask 130048  }
  0x18   : > { %v615_v3 = vld [vmem:[%s10265_s4 + $0x78] sm:$0xff]  ;;  %6871 = vmatprep.subr.mxu0 %v524_v2  ;;  %v614_v5 = vld [vmem:[%s10265_s4 + $0x70] sm:$0xff]  ;;  %v613_v15 = vld [vmem:[%s10265_s4 + $0x68] sm:$0xff] }
  0x19   : > { %s6249_s26 = sshll.u32 %s462_s25, 4  ;;  %6906 = vmatprep.subr.mxu1 %v615_v3  ;;  %6872 = vmatpush3.msra.mxu0 %v524_v2  ;;  %v521_v16 = vld [vmem:[%s10264_s3 + $0x60] sm:$0xff]  ;;  %v520_v18 = vld [vmem:[%s10264_s3 + $0x58] sm:$0xff]  ;;  %v519_v20 = vld [vmem:[%s10264_s3 + $0x50] sm:$0xff]  ;;  %s5664_s25 = sshll.u32 %s460_s21, 4  ;;  %s10214_s25 = int_to_ptr.vmem [resolvable:$true] %s5664_s25 }
  0x1a   : > { %s8245_s18 = scalar_lea.vmem %s10285_s0, %s6249_s26  ;;  %6907 = vmatpush3.msra.mxu1 %v615_v3  ;;  %6873 = vmatprep.subr.mxu0 %v523_v4  ;;  %v612_v17 = vld [vmem:[%s10265_s4 + $0x60] sm:$0xff]  ;;  %v611_v19 = vld [vmem:[%s10265_s4 + $0x58] sm:$0xff]  ;;  %v610_v21 = vld [vmem:[%s10265_s4 + $0x50] sm:$0xff]  ;;  %s6250_s26 = sshll.u32 %s8213_s17, 8 }
  0x1b   : > { %v466_v0 = vld [vmem:[%s8245_s18] sm:$0xff]  ;;  %v467_v1 = vld [vmem:[%s8245_s18 + $0x8] sm:$0xff]  ;;  %6908 = vmatprep.subr.mxu1 %v614_v5  ;;  %6874 = vmatpush3.msra.mxu0 %v523_v4  ;;  %v516_v26 = vld [vmem:[%s10264_s3 + $0x38] sm:$0xff]  ;;  %s10219_s28 = scalar_lea.hbm %s10275_s14, %s6250_s26  ;;  %s10221_s0 = scalar_lea.sflag [#allocation3], %s458_s15 }
  0x1c   : > { %470 = vadd.xlane.f32.xlu0 %v466_v0  ;;  %6909 = vmatpush3.msra.mxu1 %v614_v5  ;;  %v518_v22 = vld [vmem:[%s10264_s3 + $0x48] sm:$0xff]  ;;  %v517_v24 = vld [vmem:[%s10264_s3 + $0x40] sm:$0xff]  ;;  %v607_v27 = vld [vmem:[%s10265_s4 + $0x38] sm:$0xff]  ;;  %s8051_s19 = scalar_lea.vmem %s10214_s25, 256  ;;  %s8114_s17 = smov [#allocation2]  }
  0x1d   : > { %6875 = vmatprep.subr.mxu0 %v522_v6  ;;  %6910 = vmatprep.subr.mxu1 %v613_v15  ;;  %v609_v23 = vld [vmem:[%s10265_s4 + $0x48] sm:$0xff]  ;;  %v608_v25 = vld [vmem:[%s10265_s4 + $0x40] sm:$0xff]  ;;  %v515_v28 = vld [vmem:[%s10264_s3 + $0x30] sm:$0xff]  ;;  %p8052_p11 = scmp.ne.s32.totalorder %s10214_s25, %s8051_s19  ;;  %s8055_s22 = sshll.u32 %s8114_s17, 4  ;;  %s8056_s22 = int_to_ptr.vmem [resolvable:$false] %s8055_s22 }
  0x1e   : > { %6876 = vmatpush3.msra.mxu0 %v522_v6  ;;  %6911 = vmatpush3.msra.mxu1 %v613_v15  ;;  %v606_v29 = vld [vmem:[%s10265_s4 + $0x30] sm:$0xff]  ;;  %v514_v30 = vld [vmem:[%s10264_s3 + $0x28] sm:$0xff]  ;;  %v513_v32 = vld [vmem:[%s10264_s3 + $0x20] sm:$0xff]  ;;  %s8057_s20 = scalar_lea.vmem %s8056_s22, 512  ;;  %p8058_p0 = scmp.lt.s32.totalorder %s10214_s25, %s8056_s22 }
  0x1f   : > { %6877 = vmatprep.subr.mxu0 %v521_v16  ;;  %6912 = vmatprep.subr.mxu1 %v612_v17  ;;  %v605_v31 = vld [vmem:[%s10265_s4 + $0x28] sm:$0xff]  ;;  %v604_v33 = vld [vmem:[%s10265_s4 + $0x20] sm:$0xff]  ;;  %v512_v34 = vld [vmem:[%s10264_s3 + $0x18] sm:$0xff]  ;;  %p8053_p12 = pnand %p8052_p11, %p8230_p5  ;;  %p8059_p1 = scmp.lt.s32.totalorder %s8057_s20, %s8051_s19 }
  0x20   : > { %472 = vadd.xlane.f32.xlu0 %v467_v1  ;;  %6878 = vmatpush3.msra.mxu0 %v521_v16  ;;  %v603_v35 = vld [vmem:[%s10265_s4 + $0x18] sm:$0xff]  ;;  %v511_v36 = vld [vmem:[%s10264_s3 + $0x10] sm:$0xff]  ;;  %v510_v38 = vld [vmem:[%s10264_s3 + $0x8] sm:$0xff] }
  0x21   : > { %6879 = vmatprep.subr.mxu0 %v520_v18  ;;  %6913 = vmatpush3.msra.mxu1 %v612_v17  ;;  %v602_v37 = vld [vmem:[%s10265_s4 + $0x10] sm:$0xff]  ;;  %v601_v39 = vld [vmem:[%s10265_s4 + $0x8] sm:$0xff]  ;;  %v509_v40 = vld [vmem:[%s10264_s3] sm:$0xff]  ;;  %p8054_p13 = pneg %p8053_p12  ;;  %p8060_p2 = por %p8059_p1, %p8058_p0 }
  0x22   : > { %6880 = vmatpush3.msra.mxu0 %v520_v18  ;;  %6914 = vmatprep.subr.mxu1 %v611_v19  ;;  %v600_v41 = vld [vmem:[%s10265_s4] sm:$0xff]  ;;  %v706_v42 = vld [vmem:[%s10266_s5 + $0x78] sm:$0xff]  ;;  %v705_v59 = vld [vmem:[%s10266_s5 + $0x70] sm:$0xff] }
  0x23   : > { %6881 = vmatprep.subr.mxu0 %v519_v20  ;;  %6915 = vmatpush3.msra.mxu1 %v611_v19  ;;  %v5733_v50 = vld [vmem:[%s10262_s1] ss:$0 sm:$0xff]  ;;  %v704_v60 = vld [vmem:[%s10266_s5 + $0x68] sm:$0xff]  ;;  %v702_v62 = vld [vmem:[%s10266_s5 + $0x58] sm:$0xff]  ;;  %p8061_p3 = pnand %p8060_p2, %p8054_p13 }
  0x24   : > { %6882 = vmatpush3.msra.mxu0 %v519_v20  ;;  %6916 = vmatprep.subr.mxu1 %v610_v21  ;;  %v5734_v52 = vld [vmem:[%s10263_s2] ss:$0 sm:$0xff]  ;;  %v701_v63 = vld [vmem:[%s10266_s5 + $0x50] sm:$0xff]  ;;  %v698_v2 = vld [vmem:[%s10266_s5 + $0x38] sm:$0xff] }
  0x25   : > { %6883 = vmatprep.subr.mxu0 %v518_v22  ;;  %6917 = vmatpush3.msra.mxu1 %v610_v21  ;;  %v703_v61 = vld [vmem:[%s10266_s5 + $0x60] sm:$0xff]  ;;  %v697_v3 = vld [vmem:[%s10266_s5 + $0x30] sm:$0xff]  ;;  %v696_v4 = vld [vmem:[%s10266_s5 + $0x28] sm:$0xff] }
  0x26   : > { %6884 = vmatpush3.msra.mxu0 %v518_v22  ;;  %6918 = vmatprep.subr.mxu1 %v609_v23  ;;  %v695_v5 = vld [vmem:[%s10266_s5 + $0x20] sm:$0xff]  ;;  %v694_v6 = vld [vmem:[%s10266_s5 + $0x18] sm:$0xff]  ;;  %v5767_v15 = vld [vmem:[%s10265_s4 + $0xd0] sm:$0xff] }
  0x27   : > { %6885 = vmatprep.subr.mxu0 %v517_v24  ;;  %6919 = vmatpush3.msra.mxu1 %v609_v23  ;;  %v5766_v16 = vld [vmem:[%s10265_s4 + $0xc8] sm:$0xff]  ;;  %v5765_v17 = vld [vmem:[%s10265_s4 + $0xc0] sm:$0xff]  ;;  %v5764_v18 = vld [vmem:[%s10265_s4 + $0xb8] sm:$0xff] }
  0x28   : > { %6886 = vmatpush3.msra.mxu0 %v517_v24  ;;  %6920 = vmatprep.subr.mxu1 %v608_v25  ;;  %v5763_v19 = vld [vmem:[%s10265_s4 + $0xb0] sm:$0xff]  ;;  %v5762_v20 = vld [vmem:[%s10265_s4 + $0xa8] sm:$0xff]  ;;  %v5761_v21 = vld [vmem:[%s10265_s4 + $0xa0] sm:$0xff] }
  0x29   : > { %6887 = vmatprep.subr.mxu0 %v516_v26  ;;  %6921 = vmatpush3.msra.mxu1 %v608_v25  ;;  %v5760_v22 = vld [vmem:[%s10265_s4 + $0x98] sm:$0xff]  ;;  %v5759_v23 = vld [vmem:[%s10265_s4 + $0x90] sm:$0xff]  ;;  %v5758_v24 = vld [vmem:[%s10265_s4 + $0x88] sm:$0xff] }
  0x2a   : > { %6888 = vmatpush3.msra.mxu0 %v516_v26  ;;  %6922 = vmatprep.subr.mxu1 %v607_v27  ;;  %v5757_v25 = vld [vmem:[%s10265_s4 + $0x80] sm:$0xff] }
  0x2b   : > { %6889 = vmatprep.subr.mxu0 %v515_v28  ;;  %6923 = vmatpush3.msra.mxu1 %v607_v27 }
  0x2c   : > { %6890 = vmatpush3.msra.mxu0 %v515_v28  ;;  %6924 = vmatprep.subr.mxu1 %v606_v29 }
  0x2d   : > { %6891 = vmatprep.subr.mxu0 %v514_v30  ;;  %6925 = vmatpush3.msra.mxu1 %v606_v29 }
  0x2e   : > { %6892 = vmatpush3.msra.mxu0 %v514_v30  ;;  %6926 = vmatprep.subr.mxu1 %v605_v31 }
  0x2f   : > { %6893 = vmatprep.subr.mxu0 %v513_v32  ;;  %6927 = vmatpush3.msra.mxu1 %v605_v31 }
  0x30   : > { %6894 = vmatpush3.msra.mxu0 %v513_v32  ;;  %6928 = vmatprep.subr.mxu1 %v604_v33 }
  0x31   : > { %6895 = vmatprep.subr.mxu0 %v512_v34  ;;  %6929 = vmatpush3.msra.mxu1 %v604_v33 }
  0x32   : > { %6896 = vmatpush3.msra.mxu0 %v512_v34  ;;  %6930 = vmatprep.subr.mxu1 %v603_v35 }
  0x33   : > { %6897 = vmatprep.subr.mxu0 %v511_v36  ;;  %6931 = vmatpush3.msra.mxu1 %v603_v35 }
  0x34   : > { %6898 = vmatpush3.msra.mxu0 %v511_v36  ;;  %6932 = vmatprep.subr.mxu1 %v602_v37 }
  0x35   : > { %6899 = vmatprep.subr.mxu0 %v510_v38  ;;  %6933 = vmatpush3.msra.mxu1 %v602_v37 }
  0x36   : > { %6900 = vmatpush3.msra.mxu0 %v510_v38  ;;  %6934 = vmatprep.subr.mxu1 %v601_v39 }
  0x37   : > { %6901 = vmatprep.subr.mxu0 %v509_v40  ;;  %6935 = vmatpush3.msra.mxu1 %v601_v39 }
  0x38   : > { %6902 = vmatpush3.msra.mxu0 %v509_v40  ;;  %6936 = vmatprep.subr.mxu1 %v600_v41 }
  0x39   : > { %6937 = vmatpush3.msra.mxu1 %v600_v41  ;;  %6941 = vmatprep.subr.mxu0 %v706_v42 }
  0xa5   : > { %v471_v7 = vpop.xlane.xlu0 %470 }
  0xa6   : > { %v475_v8 = vmul.f32 0.0078125, %v471_v7  ;;  %v693_v7 = vld [vmem:[%s10266_s5 + $0x10] sm:$0xff] }
  0xa8   : > { %v8264_v9 = vsub.f32 %v466_v0, %v475_v8  ;;  %v700_v0 = vld [vmem:[%s10266_s5 + $0x48] sm:$0xff] }
  0xa9   : > { %v473_v10 = vpop.xlane.xlu0 %472  ;;  %v692_v8 = vld [vmem:[%s10266_s5 + $0x8] sm:$0xff] }
  0xaa   : > { %v476_v11 = vmul.f32 0.0078125, %v473_v10  ;;  %v479_v12 = vmul.f32 %v8264_v9, %v8264_v9  ;;  %v5772_v10 = vld [vmem:[%s10265_s4 + $0xf8] sm:$0xff] }
  0xac   : > { %v8268_v13 = vsub.f32 %v467_v1, %v476_v11  ;;  %481 = vadd.xlane.f32.xlu1 %v479_v12  ;;  %v699_v1 = vld [vmem:[%s10266_s5 + $0x40] sm:$0xff]  ;;  %v5771_v11 = vld [vmem:[%s10265_s4 + $0xf0] sm:$0xff]  ;;  %v5770_v12 = vld [vmem:[%s10265_s4 + $0xe8] sm:$0xff] }
  0xae   : > { %v480_v14 = vmul.f32 %v8268_v13, %v8268_v13 }
  0xb0   : > { %483 = vadd.xlane.f32.xlu1 %v480_v14  ;;  %v5768_v14 = vld [vmem:[%s10265_s4 + $0xd8] sm:$0xff] }
 0x135   : > { %v482_v43 = vpop.xlane.xlu1 %481 }
 0x136   : > { %v485_v44 = vmul.f32 0.0078125, %v482_v43 }
 0x138   : > { %v487_v45 = vadd.f32 1e-05, %v485_v44 }
 0x139   : > { %v484_v46 = vpop.xlane.xlu1 %483 }
 0x13a   : > { %7953 = vrsqrt.f32 %v487_v45  ;;  %v486_v47 = vmul.f32 0.0078125, %v484_v46 }
 0x13c   : > { %v488_v48 = vadd.f32 1e-05, %v486_v47 }
 0x13e   : > { %7955 = vrsqrt.f32 %v488_v48 }
 0x147   : > { %v7954_v49 = vpop.eup %7953 }
 0x148   : > { %v491_v51 = vmul.f32 %v7954_v49, %v8264_v9  ;;  %v691_v9 = vld [vmem:[%s10266_s5] sm:$0xff] }
 0x14a   : > { %v499_v53 = vmul.f32 %v5733_v50, %v491_v51 }
 0x14b   : > { %v7956_v54 = vpop.eup %7955 }
 0x14c   : > { %v8363_v55 = vadd.f32 %v5734_v52, %v499_v53  ;;  %v492_v56 = vmul.f32 %v7956_v54, %v8268_v13  ;;  %v5769_v13 = vld [vmem:[%s10265_s4 + $0xe0] sm:$0xff] }
 0x14e   : > { %v500_v57 = vmul.f32 %v5733_v50, %v492_v56  ;;  %6903 = vmatprep.mubr.f32.mxu0 %v8363_v55  ;;  %6938 = vmatprep.mubr.f32.mxu1 %v8363_v55  ;;  %v5756_v50 = vld [vmem:[%s10264_s3 + $0xf8] sm:$0xff] }
 0x150   : > { %v8368_v58 = vadd.f32 %v5734_v52, %v500_v57 }
 0x152   : > { %6904 = vmatmul.mubr.f32.vlgmr.msra.gmra.mxu0 %v8368_v58  ;;  %6939 = vmatmul.mubr.f32.vlgmr.msra.gmra.mxu1 %v8368_v58 }
 0x153   : > { %6942 = vmatpush3.msra.mxu0 %v706_v42  ;;  %6973 = vmatprep.mubr.f32.mxu0 %v8363_v55 }
 0x154   : > { %6943 = vmatprep.subr.mxu0 %v705_v59 }
 0x155   : > { %6944 = vmatpush3.msra.mxu0 %v705_v59  ;;  %v5755_v59 = vld [vmem:[%s10264_s3 + $0xf0] sm:$0xff] }
 0x156   : > { %6945 = vmatprep.subr.mxu0 %v704_v60 }
 0x157   : > { %6946 = vmatpush3.msra.mxu0 %v704_v60  ;;  %v5754_v60 = vld [vmem:[%s10264_s3 + $0xe8] sm:$0xff] }
 0x158   : > { %6947 = vmatprep.subr.mxu0 %v703_v61 }
 0x159   : > { %6948 = vmatpush3.msra.mxu0 %v703_v61  ;;  %v5753_v61 = vld [vmem:[%s10264_s3 + $0xe0] sm:$0xff] }
 0x15a   : > { %6949 = vmatprep.subr.mxu0 %v702_v62 }
 0x15b   : > { %6950 = vmatpush3.msra.mxu0 %v702_v62  ;;  %v5752_v62 = vld [vmem:[%s10264_s3 + $0xd8] sm:$0xff] }
 0x15c   : > { %6951 = vmatprep.subr.mxu0 %v701_v63 }
 0x15d   : > { %6952 = vmatpush3.msra.mxu0 %v701_v63  ;;  %v5751_v63 = vld [vmem:[%s10264_s3 + $0xd0] sm:$0xff] }
 0x15e   : > { %6953 = vmatprep.subr.mxu0 %v700_v0 }
 0x15f   : > { %6954 = vmatpush3.msra.mxu0 %v700_v0  ;;  %v5750_v0 = vld [vmem:[%s10264_s3 + $0xc8] sm:$0xff] }
 0x160   : > { %6955 = vmatprep.subr.mxu0 %v699_v1 }
 0x161   : > { %6956 = vmatpush3.msra.mxu0 %v699_v1  ;;  %v5749_v1 = vld [vmem:[%s10264_s3 + $0xc0] sm:$0xff] }
 0x162   : > { %6957 = vmatprep.subr.mxu0 %v698_v2 }
 0x163   : > { %6958 = vmatpush3.msra.mxu0 %v698_v2  ;;  %v5748_v2 = vld [vmem:[%s10264_s3 + $0xb8] sm:$0xff] }
 0x164   : > { %6959 = vmatprep.subr.mxu0 %v697_v3 }
 0x165   : > { %6960 = vmatpush3.msra.mxu0 %v697_v3  ;;  %v5747_v3 = vld [vmem:[%s10264_s3 + $0xb0] sm:$0xff] }
 0x166   : > { %6961 = vmatprep.subr.mxu0 %v696_v4 }
 0x167   : > { %6962 = vmatpush3.msra.mxu0 %v696_v4  ;;  %v5746_v4 = vld [vmem:[%s10264_s3 + $0xa8] sm:$0xff] }
 0x168   : > { %6963 = vmatprep.subr.mxu0 %v695_v5 }
 0x169   : > { %6964 = vmatpush3.msra.mxu0 %v695_v5  ;;  %v5745_v5 = vld [vmem:[%s10264_s3 + $0xa0] sm:$0xff] }
 0x16a   : > { %6965 = vmatprep.subr.mxu0 %v694_v6 }
 0x16b   : > { %6966 = vmatpush3.msra.mxu0 %v694_v6  ;;  %v5744_v6 = vld [vmem:[%s10264_s3 + $0x98] sm:$0xff] }
 0x16c   : > { %6967 = vmatprep.subr.mxu0 %v693_v7 }
 0x16d   : > { %6968 = vmatpush3.msra.mxu0 %v693_v7  ;;  %v5743_v7 = vld [vmem:[%s10264_s3 + $0x90] sm:$0xff] }
 0x16e   : > { %6969 = vmatprep.subr.mxu0 %v692_v8 }
 0x16f   : > { %6970 = vmatpush3.msra.mxu0 %v692_v8  ;;  %v5742_v8 = vld [vmem:[%s10264_s3 + $0x88] sm:$0xff] }
 0x170   : > { %6971 = vmatprep.subr.mxu0 %v691_v9 }
 0x171   : > { %6972 = vmatpush3.msra.mxu0 %v691_v9  ;;  %v5741_v9 = vld [vmem:[%s10264_s3 + $0x80] sm:$0xff] }
 0x172   : > { %6974 = vmatmul.mubr.f32.vlgmr.msra.gmra.mxu0 %v8368_v58  ;;  %7025 = vmatprep.subr.mxu0 %v5772_v10 }
 0x173   : > { %7026 = vmatpush3.msra.mxu0 %v5772_v10  ;;  %7057 = vmatprep.mubr.f32.mxu0 %v8363_v55  ;;  %v5788_v10 = vld [vmem:[%s10266_s5 + $0xf8] sm:$0xff] }
 0x174   : > { %7027 = vmatprep.subr.mxu0 %v5771_v11 }
 0x175   : > { %7028 = vmatpush3.msra.mxu0 %v5771_v11  ;;  %v5787_v11 = vld [vmem:[%s10266_s5 + $0xf0] sm:$0xff] }
 0x176   : > { %7029 = vmatprep.subr.mxu0 %v5770_v12 }
 0x177   : > { %7030 = vmatpush3.msra.mxu0 %v5770_v12  ;;  %v5786_v12 = vld [vmem:[%s10266_s5 + $0xe8] sm:$0xff] }
 0x178   : > { %7031 = vmatprep.subr.mxu0 %v5769_v13 }
 0x179   : > { %7032 = vmatpush3.msra.mxu0 %v5769_v13  ;;  %v5785_v13 = vld [vmem:[%s10266_s5 + $0xe0] sm:$0xff] }
 0x17a   : > { %7033 = vmatprep.subr.mxu0 %v5768_v14 }
 0x17b   : > { %7034 = vmatpush3.msra.mxu0 %v5768_v14  ;;  %v5784_v14 = vld [vmem:[%s10266_s5 + $0xd8] sm:$0xff] }
 0x17c   : > { %7035 = vmatprep.subr.mxu0 %v5767_v15 }
 0x17d   : > { %7036 = vmatpush3.msra.mxu0 %v5767_v15  ;;  %v5783_v15 = vld [vmem:[%s10266_s5 + $0xd0] sm:$0xff] }
 0x17e   : > { %7037 = vmatprep.subr.mxu0 %v5766_v16 }
 0x17f   : > { %7038 = vmatpush3.msra.mxu0 %v5766_v16  ;;  %v5782_v16 = vld [vmem:[%s10266_s5 + $0xc8] sm:$0xff] }
 0x180   : > { %7039 = vmatprep.subr.mxu0 %v5765_v17 }
 0x181   : > { %7040 = vmatpush3.msra.mxu0 %v5765_v17  ;;  %v5781_v17 = vld [vmem:[%s10266_s5 + $0xc0] sm:$0xff] }
 0x182   : > { %7041 = vmatprep.subr.mxu0 %v5764_v18 }
 0x183   : > { %7042 = vmatpush3.msra.mxu0 %v5764_v18  ;;  %v5780_v18 = vld [vmem:[%s10266_s5 + $0xb8] sm:$0xff] }
 0x184   : > { %7043 = vmatprep.subr.mxu0 %v5763_v19 }
 0x185   : > { %7044 = vmatpush3.msra.mxu0 %v5763_v19  ;;  %v5779_v19 = vld [vmem:[%s10266_s5 + $0xb0] sm:$0xff] }
 0x186   : > { %7045 = vmatprep.subr.mxu0 %v5762_v20 }
 0x187   : > { %7046 = vmatpush3.msra.mxu0 %v5762_v20  ;;  %v5778_v20 = vld [vmem:[%s10266_s5 + $0xa8] sm:$0xff] }
 0x188   : > { %7047 = vmatprep.subr.mxu0 %v5761_v21 }
 0x189   : > { %7048 = vmatpush3.msra.mxu0 %v5761_v21  ;;  %v5777_v21 = vld [vmem:[%s10266_s5 + $0xa0] sm:$0xff] }
 0x18a   : > { %7049 = vmatprep.subr.mxu0 %v5760_v22 }
 0x18b   : > { %7050 = vmatpush3.msra.mxu0 %v5760_v22  ;;  %v5776_v22 = vld [vmem:[%s10266_s5 + $0x98] sm:$0xff] }
 0x18c   : > { %7051 = vmatprep.subr.mxu0 %v5759_v23 }
 0x18d   : > { %7052 = vmatpush3.msra.mxu0 %v5759_v23  ;;  %v5775_v23 = vld [vmem:[%s10266_s5 + $0x90] sm:$0xff] }
 0x18e   : > { %7053 = vmatprep.subr.mxu0 %v5758_v24 }
 0x18f   : > { %7054 = vmatpush3.msra.mxu0 %v5758_v24  ;;  %v5774_v24 = vld [vmem:[%s10266_s5 + $0x88] sm:$0xff] }
 0x190   : > { %7055 = vmatprep.subr.mxu0 %v5757_v25 }
 0x191   : > { %7056 = vmatpush3.msra.mxu0 %v5757_v25  ;;  %v5773_v25 = vld [vmem:[%s10266_s5 + $0x80] sm:$0xff] }
 0x192   : > { %7058 = vmatmul.mubr.f32.vlgmr.msra.gmra.mxu0 %v8368_v58 }
 0x212   : > { %v6905_v26 = vpop.f32.mrf.mxu0  ;;  %v6940_v27 = vpop.f32.mrf.mxu1 }
 0x213   : > { %6976 = vmatprep.subr.msk.mxu1 %vm782_vm0, %v6940_v27 }
 0x214   : > { %v591_v28 = vpop.f32.mrf.mxu0  ;;  %v682_v29 = vpop.f32.mrf.mxu1  ;;  %6977 = vmatpush3.xpose.msk.msra.mxu1 %vm782_vm0, %v6940_v27  ;;  %v978_v27 = vld [vmem:[%s10267_s6 + $0x10] sm:$0xff] }
 0x215   : > { %6978 = vmatprep.subr.msk.mxu1 %vm782_vm0, %v682_v29  ;;  %6980 = vmatprep.mubr.msk.f32.mxu1 %vm782_vm0, %v591_v28  ;;  %v977_v28 = vld [vmem:[%s10267_s6 + $0x8] sm:$0xff] }
 0x218   : > { %6979 = vmatpush3.xpose.msk.msra.mxu1 %vm782_vm0, %v682_v29  ;;  %v976_v29 = vld [vmem:[%s10267_s6] sm:$0xff] }
 0x21b   : > { %6981 = vmatmul.mubr.msk.f32.vlgmr.msra.gmra.mxu1 %vm782_vm0, %v6905_v26  ;;  %v979_v26 = vld [vmem:[%s10267_s6 + $0x18] sm:$0xff] }
 0x232   : > { %v6975_v30 = vpop.f32.mrf.mxu0 }
 0x233   : > { %6983 = vmatprep.subr.mxu1 %v6975_v30 }
 0x234   : > { %v773_v31 = vpop.f32.mrf.mxu0  ;;  %6984 = vmatpush3.msra.mxu1 %v6975_v30  ;;  %v5834_v30 = vld [vmem:[%s10265_s4 + $0x178] sm:$0xff] }
 0x235   : > { %6985 = vmatprep.subr.mxu1 %v773_v31 }
 0x236   : > { %6986 = vmatpush3.msra.mxu1 %v773_v31 }
 0x237   : > { %6990 = vmatprep.subr.mxu1 %v5756_v50 }
 0x252   : > { %v7059_v32 = vpop.f32.mrf.mxu0 }
 0x253   : > { %7095 = vmatprep.subr.msk.mxu0 %vm782_vm0, %v7059_v32 }
 0x254   : > { %v1155_v33 = vpop.f32.mrf.mxu0  ;;  %7096 = vmatpush3.xpose.msk.msra.mxu0 %vm782_vm0, %v7059_v32 }
 0x255   : > { %7097 = vmatprep.subr.msk.mxu0 %vm782_vm0, %v1155_v33 }
 0x258   : > { %7098 = vmatpush3.xpose.msk.msra.mxu0 %vm782_vm0, %v1155_v33  ;;  %v5833_v33 = vld [vmem:[%s10265_s4 + $0x170] sm:$0xff] }
 0x2db   : > { %v6982_v34 = vpop.f32.mrf.mxu1 }
 0x2dc   : > { %v871_v35 = vmul.f32 0.17677669, %v6982_v34  ;;  %v5832_v34 = vld [vmem:[%s10265_s4 + $0x168] sm:$0xff] }
 0x2dd   : > { %v861_v36 = vpop.f32.mrf.mxu1 }
 0x2de   : > { %v870_v37 = vmul.f32 0.17677669, %v861_v36  ;;  %v876_v38 = vsel %vm872_vm1, %v871_v35, -inf  ;;  %v5830_v36 = vld [vmem:[%s10265_s4 + $0x158] sm:$0xff] }
 0x2df   : > { %877 = vmax.xlane.f32.xlu1 %v876_v38  ;;  %v5828_v38 = vld [vmem:[%s10265_s4 + $0x148] sm:$0xff] }
 0x2e0   : > { %v873_v39 = vsel %vm872_vm1, %v870_v37, -inf }
 0x2e1   : > { %874 = vmax.xlane.f32.xlu0 %v873_v39  ;;  %v5827_v39 = vld [vmem:[%s10265_s4 + $0x140] sm:$0xff] }
 0x368   : > { %v878_v40 = vpop.xlane.xlu1 %877 }
 0x369   : > { %v880_v41 = vsub.f32 %v871_v35, %v878_v40  ;;  %v5831_v35 = vld [vmem:[%s10265_s4 + $0x160] sm:$0xff]  ;;  %v5826_v40 = vld [vmem:[%s10265_s4 + $0x138] sm:$0xff] }
 0x36a   : > { %v875_v42 = vpop.xlane.xlu0 %874 }
 0x36b   : > { %v883_v43 = vmul.f32 1.442695, %v880_v41  ;;  %v879_v44 = vsub.f32 %v870_v37, %v875_v42  ;;  %v5829_v37 = vld [vmem:[%s10265_s4 + $0x150] sm:$0xff]  ;;  %v5824_v42 = vld [vmem:[%s10265_s4 + $0x128] sm:$0xff] }
 0x36c   : > { %v5825_v41 = vld [vmem:[%s10265_s4 + $0x130] sm:$0xff] }
 0x36d   : > { %7957 = vpow2.f32 %v883_v43  ;;  %v881_v45 = vmul.f32 1.442695, %v879_v44  ;;  %v5823_v43 = vld [vmem:[%s10265_s4 + $0x120] sm:$0xff]  ;;  %v5822_v44 = vld [vmem:[%s10265_s4 + $0x118] sm:$0xff] }
 0x36f   : > { %7959 = vpow2.f32 %v881_v45  ;;  %v5821_v45 = vld [vmem:[%s10265_s4 + $0x110] sm:$0xff] }
 0x37a   : > { %v7958_v46 = vpop.eup %7957 }
 0x37b   : > { %v888_v47 = vsel %vm872_vm1, %v7958_v46, 0.0 }
 0x37c   : > { %v7960_v48 = vpop.eup %7959  ;;  %889 = vadd.xlane.f32.xlu1 %v888_v47  ;;  %v5819_v47 = vld [vmem:[%s10265_s4 + $0x100] sm:$0xff] }
 0x37d   : > { %v885_v49 = vsel %vm872_vm1, %v7960_v48, 0.0 }
 0x37e   : > { %886 = vadd.xlane.f32.xlu0 %v885_v49 }
 0x405   : > { %v890_v51 = vpop.xlane.xlu1 %889 }
 0x406   : > { %7961 = vrcp.f32 %v890_v51 }
 0x407   : > { %v887_v52 = vpop.xlane.xlu0 %886 }
 0x408   : > { %7963 = vrcp.f32 %v887_v52 }
 0x413   : > { %v7962_v53 = vpop.eup %7961 }
 0x414   : > { %v894_v57 = vmul.f32 %v7962_v53, %v7958_v46  ;;  %v5820_v46 = vld [vmem:[%s10265_s4 + $0x108] sm:$0xff] }
 0x415   : > { %v7964_v54 = vpop.eup %7963 }
 0x416   : > { %v893_v56 = vmul.f32 %v7964_v54, %v7960_v48 }
 0x418   : > { %6987 = vmatprep.mubr.msk.f32.mxu1 %vm872_vm1, %v893_v56 }
 0x419   : > { %6988 = vmatmul.mubr.msk.f32.vlgmr.msra.gmra.mxu1 %vm872_vm1, %v894_v57 }
 0x41a   : > { %6991 = vmatpush3.msra.mxu1 %v5756_v50  ;;  %7022 = vmatprep.mubr.f32.mxu1 %v8363_v55 }
 0x41b   : > { %6992 = vmatprep.subr.mxu1 %v5755_v59 }
 0x41c   : > { %6993 = vmatpush3.msra.mxu1 %v5755_v59 }
 0x41d   : > { %6994 = vmatprep.subr.mxu1 %v5754_v60 }
 0x41e   : > { %6995 = vmatpush3.msra.mxu1 %v5754_v60 }
 0x41f   : > { %6996 = vmatprep.subr.mxu1 %v5753_v61 }
 0x420   : > { %6997 = vmatpush3.msra.mxu1 %v5753_v61 }
 0x421   : > { %6998 = vmatprep.subr.mxu1 %v5752_v62 }
 0x422   : > { %6999 = vmatpush3.msra.mxu1 %v5752_v62 }
 0x423   : > { %7000 = vmatprep.subr.mxu1 %v5751_v63 }
 0x424   : > { %7001 = vmatpush3.msra.mxu1 %v5751_v63 }
 0x425   : > { %7002 = vmatprep.subr.mxu1 %v5750_v0 }
 0x426   : > { %7003 = vmatpush3.msra.mxu1 %v5750_v0 }
 0x427   : > { %7004 = vmatprep.subr.mxu1 %v5749_v1 }
 0x428   : > { %7005 = vmatpush3.msra.mxu1 %v5749_v1 }
 0x429   : > { %7006 = vmatprep.subr.mxu1 %v5748_v2 }
 0x42a   : > { %7007 = vmatpush3.msra.mxu1 %v5748_v2 }
 0x42b   : > { %7008 = vmatprep.subr.mxu1 %v5747_v3 }
 0x42c   : > { %7009 = vmatpush3.msra.mxu1 %v5747_v3 }
 0x42d   : > { %7010 = vmatprep.subr.mxu1 %v5746_v4 }
 0x42e   : > { %7011 = vmatpush3.msra.mxu1 %v5746_v4 }
 0x42f   : > { %7012 = vmatprep.subr.mxu1 %v5745_v5 }
 0x430   : > { %7013 = vmatpush3.msra.mxu1 %v5745_v5 }
 0x431   : > { %7014 = vmatprep.subr.mxu1 %v5744_v6 }
 0x432   : > { %7015 = vmatpush3.msra.mxu1 %v5744_v6 }
 0x433   : > { %7016 = vmatprep.subr.mxu1 %v5743_v7 }
 0x434   : > { %7017 = vmatpush3.msra.mxu1 %v5743_v7 }
 0x435   : > { %7018 = vmatprep.subr.mxu1 %v5742_v8 }
 0x436   : > { %7019 = vmatpush3.msra.mxu1 %v5742_v8 }
 0x437   : > { %7020 = vmatprep.subr.mxu1 %v5741_v9 }
 0x438   : > { %7021 = vmatpush3.msra.mxu1 %v5741_v9 }
 0x439   : > { %7023 = vmatmul.mubr.f32.vlgmr.msra.gmra.mxu1 %v8368_v58  ;;  %7060 = vmatprep.subr.mxu1 %v5788_v10 }
 0x43a   : > { %7061 = vmatpush3.msra.mxu1 %v5788_v10  ;;  %7092 = vmatprep.mubr.f32.mxu1 %v8363_v55  ;;  %v5798_v10 = vld [vmem:[%s10267_s6 + $0x38] sm:$0xff] }
 0x43b   : > { %7062 = vmatprep.subr.mxu1 %v5787_v11 }
 0x43c   : > { %7063 = vmatpush3.msra.mxu1 %v5787_v11 }
 0x43d   : > { %7064 = vmatprep.subr.mxu1 %v5786_v12 }
 0x43e   : > { %7065 = vmatpush3.msra.mxu1 %v5786_v12 }
 0x43f   : > { %7066 = vmatprep.subr.mxu1 %v5785_v13 }
 0x440   : > { %7067 = vmatpush3.msra.mxu1 %v5785_v13 }
 0x441   : > { %7068 = vmatprep.subr.mxu1 %v5784_v14 }
 0x442   : > { %7069 = vmatpush3.msra.mxu1 %v5784_v14 }
 0x443   : > { %7070 = vmatprep.subr.mxu1 %v5783_v15 }
 0x444   : > { %7071 = vmatpush3.msra.mxu1 %v5783_v15 }
 0x445   : > { %7072 = vmatprep.subr.mxu1 %v5782_v16 }
 0x446   : > { %7073 = vmatpush3.msra.mxu1 %v5782_v16 }
 0x447   : > { %7074 = vmatprep.subr.mxu1 %v5781_v17 }
 0x448   : > { %7075 = vmatpush3.msra.mxu1 %v5781_v17  ;;  %v5797_v17 = vld [vmem:[%s10267_s6 + $0x30] sm:$0xff] }
 0x449   : > { %7076 = vmatprep.subr.mxu1 %v5780_v18 }
 0x44a   : > { %7077 = vmatpush3.msra.mxu1 %v5780_v18  ;;  %v5796_v18 = vld [vmem:[%s10267_s6 + $0x28] sm:$0xff] }
 0x44b   : > { %7078 = vmatprep.subr.mxu1 %v5779_v19 }
 0x44c   : > { %7079 = vmatpush3.msra.mxu1 %v5779_v19  ;;  %v5795_v19 = vld [vmem:[%s10267_s6 + $0x20] sm:$0xff] }
 0x44d   : > { %7080 = vmatprep.subr.mxu1 %v5778_v20 }
 0x44e   : > { %7081 = vmatpush3.msra.mxu1 %v5778_v20  ;;  %v5818_v20 = vld [vmem:[%s10264_s3 + $0x178] sm:$0xff] }
 0x44f   : > { %7082 = vmatprep.subr.mxu1 %v5777_v21 }
 0x450   : > { %7083 = vmatpush3.msra.mxu1 %v5777_v21 }
 0x451   : > { %7084 = vmatprep.subr.mxu1 %v5776_v22 }
 0x452   : > { %7085 = vmatpush3.msra.mxu1 %v5776_v22 }
 0x453   : > { %7086 = vmatprep.subr.mxu1 %v5775_v23 }
 0x454   : > { %7087 = vmatpush3.msra.mxu1 %v5775_v23  ;;  %v5817_v23 = vld [vmem:[%s10264_s3 + $0x170] sm:$0xff] }
 0x455   : > { %7088 = vmatprep.subr.mxu1 %v5774_v24 }
 0x456   : > { %7089 = vmatpush3.msra.mxu1 %v5774_v24  ;;  %v5816_v24 = vld [vmem:[%s10264_s3 + $0x168] sm:$0xff] }
 0x457   : > { %7090 = vmatprep.subr.mxu1 %v5773_v25 }
 0x458   : > { %7091 = vmatpush3.msra.mxu1 %v5773_v25  ;;  %v5815_v25 = vld [vmem:[%s10264_s3 + $0x160] sm:$0xff] }
 0x459   : > { %7093 = vmatmul.mubr.f32.vlgmr.msra.gmra.mxu1 %v8368_v58  ;;  %7120 = vmatprep.subr.mxu1 %v979_v26 }
 0x45a   : > { %7121 = vmatpush3.msra.mxu1 %v979_v26  ;;  %v5814_v26 = vld [vmem:[%s10264_s3 + $0x158] sm:$0xff] }
 0x45b   : > { %7122 = vmatprep.subr.mxu1 %v978_v27 }
 0x45c   : > { %7123 = vmatpush3.msra.mxu1 %v978_v27  ;;  %v5813_v27 = vld [vmem:[%s10264_s3 + $0x150] sm:$0xff] }
 0x45d   : > { %7124 = vmatprep.subr.mxu1 %v977_v28 }
 0x45e   : > { %7125 = vmatpush3.msra.mxu1 %v977_v28  ;;  %v5812_v28 = vld [vmem:[%s10264_s3 + $0x148] sm:$0xff] }
 0x45f   : > { %7126 = vmatprep.subr.mxu1 %v976_v29 }
 0x460   : > { %7127 = vmatpush3.msra.mxu1 %v976_v29  ;;  %v5811_v29 = vld [vmem:[%s10264_s3 + $0x140] sm:$0xff] }
 0x461   : > { %7166 = vmatprep.subr.mxu1 %v5834_v30 }
 0x4d9   : > { %v6989_v31 = vpop.f32.mrf.mxu1 }
 0x4db   : > { %v967_v32 = vpop.f32.mrf.mxu1 }
 0x4dc   : > { %7128 = vmatprep.mubr.msk.f32.mxu1 %vm782_vm0, %v967_v32  ;;  %v5808_v32 = vld [vmem:[%s10264_s3 + $0x128] sm:$0xff] }
 0x4dd   : > { %7129 = vmatmul.mubr.msk.f32.vlgmr.msra.gmra.mxu1 %vm782_vm0, %v6989_v31  ;;  %v5809_v31 = vld [vmem:[%s10264_s3 + $0x130] sm:$0xff] }
 0x4de   : > { %7167 = vmatpush3.msra.mxu1 %v5834_v30  ;;  %7198 = vmatprep.mubr.f32.mxu1 %v8363_v55  ;;  %v5810_v30 = vld [vmem:[%s10264_s3 + $0x138] sm:$0xff] }
 0x4df   : > { %7168 = vmatprep.subr.mxu1 %v5833_v33 }
 0x4e0   : > { %7169 = vmatpush3.msra.mxu1 %v5833_v33  ;;  %v5807_v33 = vld [vmem:[%s10264_s3 + $0x120] sm:$0xff] }
 0x4e1   : > { %7170 = vmatprep.subr.mxu1 %v5832_v34 }
 0x4e2   : > { %7171 = vmatpush3.msra.mxu1 %v5832_v34  ;;  %v5806_v34 = vld [vmem:[%s10264_s3 + $0x118] sm:$0xff] }
 0x4e3   : > { %7172 = vmatprep.subr.mxu1 %v5831_v35 }
 0x4e4   : > { %7173 = vmatpush3.msra.mxu1 %v5831_v35  ;;  %v5805_v35 = vld [vmem:[%s10264_s3 + $0x110] sm:$0xff] }
 0x4e5   : > { %7174 = vmatprep.subr.mxu1 %v5830_v36 }
 0x4e6   : > { %7175 = vmatpush3.msra.mxu1 %v5830_v36  ;;  %v5804_v36 = vld [vmem:[%s10264_s3 + $0x108] sm:$0xff] }
 0x4e7   : > { %7176 = vmatprep.subr.mxu1 %v5829_v37 }
 0x4e8   : > { %7177 = vmatpush3.msra.mxu1 %v5829_v37  ;;  %v5803_v37 = vld [vmem:[%s10264_s3 + $0x100] sm:$0xff] }
 0x4e9   : > { %7178 = vmatprep.subr.mxu1 %v5828_v38 }
 0x4ea   : > { %7179 = vmatpush3.msra.mxu1 %v5828_v38  ;;  %v5850_v38 = vld [vmem:[%s10266_s5 + $0x178] sm:$0xff] }
 0x4eb   : > { %7180 = vmatprep.subr.mxu1 %v5827_v39 }
 0x4ec   : > { %7181 = vmatpush3.msra.mxu1 %v5827_v39  ;;  %v5849_v39 = vld [vmem:[%s10266_s5 + $0x170] sm:$0xff] }
 0x4ed   : > { %7182 = vmatprep.subr.mxu1 %v5826_v40 }
 0x4ee   : > { %7183 = vmatpush3.msra.mxu1 %v5826_v40  ;;  %v5848_v40 = vld [vmem:[%s10266_s5 + $0x168] sm:$0xff] }
 0x4ef   : > { %7184 = vmatprep.subr.mxu1 %v5825_v41 }
 0x4f0   : > { %7185 = vmatpush3.msra.mxu1 %v5825_v41  ;;  %v5847_v41 = vld [vmem:[%s10266_s5 + $0x160] sm:$0xff] }
 0x4f1   : > { %7186 = vmatprep.subr.mxu1 %v5824_v42 }
 0x4f2   : > { %7187 = vmatpush3.msra.mxu1 %v5824_v42  ;;  %v5846_v42 = vld [vmem:[%s10266_s5 + $0x158] sm:$0xff] }
 0x4f3   : > { %7188 = vmatprep.subr.mxu1 %v5823_v43 }
 0x4f4   : > { %7189 = vmatpush3.msra.mxu1 %v5823_v43  ;;  %v5845_v43 = vld [vmem:[%s10266_s5 + $0x150] sm:$0xff] }
 0x4f5   : > { %7190 = vmatprep.subr.mxu1 %v5822_v44 }
 0x4f6   : > { %7191 = vmatpush3.msra.mxu1 %v5822_v44  ;;  %v5844_v44 = vld [vmem:[%s10266_s5 + $0x148] sm:$0xff] }
 0x4f7   : > { %7192 = vmatprep.subr.mxu1 %v5821_v45 }
 0x4f8   : > { %7193 = vmatpush3.msra.mxu1 %v5821_v45  ;;  %v5843_v45 = vld [vmem:[%s10266_s5 + $0x140] sm:$0xff] }
 0x4f9   : > { %v7024_v48 = vpop.f32.mrf.mxu1  ;;  %7194 = vmatprep.subr.mxu1 %v5820_v46 }
 0x4fa   : > { %7195 = vmatpush3.msra.mxu1 %v5820_v46  ;;  %v5842_v46 = vld [vmem:[%s10266_s5 + $0x138] sm:$0xff] }
 0x4fb   : > { %v1063_v49 = vpop.f32.mrf.mxu1  ;;  %7196 = vmatprep.subr.mxu1 %v5819_v47 }
 0x4fc   : > { %7099 = vmatprep.mubr.msk.f32.mxu0 %vm782_vm0, %v1063_v49  ;;  %7197 = vmatpush3.msra.mxu1 %v5819_v47  ;;  %v5841_v47 = vld [vmem:[%s10266_s5 + $0x130] sm:$0xff]  ;;  %v5839_v49 = vld [vmem:[%s10266_s5 + $0x120] sm:$0xff] }
 0x4fd   : > { %7100 = vmatmul.mubr.msk.f32.vlgmr.msra.gmra.mxu0 %vm782_vm0, %v7024_v48  ;;  %7199 = vmatmul.mubr.f32.vlgmr.msra.gmra.mxu1 %v8368_v58  ;;  %v5840_v48 = vld [vmem:[%s10266_s5 + $0x128] sm:$0xff] }
 0x519   : > { %v7094_v50 = vpop.f32.mrf.mxu1 }
 0x51a   : > { %7102 = vmatprep.subr.mxu0 %v7094_v50 }
 0x51b   : > { %v1247_v51 = vpop.f32.mrf.mxu1  ;;  %7103 = vmatpush3.msra.mxu0 %v7094_v50  ;;  %v5838_v50 = vld [vmem:[%s10266_s5 + $0x118] sm:$0xff] }
 0x51c   : > { %7104 = vmatprep.subr.mxu0 %v1247_v51 }
 0x51d   : > { %7105 = vmatpush3.msra.mxu0 %v1247_v51  ;;  %v5837_v51 = vld [vmem:[%s10266_s5 + $0x110] sm:$0xff] }
 0x51e   : > { %7109 = vmatprep.subr.mxu0 %v5798_v10 }
 0x59d   : > { %v8651_v52 = vpop.f32.mrf.mxu1 }
 0x59f   : > { %v8653_v53 = vpop.f32.mrf.mxu1 }
 0x5bd   : > { %v7101_v54 = vpop.f32.mrf.mxu0  ;;  %v7200_v56 = vpop.f32.mrf.mxu1 }
 0x5be   : > { %v1344_v57 = vmul.f32 0.17677669, %v7101_v54  ;;  %7236 = vmatprep.subr.msk.mxu1 %vm782_vm0, %v7200_v56  ;;  %v5836_v54 = vld [vmem:[%s10266_s5 + $0x108] sm:$0xff] }
 0x5bf   : > { %v1334_v59 = vpop.f32.mrf.mxu0  ;;  %v1790_v60 = vpop.f32.mrf.mxu1  ;;  %7237 = vmatpush3.xpose.msk.msra.mxu1 %vm782_vm0, %v7200_v56  ;;  %v5835_v56 = vld [vmem:[%s10266_s5 + $0x100] sm:$0xff] }
 0x5c0   : > { %v1343_v61 = vmul.f32 0.17677669, %v1334_v59  ;;  %7238 = vmatprep.subr.msk.mxu1 %vm782_vm0, %v1790_v60  ;;  %v1348_v62 = vsel %vm872_vm1, %v1344_v57, -inf  ;;  %v5893_v59 = vld [vmem:[%s10265_s4 + $0x1f0] sm:$0xff] }
 0x5c1   : > { %1349 = vmax.xlane.f32.xlu1 %v1348_v62  ;;  %v5890_v62 = vld [vmem:[%s10265_s4 + $0x1d8] sm:$0xff] }
 0x5c2   : > { %v1345_v63 = vsel %vm872_vm1, %v1343_v61, -inf }
 0x5c3   : > { %1346 = vmax.xlane.f32.xlu0 %v1345_v63  ;;  %7239 = vmatpush3.xpose.msk.msra.mxu1 %vm782_vm0, %v1790_v60  ;;  %v5892_v60 = vld [vmem:[%s10265_s4 + $0x1e8] sm:$0xff]  ;;  %v5889_v63 = vld [vmem:[%s10265_s4 + $0x1d0] sm:$0xff] }
 0x64a   : > { %v1350_v0 = vpop.xlane.xlu1 %1349 }
 0x64b   : > { %v1352_v1 = vsub.f32 %v1344_v57, %v1350_v0  ;;  %v5894_v57 = vld [vmem:[%s10265_s4 + $0x1f8] sm:$0xff]  ;;  %v5888_v0 = vld [vmem:[%s10265_s4 + $0x1c8] sm:$0xff] }
 0x64c   : > { %v1347_v2 = vpop.xlane.xlu0 %1346 }
 0x64d   : > { %v1355_v3 = vmul.f32 1.442695, %v1352_v1  ;;  %v1351_v4 = vsub.f32 %v1343_v61, %v1347_v2  ;;  %v5891_v61 = vld [vmem:[%s10265_s4 + $0x1e0] sm:$0xff]  ;;  %v5886_v2 = vld [vmem:[%s10265_s4 + $0x1b8] sm:$0xff] }
 0x64e   : > { %v5887_v1 = vld [vmem:[%s10265_s4 + $0x1c0] sm:$0xff] }
 0x64f   : > { %7965 = vpow2.f32 %v1355_v3  ;;  %v1353_v5 = vmul.f32 1.442695, %v1351_v4  ;;  %v5885_v3 = vld [vmem:[%s10265_s4 + $0x1b0] sm:$0xff]  ;;  %v5884_v4 = vld [vmem:[%s10265_s4 + $0x1a8] sm:$0xff] }
 0x651   : > { %7967 = vpow2.f32 %v1353_v5  ;;  %v5883_v5 = vld [vmem:[%s10265_s4 + $0x1a0] sm:$0xff] }
 0x65c   : > { %v7966_v6 = vpop.eup %7965 }
 0x65d   : > { %v1360_v7 = vsel %vm872_vm1, %v7966_v6, 0.0 }
 0x65e   : > { %v7968_v8 = vpop.eup %7967  ;;  %1361 = vadd.xlane.f32.xlu1 %v1360_v7  ;;  %v5881_v7 = vld [vmem:[%s10265_s4 + $0x190] sm:$0xff] }
 0x65f   : > { %v1357_v9 = vsel %vm872_vm1, %v7968_v8, 0.0 }
 0x660   : > { %1358 = vadd.xlane.f32.xlu0 %v1357_v9  ;;  %v5879_v9 = vld [vmem:[%s10265_s4 + $0x180] sm:$0xff] }
 0x6e7   : > { %v1362_v11 = vpop.xlane.xlu1 %1361 }
 0x6e8   : > { %7969 = vrcp.f32 %v1362_v11 }
 0x6e9   : > { %v1359_v12 = vpop.xlane.xlu0 %1358 }
 0x6ea   : > { %7971 = vrcp.f32 %v1359_v12 }
 0x6f5   : > { %v7970_v13 = vpop.eup %7969 }
 0x6f6   : > { %v1366_v16 = vmul.f32 %v7970_v13, %v7966_v6  ;;  %v5882_v6 = vld [vmem:[%s10265_s4 + $0x198] sm:$0xff] }
 0x6f7   : > { %v7972_v14 = vpop.eup %7971 }
 0x6f8   : > { %v1365_v15 = vmul.f32 %v7972_v14, %v7968_v8  ;;  %v5880_v8 = vld [vmem:[%s10265_s4 + $0x188] sm:$0xff] }
 0x6fa   : > { %7106 = vmatprep.mubr.msk.f32.mxu0 %vm872_vm1, %v1365_v15 }
 0x6fb   : > { %7107 = vmatmul.mubr.msk.f32.vlgmr.msra.gmra.mxu0 %vm872_vm1, %v1366_v16 }
 0x6fc   : > { %7110 = vmatpush3.msra.mxu0 %v5798_v10 }
 0x6fd   : > { %7111 = vmatprep.subr.mxu0 %v5797_v17 }
 0x6fe   : > { %7112 = vmatpush3.msra.mxu0 %v5797_v17 }
 0x6ff   : > { %7113 = vmatprep.subr.mxu0 %v5796_v18 }
 0x700   : > { %7114 = vmatpush3.msra.mxu0 %v5796_v18 }
 0x701   : > { %7115 = vmatprep.subr.mxu0 %v5795_v19 }
 0x702   : > { %7116 = vmatpush3.msra.mxu0 %v5795_v19 }
 0x703   : > { %7131 = vmatprep.subr.mxu0 %v5818_v20 }
 0x7bb   : > { %v7108_v21 = vpop.f32.mrf.mxu0 }
 0x7bd   : > { %v1439_v22 = vpop.f32.mrf.mxu0 }
 0x7be   : > { %7117 = vmatprep.mubr.msk.f32.mxu0 %vm782_vm0, %v1439_v22 }
 0x7bf   : > { %7118 = vmatmul.mubr.msk.f32.vlgmr.msra.gmra.mxu0 %vm782_vm0, %v7108_v21 }
 0x7c0   : > { %7132 = vmatpush3.msra.mxu0 %v5818_v20  ;;  %7163 = vmatprep.mubr.f32.mxu0 %v8363_v55 }
 0x7c1   : > { %7133 = vmatprep.subr.mxu0 %v5817_v23 }
 0x7c2   : > { %7134 = vmatpush3.msra.mxu0 %v5817_v23 }
 0x7c3   : > { %7135 = vmatprep.subr.mxu0 %v5816_v24 }
 0x7c4   : > { %7136 = vmatpush3.msra.mxu0 %v5816_v24 }
 0x7c5   : > { %7137 = vmatprep.subr.mxu0 %v5815_v25 }
 0x7c6   : > { %7138 = vmatpush3.msra.mxu0 %v5815_v25 }
 0x7c7   : > { %7139 = vmatprep.subr.mxu0 %v5814_v26 }
 0x7c8   : > { %7140 = vmatpush3.msra.mxu0 %v5814_v26 }
 0x7c9   : > { %7141 = vmatprep.subr.mxu0 %v5813_v27 }
 0x7ca   : > { %7142 = vmatpush3.msra.mxu0 %v5813_v27 }
 0x7cb   : > { %7143 = vmatprep.subr.mxu0 %v5812_v28 }
 0x7cc   : > { %7144 = vmatpush3.msra.mxu0 %v5812_v28 }
 0x7cd   : > { %7145 = vmatprep.subr.mxu0 %v5811_v29 }
 0x7ce   : > { %7146 = vmatpush3.msra.mxu0 %v5811_v29 }
 0x7cf   : > { %7147 = vmatprep.subr.mxu0 %v5810_v30 }
 0x7d0   : > { %7148 = vmatpush3.msra.mxu0 %v5810_v30 }
 0x7d1   : > { %7149 = vmatprep.subr.mxu0 %v5809_v31 }
 0x7d2   : > { %7150 = vmatpush3.msra.mxu0 %v5809_v31 }
 0x7d3   : > { %7151 = vmatprep.subr.mxu0 %v5808_v32 }
 0x7d4   : > { %7152 = vmatpush3.msra.mxu0 %v5808_v32 }
 0x7d5   : > { %7153 = vmatprep.subr.mxu0 %v5807_v33 }
 0x7d6   : > { %7154 = vmatpush3.msra.mxu0 %v5807_v33 }
 0x7d7   : > { %7155 = vmatprep.subr.mxu0 %v5806_v34 }
 0x7d8   : > { %7156 = vmatpush3.msra.mxu0 %v5806_v34  ;;  %v5860_v34 = vld [vmem:[%s10267_s6 + $0x58] sm:$0xff] }
 0x7d9   : > { %7157 = vmatprep.subr.mxu0 %v5805_v35 }
 0x7da   : > { %7158 = vmatpush3.msra.mxu0 %v5805_v35 }
 0x7db   : > { %7159 = vmatprep.subr.mxu0 %v5804_v36 }
 0x7dc   : > { %7160 = vmatpush3.msra.mxu0 %v5804_v36 }
 0x7dd   : > { %7161 = vmatprep.subr.mxu0 %v5803_v37 }
 0x7de   : > { %7162 = vmatpush3.msra.mxu0 %v5803_v37 }
 0x7df   : > { %7164 = vmatmul.mubr.f32.vlgmr.msra.gmra.mxu0 %v8368_v58  ;;  %7201 = vmatprep.subr.mxu0 %v5850_v38 }
 0x7e0   : > { %7202 = vmatpush3.msra.mxu0 %v5850_v38  ;;  %7233 = vmatprep.mubr.f32.mxu0 %v8363_v55 }
 0x7e1   : > { %7203 = vmatprep.subr.mxu0 %v5849_v39 }
 0x7e2   : > { %7204 = vmatpush3.msra.mxu0 %v5849_v39 }
 0x7e3   : > { %7205 = vmatprep.subr.mxu0 %v5848_v40 }
 0x7e4   : > { %7206 = vmatpush3.msra.mxu0 %v5848_v40 }
 0x7e5   : > { %7207 = vmatprep.subr.mxu0 %v5847_v41 }
 0x7e6   : > { %7208 = vmatpush3.msra.mxu0 %v5847_v41  ;;  %v5859_v41 = vld [vmem:[%s10267_s6 + $0x50] sm:$0xff] }
 0x7e7   : > { %7209 = vmatprep.subr.mxu0 %v5846_v42 }
 0x7e8   : > { %7210 = vmatpush3.msra.mxu0 %v5846_v42  ;;  %v5858_v42 = vld [vmem:[%s10267_s6 + $0x48] sm:$0xff] }
 0x7e9   : > { %7211 = vmatprep.subr.mxu0 %v5845_v43 }
 0x7ea   : > { %7212 = vmatpush3.msra.mxu0 %v5845_v43  ;;  %v5857_v43 = vld [vmem:[%s10267_s6 + $0x40] sm:$0xff] }
 0x7eb   : > { %7213 = vmatprep.subr.mxu0 %v5844_v44 }
 0x7ec   : > { %7214 = vmatpush3.msra.mxu0 %v5844_v44  ;;  %v5878_v44 = vld [vmem:[%s10264_s3 + $0x1f8] sm:$0xff] }
 0x7ed   : > { %7215 = vmatprep.subr.mxu0 %v5843_v45 }
 0x7ee   : > { %7216 = vmatpush3.msra.mxu0 %v5843_v45 }
 0x7ef   : > { %7217 = vmatprep.subr.mxu0 %v5842_v46 }
 0x7f0   : > { %7218 = vmatpush3.msra.mxu0 %v5842_v46 }
 0x7f1   : > { %7219 = vmatprep.subr.mxu0 %v5841_v47 }
 0x7f2   : > { %7220 = vmatpush3.msra.mxu0 %v5841_v47  ;;  %v5877_v47 = vld [vmem:[%s10264_s3 + $0x1f0] sm:$0xff] }
 0x7f3   : > { %7221 = vmatprep.subr.mxu0 %v5840_v48 }
 0x7f4   : > { %7222 = vmatpush3.msra.mxu0 %v5840_v48  ;;  %v5876_v48 = vld [vmem:[%s10264_s3 + $0x1e8] sm:$0xff] }
 0x7f5   : > { %7223 = vmatprep.subr.mxu0 %v5839_v49 }
 0x7f6   : > { %7224 = vmatpush3.msra.mxu0 %v5839_v49  ;;  %v5875_v49 = vld [vmem:[%s10264_s3 + $0x1e0] sm:$0xff] }
 0x7f7   : > { %7225 = vmatprep.subr.mxu0 %v5838_v50 }
 0x7f8   : > { %7226 = vmatpush3.msra.mxu0 %v5838_v50  ;;  %v5874_v50 = vld [vmem:[%s10264_s3 + $0x1d8] sm:$0xff] }
 0x7f9   : > { %7227 = vmatprep.subr.mxu0 %v5837_v51 }
 0x7fa   : > { %7228 = vmatpush3.msra.mxu0 %v5837_v51  ;;  %v5873_v51 = vld [vmem:[%s10264_s3 + $0x1d0] sm:$0xff] }
 0x7fb   : > { %7229 = vmatprep.subr.mxu0 %v5836_v54 }
 0x7fc   : > { %7230 = vmatpush3.msra.mxu0 %v5836_v54  ;;  %v5872_v54 = vld [vmem:[%s10264_s3 + $0x1c8] sm:$0xff] }
 0x7fd   : > { %7231 = vmatprep.subr.mxu0 %v5835_v56 }
 0x7fe   : > { %7232 = vmatpush3.msra.mxu0 %v5835_v56  ;;  %v5871_v56 = vld [vmem:[%s10264_s3 + $0x1c0] sm:$0xff] }
 0x7ff   : > { %7234 = vmatmul.mubr.f32.vlgmr.msra.gmra.mxu0 %v8368_v58  ;;  %7296 = vmatprep.subr.mxu0 %v5894_v57 }
 0x800   : > { %7297 = vmatpush3.msra.mxu0 %v5894_v57  ;;  %7328 = vmatprep.mubr.f32.mxu0 %v8363_v55  ;;  %v5870_v57 = vld [vmem:[%s10264_s3 + $0x1b8] sm:$0xff] }
 0x801   : > { %7298 = vmatprep.subr.mxu0 %v5893_v59 }
 0x802   : > { %7299 = vmatpush3.msra.mxu0 %v5893_v59  ;;  %v5869_v59 = vld [vmem:[%s10264_s3 + $0x1b0] sm:$0xff] }
 0x803   : > { %7300 = vmatprep.subr.mxu0 %v5892_v60 }
 0x804   : > { %7301 = vmatpush3.msra.mxu0 %v5892_v60  ;;  %v5868_v60 = vld [vmem:[%s10264_s3 + $0x1a8] sm:$0xff] }
 0x805   : > { %7302 = vmatprep.subr.mxu0 %v5891_v61 }
 0x806   : > { %7303 = vmatpush3.msra.mxu0 %v5891_v61  ;;  %v5867_v61 = vld [vmem:[%s10264_s3 + $0x1a0] sm:$0xff] }
 0x807   : > { %7304 = vmatprep.subr.mxu0 %v5890_v62 }
 0x808   : > { %7305 = vmatpush3.msra.mxu0 %v5890_v62  ;;  %v5866_v62 = vld [vmem:[%s10264_s3 + $0x198] sm:$0xff] }
 0x809   : > { %7306 = vmatprep.subr.mxu0 %v5889_v63 }
 0x80a   : > { %7307 = vmatpush3.msra.mxu0 %v5889_v63  ;;  %v5865_v63 = vld [vmem:[%s10264_s3 + $0x190] sm:$0xff] }
 0x80b   : > { %7308 = vmatprep.subr.mxu0 %v5888_v0 }
 0x80c   : > { %7309 = vmatpush3.msra.mxu0 %v5888_v0  ;;  %v5864_v0 = vld [vmem:[%s10264_s3 + $0x188] sm:$0xff] }
 0x80d   : > { %7310 = vmatprep.subr.mxu0 %v5887_v1 }
 0x80e   : > { %7311 = vmatpush3.msra.mxu0 %v5887_v1  ;;  %v5863_v1 = vld [vmem:[%s10264_s3 + $0x180] sm:$0xff] }
 0x80f   : > { %7312 = vmatprep.subr.mxu0 %v5886_v2 }
 0x810   : > { %7313 = vmatpush3.msra.mxu0 %v5886_v2  ;;  %v5910_v2 = vld [vmem:[%s10266_s5 + $0x1f8] sm:$0xff] }
 0x811   : > { %7314 = vmatprep.subr.mxu0 %v5885_v3 }
 0x812   : > { %7315 = vmatpush3.msra.mxu0 %v5885_v3  ;;  %v5909_v3 = vld [vmem:[%s10266_s5 + $0x1f0] sm:$0xff] }
 0x813   : > { %7316 = vmatprep.subr.mxu0 %v5884_v4 }
 0x814   : > { %7317 = vmatpush3.msra.mxu0 %v5884_v4  ;;  %v5908_v4 = vld [vmem:[%s10266_s5 + $0x1e8] sm:$0xff] }
 0x815   : > { %7318 = vmatprep.subr.mxu0 %v5883_v5 }
 0x816   : > { %7319 = vmatpush3.msra.mxu0 %v5883_v5  ;;  %v5907_v5 = vld [vmem:[%s10266_s5 + $0x1e0] sm:$0xff] }
 0x817   : > { %7320 = vmatprep.subr.mxu0 %v5882_v6 }
 0x818   : > { %7321 = vmatpush3.msra.mxu0 %v5882_v6  ;;  %v5906_v6 = vld [vmem:[%s10266_s5 + $0x1d8] sm:$0xff] }
 0x819   : > { %7322 = vmatprep.subr.mxu0 %v5881_v7 }
 0x81a   : > { %7323 = vmatpush3.msra.mxu0 %v5881_v7  ;;  %v5904_v7 = vld [vmem:[%s10266_s5 + $0x1c8] sm:$0xff] }
 0x81b   : > { %7324 = vmatprep.subr.mxu0 %v5880_v8 }
 0x81c   : > { %7325 = vmatpush3.msra.mxu0 %v5880_v8  ;;  %v5903_v8 = vld [vmem:[%s10266_s5 + $0x1c0] sm:$0xff] }
 0x81d   : > { %7326 = vmatprep.subr.mxu0 %v5879_v9 }
 0x81e   : > { %7327 = vmatpush3.msra.mxu0 %v5879_v9  ;;  %v5902_v9 = vld [vmem:[%s10266_s5 + $0x1b8] sm:$0xff] }
 0x81f   : > { %7329 = vmatmul.mubr.f32.vlgmr.msra.gmra.mxu0 %v8368_v58 }
 0x87f   : > { %v8829_v10 = vpop.f32.mrf.mxu0 }
 0x881   : > { %v8831_v11 = vpop.f32.mrf.mxu0 }
 0x89f   : > { %v7165_v12 = vpop.f32.mrf.mxu0 }
 0x8a1   : > { %v1698_v13 = vpop.f32.mrf.mxu0 }
 0x8a2   : > { %7240 = vmatprep.mubr.msk.f32.mxu1 %vm782_vm0, %v1698_v13  ;;  %v5900_v13 = vld [vmem:[%s10266_s5 + $0x1a8] sm:$0xff] }
 0x8a3   : > { %7241 = vmatmul.mubr.msk.f32.vlgmr.msra.gmra.mxu1 %vm782_vm0, %v7165_v12  ;;  %v5901_v12 = vld [vmem:[%s10266_s5 + $0x1b0] sm:$0xff] }
 0x8bf   : > { %v7235_v14 = vpop.f32.mrf.mxu0 }
 0x8c0   : > { %7243 = vmatprep.subr.mxu1 %v7235_v14 }
 0x8c1   : > { %v1882_v15 = vpop.f32.mrf.mxu0  ;;  %7244 = vmatpush3.msra.mxu1 %v7235_v14  ;;  %v5899_v14 = vld [vmem:[%s10266_s5 + $0x1a0] sm:$0xff] }
 0x8c2   : > { %7245 = vmatprep.subr.mxu1 %v1882_v15 }
 0x8c3   : > { %7246 = vmatpush3.msra.mxu1 %v1882_v15  ;;  %v5898_v15 = vld [vmem:[%s10266_s5 + $0x198] sm:$0xff] }
 0x8c4   : > { %7250 = vmatprep.subr.mxu1 %v5860_v34 }
 0x8df   : > { %v7330_v16 = vpop.f32.mrf.mxu0 }
 0x8e0   : > { %7366 = vmatprep.subr.msk.mxu0 %vm782_vm0, %v7330_v16 }
 0x8e1   : > { %v2346_v17 = vpop.f32.mrf.mxu0  ;;  %7367 = vmatpush3.xpose.msk.msra.mxu0 %vm782_vm0, %v7330_v16  ;;  %v5897_v16 = vld [vmem:[%s10266_s5 + $0x190] sm:$0xff] }
 0x8e2   : > { %7368 = vmatprep.subr.msk.mxu0 %vm782_vm0, %v2346_v17 }
 0x8e5   : > { %7369 = vmatpush3.xpose.msk.msra.mxu0 %vm782_vm0, %v2346_v17  ;;  %v5896_v17 = vld [vmem:[%s10266_s5 + $0x188] sm:$0xff] }
 0x963   : > { %v7242_v18 = vpop.f32.mrf.mxu1 }
 0x964   : > { %v1979_v19 = vmul.f32 0.17677669, %v7242_v18  ;;  %v5895_v18 = vld [vmem:[%s10266_s5 + $0x180] sm:$0xff] }
 0x965   : > { %v1969_v20 = vpop.f32.mrf.mxu1 }
 0x966   : > { %v1978_v21 = vmul.f32 0.17677669, %v1969_v20  ;;  %v1983_v22 = vsel %vm872_vm1, %v1979_v19, -inf }
 0x967   : > { %1984 = vmax.xlane.f32.xlu1 %v1983_v22 }
 0x968   : > { %v1980_v23 = vsel %vm872_vm1, %v1978_v21, -inf }
 0x969   : > { %1981 = vmax.xlane.f32.xlu0 %v1980_v23 }
 0x9f0   : > { %v1985_v24 = vpop.xlane.xlu1 %1984 }
 0x9f1   : > { %v1987_v25 = vsub.f32 %v1979_v19, %v1985_v24  ;;  %v1612_v19 = vadd.f32 %v8651_v52, %v8829_v10 }
 0x9f2   : > { %v1982_v26 = vpop.xlane.xlu0 %1981 }
 0x9f3   : > { %v1990_v27 = vmul.f32 1.442695, %v1987_v25  ;;  %v1986_v28 = vsub.f32 %v1978_v21, %v1982_v26  ;;  %v1607_v21 = vadd.f32 %v8653_v53, %v8831_v11 }
 0x9f5   : > { %7973 = vpow2.f32 %v1990_v27  ;;  %v1988_v29 = vmul.f32 1.442695, %v1986_v28 }
 0x9f7   : > { %7975 = vpow2.f32 %v1988_v29 }
 0xa02   : > { %v7974_v30 = vpop.eup %7973 }
 0xa03   : > { %v1995_v31 = vsel %vm872_vm1, %v7974_v30, 0.0 }
 0xa04   : > { %v7976_v32 = vpop.eup %7975  ;;  %1996 = vadd.xlane.f32.xlu1 %v1995_v31 }
 0xa05   : > { %v1992_v33 = vsel %vm872_vm1, %v7976_v32, 0.0 }
 0xa06   : > { %1993 = vadd.xlane.f32.xlu0 %v1992_v33 }
 0xa8d   : > { %v1997_v35 = vpop.xlane.xlu1 %1996 }
 0xa8e   : > { %7977 = vrcp.f32 %v1997_v35 }
 0xa8f   : > { %v1994_v36 = vpop.xlane.xlu0 %1993 }
 0xa90   : > { %7979 = vrcp.f32 %v1994_v36 }
 0xa9b   : > { %v7978_v37 = vpop.eup %7977 }
 0xa9c   : > { %v2001_v40 = vmul.f32 %v7978_v37, %v7974_v30 }
 0xa9d   : > { %v7980_v38 = vpop.eup %7979 }
 0xa9e   : > { %v2000_v39 = vmul.f32 %v7980_v38, %v7976_v32 }
 0xaa0   : > { %7247 = vmatprep.mubr.msk.f32.mxu1 %vm872_vm1, %v2000_v39 }
 0xaa1   : > { %7248 = vmatmul.mubr.msk.f32.vlgmr.msra.gmra.mxu1 %vm872_vm1, %v2001_v40  ;;  %v5920_v40 = vld [vmem:[%s10267_s6 + $0x78] sm:$0xff] }
 0xaa2   : > { %7251 = vmatpush3.msra.mxu1 %v5860_v34 }
 0xaa3   : > { %7252 = vmatprep.subr.mxu1 %v5859_v41 }
 0xaa4   : > { %7253 = vmatpush3.msra.mxu1 %v5859_v41 }
 0xaa5   : > { %7254 = vmatprep.subr.mxu1 %v5858_v42 }
 0xaa6   : > { %7255 = vmatpush3.msra.mxu1 %v5858_v42 }
 0xaa7   : > { %7256 = vmatprep.subr.mxu1 %v5857_v43 }
 0xaa8   : > { %7257 = vmatpush3.msra.mxu1 %v5857_v43 }
 0xaa9   : > { %7261 = vmatprep.subr.mxu1 %v5878_v44 }
 0xb61   : > { %v7249_v45 = vpop.f32.mrf.mxu1 }
 0xb63   : > { %v2074_v46 = vpop.f32.mrf.mxu1 }
 0xb64   : > { %7258 = vmatprep.mubr.msk.f32.mxu1 %vm782_vm0, %v2074_v46 }
 0xb65   : > { %7259 = vmatmul.mubr.msk.f32.vlgmr.msra.gmra.mxu1 %vm782_vm0, %v7249_v45 }
 0xb66   : > { %7262 = vmatpush3.msra.mxu1 %v5878_v44  ;;  %7293 = vmatprep.mubr.f32.mxu1 %v8363_v55 }
 0xb67   : > { %7263 = vmatprep.subr.mxu1 %v5877_v47 }
 0xb68   : > { %7264 = vmatpush3.msra.mxu1 %v5877_v47  ;;  %v5919_v47 = vld [vmem:[%s10267_s6 + $0x70] sm:$0xff] }
 0xb69   : > { %7265 = vmatprep.subr.mxu1 %v5876_v48 }
 0xb6a   : > { %7266 = vmatpush3.msra.mxu1 %v5876_v48  ;;  %v5918_v48 = vld [vmem:[%s10267_s6 + $0x68] sm:$0xff] }
 0xb6b   : > { %7267 = vmatprep.subr.mxu1 %v5875_v49 }
 0xb6c   : > { %7268 = vmatpush3.msra.mxu1 %v5875_v49  ;;  %v5917_v49 = vld [vmem:[%s10267_s6 + $0x60] sm:$0xff] }
 0xb6d   : > { %7269 = vmatprep.subr.mxu1 %v5874_v50 }
 0xb6e   : > { %7270 = vmatpush3.msra.mxu1 %v5874_v50 }
 0xb6f   : > { %7271 = vmatprep.subr.mxu1 %v5873_v51 }
 0xb70   : > { %7272 = vmatpush3.msra.mxu1 %v5873_v51 }
 0xb71   : > { %7273 = vmatprep.subr.mxu1 %v5872_v54 }
 0xb72   : > { %7274 = vmatpush3.msra.mxu1 %v5872_v54 }
 0xb73   : > { %7275 = vmatprep.subr.mxu1 %v5871_v56 }
 0xb74   : > { %7276 = vmatpush3.msra.mxu1 %v5871_v56 }
 0xb75   : > { %7277 = vmatprep.subr.mxu1 %v5870_v57 }
 0xb76   : > { %7278 = vmatpush3.msra.mxu1 %v5870_v57 }
 0xb77   : > { %7279 = vmatprep.subr.mxu1 %v5869_v59 }
 0xb78   : > { %7280 = vmatpush3.msra.mxu1 %v5869_v59  ;;  %v5923_v59 = vld [vmem:[%s10268_s7] ss:$0 sm:$0xff] }
 0xb79   : > { %7281 = vmatprep.subr.mxu1 %v5868_v60 }
 0xb7a   : > { %7282 = vmatpush3.msra.mxu1 %v5868_v60  ;;  %v8049_v60 = vld [vmem:[%s8245_s18 + $0x8] sm:$0xff] }
 0xb7b   : > { %7283 = vmatprep.subr.mxu1 %v5867_v61 }
 0xb7c   : > { %7284 = vmatpush3.msra.mxu1 %v5867_v61 }
 0xb7d   : > { %7285 = vmatprep.subr.mxu1 %v5866_v62 }
 0xb7e   : > { %7286 = vmatpush3.msra.mxu1 %v5866_v62 }
 0xb7f   : > { %7287 = vmatprep.subr.mxu1 %v5865_v63 }
 0xb80   : > { %7288 = vmatpush3.msra.mxu1 %v5865_v63  ;;  %v8050_v63 = vld [vmem:[%s8245_s18] sm:$0xff] }
 0xb81   : > { %7289 = vmatprep.subr.mxu1 %v5864_v0 }
 0xb82   : > { %7290 = vmatpush3.msra.mxu1 %v5864_v0 }
 0xb83   : > { %7291 = vmatprep.subr.mxu1 %v5863_v1 }
 0xb84   : > { %7292 = vmatpush3.msra.mxu1 %v5863_v1 }
 0xb85   : > { %7294 = vmatmul.mubr.f32.vlgmr.msra.gmra.mxu1 %v8368_v58  ;;  %7331 = vmatprep.subr.mxu1 %v5910_v2 }
 0xb86   : > { %7332 = vmatpush3.msra.mxu1 %v5910_v2  ;;  %7363 = vmatprep.mubr.f32.mxu1 %v8363_v55  ;;  %v5905_v55 = vld [vmem:[%s10266_s5 + $0x1d0] sm:$0xff] }
 0xb87   : > { %7333 = vmatprep.subr.mxu1 %v5909_v3 }
 0xb88   : > { %7334 = vmatpush3.msra.mxu1 %v5909_v3  ;;  %v2809_v3 = vld [vmem:[%s10271_s10 + $0xf8] sm:$0xff] }
 0xb89   : > { %7335 = vmatprep.subr.mxu1 %v5908_v4 }
 0xb8a   : > { %7336 = vmatpush3.msra.mxu1 %v5908_v4  ;;  %v2808_v4 = vld [vmem:[%s10271_s10 + $0xf0] sm:$0xff] }
 0xb8b   : > { %7337 = vmatprep.subr.mxu1 %v5907_v5 }
 0xb8c   : > { %7338 = vmatpush3.msra.mxu1 %v5907_v5  ;;  %v2807_v5 = vld [vmem:[%s10271_s10 + $0xe8] sm:$0xff] }
 0xb8d   : > { %7339 = vmatprep.subr.mxu1 %v5906_v6 }
 0xb8e   : > { %7340 = vmatpush3.msra.mxu1 %v5906_v6  ;;  %v2806_v6 = vld [vmem:[%s10271_s10 + $0xe0] sm:$0xff] }
 0xb8f   : > { %7341 = vmatprep.subr.mxu1 %v5905_v55 }
 0xb90   : > { %7342 = vmatpush3.msra.mxu1 %v5905_v55  ;;  %v2805_v55 = vld [vmem:[%s10271_s10 + $0xd8] sm:$0xff] }
 0xb91   : > { %7343 = vmatprep.subr.mxu1 %v5904_v7 }
 0xb92   : > { %7344 = vmatpush3.msra.mxu1 %v5904_v7  ;;  %v2804_v7 = vld [vmem:[%s10271_s10 + $0xd0] sm:$0xff] }
 0xb93   : > { %7345 = vmatprep.subr.mxu1 %v5903_v8 }
 0xb94   : > { %7346 = vmatpush3.msra.mxu1 %v5903_v8 }
 0xb95   : > { %7347 = vmatprep.subr.mxu1 %v5902_v9 }
 0xb96   : > { %7348 = vmatpush3.msra.mxu1 %v5902_v9 }
 0xb97   : > { %7349 = vmatprep.subr.mxu1 %v5901_v12 }
 0xb98   : > { %7350 = vmatpush3.msra.mxu1 %v5901_v12 }
 0xb99   : > { %7351 = vmatprep.subr.mxu1 %v5900_v13 }
 0xb9a   : > { %7352 = vmatpush3.msra.mxu1 %v5900_v13 }
 0xb9b   : > { %7353 = vmatprep.subr.mxu1 %v5899_v14 }
 0xb9c   : > { %7354 = vmatpush3.msra.mxu1 %v5899_v14 }
 0xb9d   : > { %7355 = vmatprep.subr.mxu1 %v5898_v15 }
 0xb9e   : > { %7356 = vmatpush3.msra.mxu1 %v5898_v15 }
 0xb9f   : > { %7357 = vmatprep.subr.mxu1 %v5897_v16 }
 0xba0   : > { %7358 = vmatpush3.msra.mxu1 %v5897_v16 }
 0xba1   : > { %7359 = vmatprep.subr.mxu1 %v5896_v17 }
 0xba2   : > { %7360 = vmatpush3.msra.mxu1 %v5896_v17 }
 0xba3   : > { %7361 = vmatprep.subr.mxu1 %v5895_v18 }
 0xba4   : > { %7362 = vmatpush3.msra.mxu1 %v5895_v18  ;;  %v2803_v18 = vld [vmem:[%s10271_s10 + $0xc8] sm:$0xff] }
 0xba5   : > { %7364 = vmatmul.mubr.f32.vlgmr.msra.gmra.mxu1 %v8368_v58 }
 0xc25   : > { %v7260_v20 = vpop.f32.mrf.mxu1 }
 0xc26   : > { %v2170_v22 = vadd.f32 %v7260_v20, %v1612_v19  ;;  %v2802_v19 = vld [vmem:[%s10271_s10 + $0xc0] sm:$0xff]  ;;  %v2801_v20 = vld [vmem:[%s10271_s10 + $0xb8] sm:$0xff] }
 0xc27   : > { %v2160_v23 = vpop.f32.mrf.mxu1 }
 0xc28   : > { %v8963_v24 = vadd.f32 %v2160_v23, %v1607_v21  ;;  %v2800_v21 = vld [vmem:[%s10271_s10 + $0xb0] sm:$0xff]  ;;  %v2798_v23 = vld [vmem:[%s10271_s10 + $0xa0] sm:$0xff] }
 0xc45   : > { %v7295_v25 = vpop.f32.mrf.mxu1 }
 0xc47   : > { %v2254_v26 = vpop.f32.mrf.mxu1 }
 0xc48   : > { %7370 = vmatprep.mubr.msk.f32.mxu0 %vm782_vm0, %v2254_v26  ;;  %v2795_v26 = vld [vmem:[%s10271_s10 + $0x88] sm:$0xff] }
 0xc49   : > { %7371 = vmatmul.mubr.msk.f32.vlgmr.msra.gmra.mxu0 %vm782_vm0, %v7295_v25  ;;  %v2796_v25 = vld [vmem:[%s10271_s10 + $0x90] sm:$0xff] }
 0xc65   : > { %v7365_v27 = vpop.f32.mrf.mxu1 }
 0xc66   : > { %7373 = vmatprep.subr.mxu0 %v7365_v27 }
 0xc67   : > { %v2438_v58 = vpop.f32.mrf.mxu1  ;;  %7374 = vmatpush3.msra.mxu0 %v7365_v27  ;;  %v2794_v27 = vld [vmem:[%s10271_s10 + $0x80] sm:$0xff] }
 0xc68   : > { %7375 = vmatprep.subr.mxu0 %v2438_v58 }
 0xc69   : > { %7376 = vmatpush3.msra.mxu0 %v2438_v58  ;;  %v2793_v58 = vld [vmem:[%s10271_s10 + $0x78] sm:$0xff] }
 0xc6a   : > { %7380 = vmatprep.subr.mxu0 %v5920_v40 }
 0xd09   : > { %v7372_v52 = vpop.f32.mrf.mxu0 }
 0xd0a   : > { %v2535_v10 = vmul.f32 0.17677669, %v7372_v52  ;;  %v8113_v52 = vmov 0.0  }
 0xd0b   : > { %v2525_v28 = vpop.f32.mrf.mxu0 }
 0xd0c   : > { %v2534_v53 = vmul.f32 0.17677669, %v2525_v28  ;;  %v2539_v11 = vsel %vm872_vm1, %v2535_v10, -inf  ;;  %v2791_v28 = vld [vmem:[%s10271_s10 + $0x68] sm:$0xff] }
 0xd0d   : > { %2540 = vmax.xlane.f32.xlu1 %v2539_v11  ;;  %v2789_v11 = vld [vmem:[%s10271_s10 + $0x58] sm:$0xff] }
 0xd0e   : > { %v2536_v29 = vsel %vm872_vm1, %v2534_v53, -inf }
 0xd0f   : > { %2537 = vmax.xlane.f32.xlu0 %v2536_v29  ;;  %v2788_v29 = vld [vmem:[%s10271_s10 + $0x50] sm:$0xff] }
 0xd96   : > { %v2541_v30 = vpop.xlane.xlu1 %2540 }
 0xd97   : > { %v2543_v31 = vsub.f32 %v2535_v10, %v2541_v30  ;;  %v2792_v10 = vld [vmem:[%s10271_s10 + $0x70] sm:$0xff]  ;;  %v2787_v30 = vld [vmem:[%s10271_s10 + $0x48] sm:$0xff] }
 0xd98   : > { %v2538_v32 = vpop.xlane.xlu0 %2537 }
 0xd99   : > { %v2546_v33 = vmul.f32 1.442695, %v2543_v31  ;;  %v2542_v34 = vsub.f32 %v2534_v53, %v2538_v32  ;;  %v2790_v53 = vld [vmem:[%s10271_s10 + $0x60] sm:$0xff]  ;;  %v2785_v32 = vld [vmem:[%s10271_s10 + $0x38] sm:$0xff] }
 0xd9a   : > { %v2786_v31 = vld [vmem:[%s10271_s10 + $0x40] sm:$0xff] }
 0xd9b   : > { %7981 = vpow2.f32 %v2546_v33  ;;  %v2544_v35 = vmul.f32 1.442695, %v2542_v34  ;;  %v2784_v33 = vld [vmem:[%s10271_s10 + $0x30] sm:$0xff]  ;;  %v2783_v34 = vld [vmem:[%s10271_s10 + $0x28] sm:$0xff] }
 0xd9d   : > { %7983 = vpow2.f32 %v2544_v35  ;;  %v2782_v35 = vld [vmem:[%s10271_s10 + $0x20] sm:$0xff] }
 0xda8   : > { %v7982_v36 = vpop.eup %7981 }
 0xda9   : > { %v2551_v37 = vsel %vm872_vm1, %v7982_v36, 0.0 }
 0xdaa   : > { %v7984_v38 = vpop.eup %7983  ;;  %2552 = vadd.xlane.f32.xlu1 %v2551_v37  ;;  %v2780_v37 = vld [vmem:[%s10271_s10 + $0x10] sm:$0xff] }
 0xdab   : > { %v2548_v39 = vsel %vm872_vm1, %v7984_v38, 0.0 }
 0xdac   : > { %2549 = vadd.xlane.f32.xlu0 %v2548_v39  ;;  %v2778_v39 = vld [vmem:[%s10271_s10] sm:$0xff] }
 0xe33   : > { %v2553_v41 = vpop.xlane.xlu1 %2552 }
 0xe34   : > { %7985 = vrcp.f32 %v2553_v41 }
 0xe35   : > { %v2550_v42 = vpop.xlane.xlu0 %2549 }
 0xe36   : > { %7987 = vrcp.f32 %v2550_v42 }
 0xe41   : > { %v7986_v43 = vpop.eup %7985 }
 0xe42   : > { %v2557_v46 = vmul.f32 %v7986_v43, %v7982_v36  ;;  %v2781_v36 = vld [vmem:[%s10271_s10 + $0x18] sm:$0xff] }
 0xe43   : > { %v7988_v44 = vpop.eup %7987 }
 0xe44   : > { %v2556_v45 = vmul.f32 %v7988_v44, %v7984_v38  ;;  %v2779_v38 = vld [vmem:[%s10271_s10 + $0x8] sm:$0xff] }
 0xe46   : > { %7377 = vmatprep.mubr.msk.f32.mxu0 %vm872_vm1, %v2556_v45 }
 0xe47   : > { %7378 = vmatmul.mubr.msk.f32.vlgmr.msra.gmra.mxu0 %vm872_vm1, %v2557_v46 }
 0xe48   : > { %7381 = vmatpush3.msra.mxu0 %v5920_v40 }
 0xe49   : > { %7382 = vmatprep.subr.mxu0 %v5919_v47 }
 0xe4a   : > { %7383 = vmatpush3.msra.mxu0 %v5919_v47 }
 0xe4b   : > { %7384 = vmatprep.subr.mxu0 %v5918_v48 }
 0xe4c   : > { %7385 = vmatpush3.msra.mxu0 %v5918_v48 }
 0xe4d   : > { %7386 = vmatprep.subr.mxu0 %v5917_v49 }
 0xe4e   : > { %7387 = vmatpush3.msra.mxu0 %v5917_v49 }
 0xe4f   : > { %2822 = vmatprep.subr.mxu0 %v2809_v3  ;;  %v2948_v3 = vld [vmem:[%s10273_s12 + $0x68] sm:$0xff] }
 0xf07   : > { %v7379_v50 = vpop.f32.mrf.mxu0 }
 0xf09   : > { %v2630_v51 = vpop.f32.mrf.mxu0 }
 0xf0a   : > { %7388 = vmatprep.mubr.msk.f32.mxu0 %vm782_vm0, %v2630_v51 }
 0xf0b   : > { %7389 = vmatmul.mubr.msk.f32.vlgmr.msra.gmra.mxu0 %vm782_vm0, %v7379_v50  ;;  %v5924_v50 = vld [vmem:[%s10269_s8] ss:$0 sm:$0xff] }
 0xf0c   : > { %2823 = vmatpush1.msra.mxu0 %v2808_v4  ;;  %2886 = vmatprep.mubr.f32.mxu0 %v8113_v52  ;;  %v2963_v4 = vld [vmem:[%s10273_s12 + $0xe0] sm:$0xff] }
 0xf0d   : > { %2824 = vmatprep.subr.mxu0 %v2807_v5  ;;  %v2947_v5 = vld [vmem:[%s10273_s12 + $0x60] sm:$0xff] }
 0xf0e   : > { %2825 = vmatpush1.msra.mxu0 %v2806_v6  ;;  %v2962_v6 = vld [vmem:[%s10273_s12 + $0xd8] sm:$0xff] }
 0xf0f   : > { %2826 = vmatprep.subr.mxu0 %v2805_v55  ;;  %v2946_v55 = vld [vmem:[%s10273_s12 + $0x58] sm:$0xff] }
 0xf10   : > { %2827 = vmatpush1.msra.mxu0 %v2804_v7  ;;  %v2961_v7 = vld [vmem:[%s10273_s12 + $0xd0] sm:$0xff] }
 0xf11   : > { %2828 = vmatprep.subr.mxu0 %v2803_v18  ;;  %v2941_v18 = vld [vmem:[%s10273_s12 + $0x30] sm:$0xff] }
 0xf12   : > { %2829 = vmatpush1.msra.mxu0 %v2802_v19  ;;  %v2956_v19 = vld [vmem:[%s10273_s12 + $0xa8] sm:$0xff] }
 0xf13   : > { %2830 = vmatprep.subr.mxu0 %v2801_v20  ;;  %v2940_v20 = vld [vmem:[%s10273_s12 + $0x28] sm:$0xff] }
 0xf14   : > { %2831 = vmatpush1.msra.mxu0 %v2800_v21  ;;  %v2955_v21 = vld [vmem:[%s10273_s12 + $0xa0] sm:$0xff] }
 0xfcb   : > { %v7390_v54 = vpop.f32.mrf.mxu0 }
 0xfcc   : > { %v2726_v56 = vadd.f32 %v7390_v54, %v2170_v22  ;;  %v2799_v22 = vld [vmem:[%s10271_s10 + $0xa8] sm:$0xff]  ;;  %v5925_v54 = vld [vmem:[%s10270_s9] ss:$0 sm:$0xff] }
 0xfcd   : > { %v2716_v57 = vpop.f32.mrf.mxu0  ;;  %2832 = vmatprep.subr.mxu0 %v2799_v22  ;;  %v2939_v22 = vld [vmem:[%s10273_s12 + $0x20] sm:$0xff] }
 0xfce   : > { %v2728_v61 = vadd.f32 %v8049_v60, %v2726_v56  ;;  %v2725_v62 = vadd.f32 %v2716_v57, %v8963_v24  ;;  %2833 = vmatpush1.msra.mxu0 %v2798_v23  ;;  %v2797_v24 = vld [vmem:[%s10271_s10 + $0x98] sm:$0xff] }
 0xfcf   : > { %2834 = vmatprep.subr.mxu0 %v2797_v24  ;;  %v2966_v60 = vld [vmem:[%s10273_s12 + $0xf8] sm:$0xff] }
 0xfd0   : > { %v2727_v0 = vadd.f32 %v8050_v63, %v2725_v62  ;;  %v8993_v1 = vadd.f32 %v5923_v59, %v2728_v61  ;;  %2835 = vmatpush1.msra.mxu0 %v2796_v25  ;;  %6523 = vmatprep.subr.mxu1 %v2966_v60  ;;  %v2950_v61 = vld [vmem:[%s10273_s12 + $0x78] sm:$0xff]  ;;  %v2965_v62 = vld [vmem:[%s10273_s12 + $0xf0] sm:$0xff] }
 0xfd1   : > { %2836 = vmatprep.subr.mxu0 %v2795_v26  ;;  %6524 = vmatpush3.msra.mxu1 %v2950_v61  ;;  %v2949_v63 = vld [vmem:[%s10273_s12 + $0x70] sm:$0xff]  ;;  %v2954_v23 = vld [vmem:[%s10273_s12 + $0x98] sm:$0xff] }
 0xfd2   : > { %2742 = vadd.xlane.f32.xlu1 %v8993_v1  ;;  %v8996_v2 = vadd.f32 %v5923_v59, %v2727_v0  ;;  %2837 = vmatpush1.msra.mxu0 %v2794_v27  ;;  %v2964_v0 = vld [vmem:[%s10273_s12 + $0xe8] sm:$0xff]  ;;  %v2938_v24 = vld [vmem:[%s10273_s12 + $0x18] sm:$0xff]  ;;  %v2953_v25 = vld [vmem:[%s10273_s12 + $0x90] sm:$0xff] }
 0xfd3   : > { %2838 = vmatprep.subr.mxu0 %v2793_v58  ;;  %6525 = vmatprep.subr.mxu1 %v2965_v62  ;;  %v2937_v26 = vld [vmem:[%s10273_s12 + $0x10] sm:$0xff]  ;;  %v2952_v27 = vld [vmem:[%s10273_s12 + $0x88] sm:$0xff] }
 0xfd4   : > { %2740 = vadd.xlane.f32.xlu0 %v8996_v2  ;;  %2839 = vmatpush1.msra.mxu0 %v2792_v10  ;;  %v2936_v58 = vld [vmem:[%s10273_s12 + $0x8] sm:$0xff]  ;;  %v2951_v10 = vld [vmem:[%s10273_s12 + $0x80] sm:$0xff] }
 0xfd5   : > { %2840 = vmatprep.subr.mxu0 %v2791_v28  ;;  %6526 = vmatpush3.msra.mxu1 %v2949_v63  ;;  %v2935_v28 = vld [vmem:[%s10273_s12] sm:$0xff] }
 0xfd6   : > { %2841 = vmatpush1.msra.mxu0 %v2790_v53  ;;  %6527 = vmatprep.subr.mxu1 %v2964_v0  ;;  %v2812_v53 = vlaneseq }
 0xfd7   : > { %2842 = vmatprep.subr.mxu0 %v2789_v11  ;;  %6528 = vmatpush3.msra.mxu1 %v2948_v3 }
 0xfd8   : > { %2843 = vmatpush1.msra.mxu0 %v2788_v29  ;;  %6529 = vmatprep.subr.mxu1 %v2963_v4  ;;  %v9211_v11 = vshrl.u32 %v2812_v53, 7 }
 0xfd9   : > { %2844 = vmatprep.subr.mxu0 %v2787_v30  ;;  %6530 = vmatpush3.msra.mxu1 %v2947_v5  ;;  %v2810_v30 = vld [vmem:[%s10272_s11] sm:$0x3] }
 0xfda   : > { %2845 = vmatpush1.msra.mxu0 %v2786_v31  ;;  %6531 = vmatprep.subr.mxu1 %v2962_v6  ;;  %v2814_v29 = vsub.s32 0, %v9211_v11  ;;  %v2818_v31 = vsub.s32 1, %v9211_v11 }
 0xfdb   : > { %2846 = vmatprep.subr.mxu0 %v2785_v32  ;;  %6532 = vmatpush3.msra.mxu1 %v2946_v55 }
 0xfdc   : > { %2847 = vmatpush1.msra.mxu0 %v2784_v33  ;;  %6533 = vmatprep.subr.mxu1 %v2961_v7  ;;  %v2815_v32 = vrot.slane %v2810_v30, %v2814_v29  ;;  %v2819_v33 = vrot.slane %v2810_v30, %v2818_v31  ;;  %v5946_v30 = vld [vmem:[%s10264_s3 + $0x278] sm:$0xff] }
 0xfdd   : > { %2848 = vmatprep.subr.mxu0 %v2783_v34 }
 0xfde   : > { %2849 = vmatpush1.msra.mxu0 %v2782_v35 }
 0xfdf   : > { %2850 = vmatprep.subr.mxu0 %v2781_v36 }
 0xfe0   : > { %2851 = vmatpush1.msra.mxu0 %v2780_v37 }
 0xfe1   : > { %2852 = vmatprep.subr.mxu0 %v2779_v38 }
 0xfe2   : > { %2853 = vmatpush1.msra.mxu0 %v2778_v39 }
 0xfe3   : > { %7391 = vmatprep.subr.mxu0 %v5946_v30 }
0x105b   : > { %v2743_v8 = vpop.xlane.xlu1 %2742 }
0x105c   : > { %v2745_v9 = vmul.f32 0.0078125, %v2743_v8  ;;  %v2945_v8 = vld [vmem:[%s10273_s12 + $0x50] sm:$0xff] }
0x105d   : > { %v2741_v12 = vpop.xlane.xlu0 %2740  ;;  %6534 = vmatpush3.msra.mxu1 %v2945_v8 }
0x105e   : > { %v9018_v13 = vsub.f32 %v8993_v1, %v2745_v9  ;;  %v2744_v14 = vmul.f32 0.0078125, %v2741_v12  ;;  %v2960_v9 = vld [vmem:[%s10273_s12 + $0xc8] sm:$0xff] }
0x105f   : > { %v2944_v12 = vld [vmem:[%s10273_s12 + $0x48] sm:$0xff]  ;;  %6535 = vmatprep.subr.mxu1 %v2960_v9 }
0x1060   : > { %v9021_v15 = vsub.f32 %v8996_v2, %v2744_v14  ;;  %v2749_v16 = vmul.f32 %v9018_v13, %v9018_v13  ;;  %v2943_v14 = vld [vmem:[%s10273_s12 + $0x40] sm:$0xff]  ;;  %6536 = vmatpush3.msra.mxu1 %v2944_v12 }
0x1062   : > { %2752 = vadd.xlane.f32.xlu1 %v2749_v16  ;;  %v2748_v17 = vmul.f32 %v9021_v15, %v9021_v15  ;;  %v2942_v16 = vld [vmem:[%s10273_s12 + $0x38] sm:$0xff] }
0x1064   : > { %2750 = vadd.xlane.f32.xlu0 %v2748_v17  ;;  %v2957_v17 = vld [vmem:[%s10273_s12 + $0xb0] sm:$0xff] }
0x10eb   : > { %v2753_v40 = vpop.xlane.xlu1 %2752 }
0x10ec   : > { %v2755_v41 = vmul.f32 0.0078125, %v2753_v40 }
0x10ed   : > { %v2751_v42 = vpop.xlane.xlu0 %2750 }
0x10ee   : > { %v2757_v43 = vadd.f32 1e-05, %v2755_v41  ;;  %v2754_v44 = vmul.f32 0.0078125, %v2751_v42 }
0x10f0   : > { %7989 = vrsqrt.f32 %v2757_v43  ;;  %v2756_v45 = vadd.f32 1e-05, %v2754_v44 }
0x10f2   : > { %7991 = vrsqrt.f32 %v2756_v45 }
0x10fd   : > { %v7990_v46 = vpop.eup %7989 }
0x10fe   : > { %v2761_v49 = vmul.f32 %v7990_v46, %v9018_v13  ;;  %v2959_v13 = vld [vmem:[%s10273_s12 + $0xc0] sm:$0xff] }
0x10ff   : > { %v7992_v47 = vpop.eup %7991  ;;  %6537 = vmatprep.subr.mxu1 %v2959_v13 }
0x1100   : > { %v2760_v48 = vmul.f32 %v7992_v47, %v9021_v15  ;;  %v2769_v57 = vmul.f32 %v5924_v50, %v2761_v49  ;;  %v2958_v15 = vld [vmem:[%s10273_s12 + $0xb8] sm:$0xff]  ;;  %6538 = vmatpush3.msra.mxu1 %v2943_v14 }
0x1101   : > { %6539 = vmatprep.subr.mxu1 %v2958_v15 }
0x1102   : > { %v2768_v51 = vmul.f32 %v5924_v50, %v2760_v48  ;;  %v2777_v59 = vadd.f32 %v5925_v54, %v2769_v57  ;;  %6540 = vmatpush3.msra.mxu1 %v2942_v16 }
0x1103   : > { %6541 = vmatprep.subr.mxu1 %v2957_v17 }
0x1104   : > { %v2776_v56 = vadd.f32 %v5925_v54, %v2768_v51  ;;  %6542 = vmatpush3.msra.mxu1 %v2941_v18 }
0x1105   : > { %6543 = vmatprep.subr.mxu1 %v2956_v19 }
0x1106   : > { %2887 = vmatmul.mubr.f32.vlgmr.msra.gmra.mxu0 %v2776_v56  ;;  %6544 = vmatpush3.msra.mxu1 %v2940_v20 }
0x1107   : > { %2892 = vmatprep.mubr.f32.mxu0 %v8113_v52  ;;  %6545 = vmatprep.subr.mxu1 %v2955_v21 }
0x1108   : > { %6546 = vmatpush3.msra.mxu1 %v2939_v22  ;;  %7392 = vmatpush3.msra.mxu0 %v5946_v30  ;;  %v5976_v30 = vld [vmem:[%s10266_s5 + $0x268] sm:$0xff] }
0x1109   : > { %6547 = vmatprep.subr.mxu1 %v2954_v23 }
0x110a   : > { %2893 = vmatmul.mubr.f32.gmra.mxu0 %v2777_v59  ;;  %6548 = vmatpush3.msra.mxu1 %v2938_v24 }
0x110b   : > { %6549 = vmatprep.subr.mxu1 %v2953_v25  ;;  %v5926_v25 = vld [vmem:[%s10274_s13] ss:$0 sm:$0xff] }
0x110c   : > { %6550 = vmatpush3.msra.mxu1 %v2937_v26 }
0x110d   : > { %6551 = vmatprep.subr.mxu1 %v2952_v27 }
0x110e   : > { %6552 = vmatpush3.msra.mxu1 %v2936_v58 }
0x110f   : > { %6553 = vmatprep.subr.mxu1 %v2951_v10 }
0x1110   : > { %6554 = vmatpush3.msra.mxu1 %v2935_v28 }
0x11c6   : > { %v2888_v34 = vpop.f32.mrf.mxu0 }
0x11c7   : > { %v2889_v35 = vadd.f32 %v2888_v34, %v2815_v32 }
0x11c8   : > { %v2890_v36 = vpop.f32.mrf.mxu0 }
0x11c9   : > { %v2903_v37 = vmul.f32 0.044715, %v2889_v35  ;;  %v2891_v38 = vadd.f32 %v2890_v36, %v2819_v33  ;;  %v2899_v9 = vmul.f32 0.5, %v2889_v35 }
0x11ca   : > { %v2894_v39 = vpop.f32.mrf.mxu0 }
0x11cb   : > { %v2907_v40 = vmul.f32 %v2903_v37, %v2889_v35  ;;  %v2904_v41 = vmul.f32 0.044715, %v2891_v38  ;;  %v2895_v42 = vadd.f32 %v2894_v39, %v2815_v32  ;;  %v2900_v55 = vmul.f32 0.5, %v2891_v38  ;;  %v5945_v32 = vld [vmem:[%s10264_s3 + $0x270] sm:$0xff] }
0x11cc   : > { %v2896_v43 = vpop.f32.mrf.mxu0  ;;  %7393 = vmatprep.subr.mxu0 %v5945_v32 }
0x11cd   : > { %v2911_v44 = vmul.f32 %v2907_v40, %v2889_v35  ;;  %v2908_v45 = vmul.f32 %v2904_v41, %v2891_v38  ;;  %v2905_v46 = vmul.f32 0.044715, %v2895_v42  ;;  %v2897_v47 = vadd.f32 %v2896_v43, %v2819_v33  ;;  %v5944_v33 = vld [vmem:[%s10264_s3 + $0x268] sm:$0xff]  ;;  %7394 = vmatpush3.msra.mxu0 %v5945_v32  ;;  %v5943_v43 = vld [vmem:[%s10264_s3 + $0x260] sm:$0xff]  ;;  %v5974_v32 = vld [vmem:[%s10266_s5 + $0x258] sm:$0xff] }
0x11ce   : > { %v2901_v18 = vmul.f32 0.5, %v2895_v42  ;;  %7395 = vmatprep.subr.mxu0 %v5944_v33 }
0x11cf   : > { %v2915_v48 = vadd.f32 %v2911_v44, %v2889_v35  ;;  %v2909_v49 = vmul.f32 %v2905_v46, %v2895_v42  ;;  %v2906_v50 = vmul.f32 0.044715, %v2897_v47  ;;  %v2912_v51 = vmul.f32 %v2908_v45, %v2891_v38  ;;  %7396 = vmatpush3.msra.mxu0 %v5944_v33  ;;  %v5959_v44 = vld [vmem:[%s10265_s4 + $0x260] sm:$0xff]  ;;  %v5942_v45 = vld [vmem:[%s10264_s3 + $0x258] sm:$0xff]  ;;  %v5972_v33 = vld [vmem:[%s10266_s5 + $0x248] sm:$0xff] }
0x11d0   : > { %v2902_v16 = vmul.f32 0.5, %v2897_v47  ;;  %7397 = vmatprep.subr.mxu0 %v5943_v43  ;;  %v5958_v46 = vld [vmem:[%s10265_s4 + $0x258] sm:$0xff] }
0x11d1   : > { %v2910_v54 = vmul.f32 %v2906_v50, %v2897_v47  ;;  %v2916_v56 = vadd.f32 %v2912_v51, %v2891_v38  ;;  %v2919_v57 = vmul.f32 0.7978846, %v2915_v48  ;;  %v2913_v59 = vmul.f32 %v2909_v49, %v2895_v42  ;;  %7398 = vmatpush3.msra.mxu0 %v5943_v43  ;;  %v5957_v48 = vld [vmem:[%s10265_s4 + $0x250] sm:$0xff]  ;;  %v5940_v49 = vld [vmem:[%s10264_s3 + $0x248] sm:$0xff]  ;;  %v5939_v51 = vld [vmem:[%s10264_s3 + $0x240] sm:$0xff] }
0x11d2   : > { %7399 = vmatprep.subr.mxu0 %v5942_v45  ;;  %v5956_v50 = vld [vmem:[%s10265_s4 + $0x248] sm:$0xff]  ;;  %v6020_v43 = vld [vmem:[%s10265_s4 + $0x2f8] sm:$0xff] }
0x11d3   : > { %v2920_v60 = vmul.f32 0.7978846, %v2916_v56  ;;  %7993 = vtanh.f32 %v2919_v57  ;;  %v2914_v61 = vmul.f32 %v2910_v54, %v2897_v47  ;;  %v2917_v62 = vadd.f32 %v2913_v59, %v2895_v42  ;;  %v5960_v42 = vld [vmem:[%s10265_s4 + $0x268] sm:$0xff]  ;;  %7400 = vmatpush3.msra.mxu0 %v5942_v45  ;;  %v5955_v54 = vld [vmem:[%s10265_s4 + $0x240] sm:$0xff]  ;;  %v5938_v56 = vld [vmem:[%s10264_s3 + $0x238] sm:$0xff] }
0x11d4   : > { %v5954_v57 = vld [vmem:[%s10265_s4 + $0x238] sm:$0xff]  ;;  %v5937_v59 = vld [vmem:[%s10264_s3 + $0x230] sm:$0xff]  ;;  %v6018_v45 = vld [vmem:[%s10265_s4 + $0x2e8] sm:$0xff] }
0x11d5   : > { %7995 = vtanh.f32 %v2920_v60  ;;  %v2918_v63 = vadd.f32 %v2914_v61, %v2897_v47  ;;  %v2921_v0 = vmul.f32 0.7978846, %v2917_v62  ;;  %v5941_v47 = vld [vmem:[%s10264_s3 + $0x250] sm:$0xff]  ;;  %v5936_v61 = vld [vmem:[%s10264_s3 + $0x228] sm:$0xff] }
0x11d6   : > { %7401 = vmatprep.subr.mxu0 %v5941_v47  ;;  %v5953_v60 = vld [vmem:[%s10265_s4 + $0x230] sm:$0xff]  ;;  %v5952_v62 = vld [vmem:[%s10265_s4 + $0x228] sm:$0xff] }
0x11d7   : > { %v2922_v3 = vmul.f32 0.7978846, %v2918_v63  ;;  %7997 = vtanh.f32 %v2921_v0  ;;  %7402 = vmatpush3.msra.mxu0 %v5941_v47  ;;  %v5935_v63 = vld [vmem:[%s10264_s3 + $0x220] sm:$0xff]  ;;  %v6016_v47 = vld [vmem:[%s10265_s4 + $0x2d8] sm:$0xff] }
0x11d8   : > { %7403 = vmatprep.subr.mxu0 %v5940_v49  ;;  %v5951_v0 = vld [vmem:[%s10265_s4 + $0x220] sm:$0xff] }
0x11d9   : > { %7999 = vtanh.f32 %v2922_v3  ;;  %7404 = vmatpush3.msra.mxu0 %v5940_v49  ;;  %v5934_v3 = vld [vmem:[%s10264_s3 + $0x218] sm:$0xff]  ;;  %v6014_v49 = vld [vmem:[%s10265_s4 + $0x2c8] sm:$0xff] }
0x11da   : > { %7405 = vmatprep.subr.mxu0 %v5939_v51 }
0x11db   : > { %7406 = vmatpush3.msra.mxu0 %v5939_v51  ;;  %v6012_v51 = vld [vmem:[%s10265_s4 + $0x2b8] sm:$0xff] }
0x11dc   : > { %7407 = vmatprep.subr.mxu0 %v5938_v56 }
0x11dd   : > { %7408 = vmatpush3.msra.mxu0 %v5938_v56  ;;  %v6010_v56 = vld [vmem:[%s10265_s4 + $0x2a8] sm:$0xff] }
0x11de   : > { %7409 = vmatprep.subr.mxu0 %v5937_v59 }
0x11df   : > { %7410 = vmatpush3.msra.mxu0 %v5937_v59  ;;  %v6008_v59 = vld [vmem:[%s10265_s4 + $0x298] sm:$0xff] }
0x11e0   : > { %v7994_v4 = vpop.eup %7993  ;;  %7411 = vmatprep.subr.mxu0 %v5936_v61 }
0x11e1   : > { %v2927_v6 = vadd.f32 1.0, %v7994_v4  ;;  %7412 = vmatpush3.msra.mxu0 %v5936_v61  ;;  %v5950_v4 = vld [vmem:[%s10265_s4 + $0x218] sm:$0xff]  ;;  %v6006_v61 = vld [vmem:[%s10265_s4 + $0x288] sm:$0xff] }
0x11e2   : > { %v7996_v5 = vpop.eup %7995  ;;  %7413 = vmatprep.subr.mxu0 %v5935_v63 }
0x11e3   : > { %v2928_v7 = vadd.f32 1.0, %v7996_v5  ;;  %v2931_v14 = vmul.f32 %v2927_v6, %v2899_v9  ;;  %7414 = vmatpush3.msra.mxu0 %v5935_v63  ;;  %v5933_v5 = vld [vmem:[%s10264_s3 + $0x210] sm:$0xff]  ;;  %v5947_v9 = vld [vmem:[%s10265_s4 + $0x200] sm:$0xff] }
0x11e4   : > { %v7998_v8 = vpop.eup %7997  ;;  %7415 = vmatprep.subr.mxu0 %v5934_v3  ;;  %v5949_v6 = vld [vmem:[%s10265_s4 + $0x210] sm:$0xff] }
0x11e5   : > { %v2932_v12 = vmul.f32 %v2928_v7, %v2900_v55  ;;  %v2929_v15 = vadd.f32 1.0, %v7998_v8  ;;  %7416 = vmatpush3.msra.mxu0 %v5934_v3  ;;  %v5932_v55 = vld [vmem:[%s10264_s3 + $0x208] sm:$0xff]  ;;  %v5931_v8 = vld [vmem:[%s10264_s3 + $0x200] sm:$0xff] }
0x11e6   : > { %v8000_v13 = vpop.eup %7999  ;;  %7417 = vmatprep.subr.mxu0 %v5933_v5  ;;  %v5948_v7 = vld [vmem:[%s10265_s4 + $0x208] sm:$0xff] }
0x11e7   : > { %3031 = vmatprep.mubr.f32.mxu1 %v2932_v12  ;;  %v2930_v17 = vadd.f32 1.0, %v8000_v13  ;;  %v2933_v20 = vmul.f32 %v2929_v15, %v2901_v18  ;;  %7418 = vmatpush3.msra.mxu0 %v5933_v5  ;;  %v5978_v12 = vld [vmem:[%s10266_s5 + $0x278] sm:$0xff] }
0x11e8   : > { %3032 = vmatmul.mubr.f32.vlgmr.msra.gmra.mxu1 %v2931_v14  ;;  %7419 = vmatprep.subr.mxu0 %v5932_v55 }
0x11e9   : > { %v2934_v19 = vmul.f32 %v2930_v17, %v2902_v16  ;;  %7420 = vmatpush3.msra.mxu0 %v5932_v55 }
0x11ea   : > { %7421 = vmatprep.subr.mxu0 %v5931_v8 }
0x11eb   : > { %3036 = vmatprep.mubr.f32.mxu1 %v2934_v19  ;;  %7422 = vmatpush3.msra.mxu0 %v5931_v8 }
0x11ec   : > { %3037 = vmatmul.mubr.f32.gmra.mxu1 %v2933_v20  ;;  %7461 = vmatprep.subr.mxu0 %v5978_v12  ;;  %v5929_v20 = vld [vmem:[%s10262_s1 + $0x1] ss:$0 sm:$0xff] }
0x12a8   : > { %v6555_v21 = vpop.f32.mrf.mxu1 }
0x12aa   : > { %v6556_v22 = vpop.f32.mrf.mxu1 }
0x12ab   : > { %v6557_v23 = vadd.f32 %v6556_v22, %v6555_v21  ;;  %v5930_v22 = vld [vmem:[%s10263_s2 + $0x1] ss:$0 sm:$0xff] }
0x12ac   : > { %v6558_v24 = vpop.f32.mrf.mxu1 }
0x12ad   : > { %v3042_v26 = vadd.f32 %v6557_v23, %v8996_v2  ;;  %v5962_v2 = vld [vmem:[%s10265_s4 + $0x278] sm:$0xff] }
0x12ae   : > { %v6559_v27 = vpop.f32.mrf.mxu1  ;;  %7426 = vmatprep.subr.mxu1 %v5962_v2 }
0x12af   : > { %v6560_v58 = vadd.f32 %v6559_v27, %v6558_v24  ;;  %v9226_v10 = vadd.f32 %v5926_v25, %v3042_v26  ;;  %7427 = vmatpush3.msra.mxu1 %v5962_v2  ;;  %v5975_v2 = vld [vmem:[%s10266_s5 + $0x260] sm:$0xff] }
0x12b1   : > { %v3043_v28 = vadd.f32 %v6560_v58, %v8993_v1  ;;  %3057 = vadd.xlane.f32.xlu0 %v9226_v10  ;;  %v5961_v1 = vld [vmem:[%s10265_s4 + $0x270] sm:$0xff] }
0x12b2   : > { %7428 = vmatprep.subr.mxu1 %v5961_v1 }
0x12b3   : > { %v9230_v53 = vadd.f32 %v5926_v25, %v3043_v28  ;;  %7429 = vmatpush3.msra.mxu1 %v5961_v1  ;;  %v5977_v28 = vld [vmem:[%s10266_s5 + $0x270] sm:$0xff] }
0x12b4   : > { %7430 = vmatprep.subr.mxu1 %v5960_v42  ;;  %v5973_v1 = vld [vmem:[%s10266_s5 + $0x250] sm:$0xff] }
0x12b5   : > { %3059 = vadd.xlane.f32.xlu1 %v9230_v53  ;;  %7431 = vmatpush3.msra.mxu1 %v5960_v42  ;;  %v5963_v42 = vld [vmem:[%s10266_s5 + $0x200] sm:$0xff] }
0x12b6   : > { %7432 = vmatprep.subr.mxu1 %v5959_v44 }
0x12b7   : > { %7433 = vmatpush3.msra.mxu1 %v5959_v44  ;;  %v6019_v44 = vld [vmem:[%s10265_s4 + $0x2f0] sm:$0xff] }
0x12b8   : > { %7434 = vmatprep.subr.mxu1 %v5958_v46 }
0x12b9   : > { %7435 = vmatpush3.msra.mxu1 %v5958_v46  ;;  %v6017_v46 = vld [vmem:[%s10265_s4 + $0x2e0] sm:$0xff] }
0x12ba   : > { %7436 = vmatprep.subr.mxu1 %v5957_v48 }
0x12bb   : > { %7437 = vmatpush3.msra.mxu1 %v5957_v48  ;;  %v6015_v48 = vld [vmem:[%s10265_s4 + $0x2d0] sm:$0xff] }
0x12bc   : > { %7438 = vmatprep.subr.mxu1 %v5956_v50 }
0x12bd   : > { %7439 = vmatpush3.msra.mxu1 %v5956_v50  ;;  %v6013_v50 = vld [vmem:[%s10265_s4 + $0x2c0] sm:$0xff] }
0x12be   : > { %7440 = vmatprep.subr.mxu1 %v5955_v54 }
0x12bf   : > { %7441 = vmatpush3.msra.mxu1 %v5955_v54  ;;  %v6011_v54 = vld [vmem:[%s10265_s4 + $0x2b0] sm:$0xff] }
0x12c0   : > { %7442 = vmatprep.subr.mxu1 %v5954_v57 }
0x12c1   : > { %7443 = vmatpush3.msra.mxu1 %v5954_v57  ;;  %v6009_v57 = vld [vmem:[%s10265_s4 + $0x2a0] sm:$0xff] }
0x12c2   : > { %7444 = vmatprep.subr.mxu1 %v5953_v60 }
0x12c3   : > { %7445 = vmatpush3.msra.mxu1 %v5953_v60  ;;  %v6007_v60 = vld [vmem:[%s10265_s4 + $0x290] sm:$0xff] }
0x12c4   : > { %7446 = vmatprep.subr.mxu1 %v5952_v62 }
0x12c5   : > { %7447 = vmatpush3.msra.mxu1 %v5952_v62  ;;  %v6005_v62 = vld [vmem:[%s10265_s4 + $0x280] sm:$0xff] }
0x12c6   : > { %7448 = vmatprep.subr.mxu1 %v5951_v0 }
0x12c7   : > { %7449 = vmatpush3.msra.mxu1 %v5951_v0 }
0x12c8   : > { %7450 = vmatprep.subr.mxu1 %v5950_v4 }
0x12c9   : > { %7451 = vmatpush3.msra.mxu1 %v5950_v4 }
0x12ca   : > { %7452 = vmatprep.subr.mxu1 %v5949_v6 }
0x12cb   : > { %7453 = vmatpush3.msra.mxu1 %v5949_v6 }
0x12cc   : > { %7454 = vmatprep.subr.mxu1 %v5948_v7 }
0x12cd   : > { %7455 = vmatpush3.msra.mxu1 %v5948_v7 }
0x12ce   : > { %7456 = vmatprep.subr.mxu1 %v5947_v9 }
0x12cf   : > { %7457 = vmatpush3.msra.mxu1 %v5947_v9 }
0x133a   : > { %v3058_v34 = vpop.xlane.xlu0 %3057 }
0x133b   : > { %v3061_v35 = vmul.f32 0.0078125, %v3058_v34  ;;  %v5971_v34 = vld [vmem:[%s10266_s5 + $0x240] sm:$0xff] }
0x133d   : > { %v9249_v36 = vsub.f32 %v9226_v10, %v3061_v35  ;;  %v5970_v35 = vld [vmem:[%s10266_s5 + $0x238] sm:$0xff] }
0x133e   : > { %v3060_v37 = vpop.xlane.xlu1 %3059 }
0x133f   : > { %v3062_v38 = vmul.f32 0.0078125, %v3060_v37  ;;  %v3065_v39 = vmul.f32 %v9249_v36, %v9249_v36  ;;  %v5968_v37 = vld [vmem:[%s10266_s5 + $0x228] sm:$0xff] }
0x1341   : > { %v9254_v40 = vsub.f32 %v9230_v53, %v3062_v38  ;;  %3067 = vadd.xlane.f32.xlu0 %v3065_v39  ;;  %v5967_v38 = vld [vmem:[%s10266_s5 + $0x220] sm:$0xff]  ;;  %v5966_v39 = vld [vmem:[%s10266_s5 + $0x218] sm:$0xff] }
0x1343   : > { %v3066_v41 = vmul.f32 %v9254_v40, %v9254_v40 }
0x1345   : > { %3069 = vadd.xlane.f32.xlu1 %v3066_v41  ;;  %v5964_v41 = vld [vmem:[%s10266_s5 + $0x208] sm:$0xff] }
0x13ca   : > { %v3068_v13 = vpop.xlane.xlu0 %3067 }
0x13cb   : > { %v3071_v14 = vmul.f32 0.0078125, %v3068_v13 }
0x13cd   : > { %v3073_v15 = vadd.f32 1e-05, %v3071_v14 }
0x13ce   : > { %v3070_v16 = vpop.xlane.xlu1 %3069 }
0x13cf   : > { %8001 = vrsqrt.f32 %v3073_v15  ;;  %v3072_v17 = vmul.f32 0.0078125, %v3070_v16 }
0x13d1   : > { %v3074_v18 = vadd.f32 1e-05, %v3072_v17 }
0x13d3   : > { %8003 = vrsqrt.f32 %v3074_v18 }
0x13dc   : > { %v8002_v19 = vpop.eup %8001 }
0x13dd   : > { %v3077_v21 = vmul.f32 %v8002_v19, %v9249_v36  ;;  %v5969_v36 = vld [vmem:[%s10266_s5 + $0x230] sm:$0xff] }
0x13df   : > { %v3085_v23 = vmul.f32 %v5929_v20, %v3077_v21 }
0x13e0   : > { %v8004_v24 = vpop.eup %8003 }
0x13e1   : > { %v9349_v25 = vadd.f32 %v5930_v22, %v3085_v23  ;;  %v3078_v26 = vmul.f32 %v8004_v24, %v9254_v40  ;;  %v5965_v40 = vld [vmem:[%s10266_s5 + $0x210] sm:$0xff] }
0x13e3   : > { %v3086_v27 = vmul.f32 %v5929_v20, %v3078_v26  ;;  %7423 = vmatprep.mubr.f32.mxu0 %v9349_v25  ;;  %7458 = vmatprep.mubr.f32.mxu1 %v9349_v25 }
0x13e5   : > { %v9354_v58 = vadd.f32 %v5930_v22, %v3086_v27  ;;  %v6004_v27 = vld [vmem:[%s10264_s3 + $0x2f8] sm:$0xff] }
0x13e7   : > { %7424 = vmatmul.mubr.f32.vlgmr.msra.gmra.mxu0 %v9354_v58  ;;  %7459 = vmatmul.mubr.f32.vlgmr.msra.gmra.mxu1 %v9354_v58 }
0x13e8   : > { %7462 = vmatpush3.msra.mxu0 %v5978_v12  ;;  %7493 = vmatprep.mubr.f32.mxu0 %v9349_v25 }
0x13e9   : > { %7463 = vmatprep.subr.mxu0 %v5977_v28 }
0x13ea   : > { %7464 = vmatpush3.msra.mxu0 %v5977_v28 }
0x13eb   : > { %7465 = vmatprep.subr.mxu0 %v5976_v30 }
0x13ec   : > { %7466 = vmatpush3.msra.mxu0 %v5976_v30 }
0x13ed   : > { %7467 = vmatprep.subr.mxu0 %v5975_v2 }
0x13ee   : > { %7468 = vmatpush3.msra.mxu0 %v5975_v2 }
0x13ef   : > { %7469 = vmatprep.subr.mxu0 %v5974_v32 }
0x13f0   : > { %7470 = vmatpush3.msra.mxu0 %v5974_v32 }
0x13f1   : > { %7471 = vmatprep.subr.mxu0 %v5973_v1 }
0x13f2   : > { %7472 = vmatpush3.msra.mxu0 %v5973_v1 }
0x13f3   : > { %7473 = vmatprep.subr.mxu0 %v5972_v33 }
0x13f4   : > { %7474 = vmatpush3.msra.mxu0 %v5972_v33 }
0x13f5   : > { %7475 = vmatprep.subr.mxu0 %v5971_v34 }
0x13f6   : > { %7476 = vmatpush3.msra.mxu0 %v5971_v34  ;;  %v6003_v34 = vld [vmem:[%s10264_s3 + $0x2f0] sm:$0xff] }
0x13f7   : > { %7477 = vmatprep.subr.mxu0 %v5970_v35 }
0x13f8   : > { %7478 = vmatpush3.msra.mxu0 %v5970_v35  ;;  %v6002_v35 = vld [vmem:[%s10264_s3 + $0x2e8] sm:$0xff] }
0x13f9   : > { %7479 = vmatprep.subr.mxu0 %v5969_v36 }
0x13fa   : > { %7480 = vmatpush3.msra.mxu0 %v5969_v36  ;;  %v6001_v36 = vld [vmem:[%s10264_s3 + $0x2e0] sm:$0xff] }
0x13fb   : > { %7481 = vmatprep.subr.mxu0 %v5968_v37 }
0x13fc   : > { %7482 = vmatpush3.msra.mxu0 %v5968_v37  ;;  %v6000_v37 = vld [vmem:[%s10264_s3 + $0x2d8] sm:$0xff] }
0x13fd   : > { %7483 = vmatprep.subr.mxu0 %v5967_v38 }
0x13fe   : > { %7484 = vmatpush3.msra.mxu0 %v5967_v38  ;;  %v5999_v38 = vld [vmem:[%s10264_s3 + $0x2d0] sm:$0xff] }
0x13ff   : > { %7485 = vmatprep.subr.mxu0 %v5966_v39 }
0x1400   : > { %7486 = vmatpush3.msra.mxu0 %v5966_v39  ;;  %v5998_v39 = vld [vmem:[%s10264_s3 + $0x2c8] sm:$0xff] }
0x1401   : > { %7487 = vmatprep.subr.mxu0 %v5965_v40 }
0x1402   : > { %7488 = vmatpush3.msra.mxu0 %v5965_v40  ;;  %v5997_v40 = vld [vmem:[%s10264_s3 + $0x2c0] sm:$0xff] }
0x1403   : > { %7489 = vmatprep.subr.mxu0 %v5964_v41 }
0x1404   : > { %7490 = vmatpush3.msra.mxu0 %v5964_v41  ;;  %v5996_v41 = vld [vmem:[%s10264_s3 + $0x2b8] sm:$0xff] }
0x1405   : > { %7491 = vmatprep.subr.mxu0 %v5963_v42 }
0x1406   : > { %7492 = vmatpush3.msra.mxu0 %v5963_v42  ;;  %v5995_v42 = vld [vmem:[%s10264_s3 + $0x2b0] sm:$0xff] }
0x1407   : > { %7494 = vmatmul.mubr.f32.vlgmr.msra.gmra.mxu0 %v9354_v58  ;;  %7545 = vmatprep.subr.mxu0 %v6020_v43 }
0x1408   : > { %7546 = vmatpush3.msra.mxu0 %v6020_v43  ;;  %7577 = vmatprep.mubr.f32.mxu0 %v9349_v25  ;;  %v5994_v43 = vld [vmem:[%s10264_s3 + $0x2a8] sm:$0xff] }
0x1409   : > { %7547 = vmatprep.subr.mxu0 %v6019_v44 }
0x140a   : > { %7548 = vmatpush3.msra.mxu0 %v6019_v44  ;;  %v5993_v44 = vld [vmem:[%s10264_s3 + $0x2a0] sm:$0xff] }
0x140b   : > { %7549 = vmatprep.subr.mxu0 %v6018_v45 }
0x140c   : > { %7550 = vmatpush3.msra.mxu0 %v6018_v45  ;;  %v5992_v45 = vld [vmem:[%s10264_s3 + $0x298] sm:$0xff] }
0x140d   : > { %7551 = vmatprep.subr.mxu0 %v6017_v46 }
0x140e   : > { %7552 = vmatpush3.msra.mxu0 %v6017_v46  ;;  %v5991_v46 = vld [vmem:[%s10264_s3 + $0x290] sm:$0xff] }
0x140f   : > { %7553 = vmatprep.subr.mxu0 %v6016_v47 }
0x1410   : > { %7554 = vmatpush3.msra.mxu0 %v6016_v47  ;;  %v5990_v47 = vld [vmem:[%s10264_s3 + $0x288] sm:$0xff] }
0x1411   : > { %7555 = vmatprep.subr.mxu0 %v6015_v48 }
0x1412   : > { %7556 = vmatpush3.msra.mxu0 %v6015_v48  ;;  %v5989_v48 = vld [vmem:[%s10264_s3 + $0x280] sm:$0xff] }
0x1413   : > { %7557 = vmatprep.subr.mxu0 %v6014_v49 }
0x1414   : > { %7558 = vmatpush3.msra.mxu0 %v6014_v49  ;;  %v6036_v49 = vld [vmem:[%s10266_s5 + $0x2f8] sm:$0xff] }
0x1415   : > { %7559 = vmatprep.subr.mxu0 %v6013_v50 }
0x1416   : > { %7560 = vmatpush3.msra.mxu0 %v6013_v50  ;;  %v6035_v50 = vld [vmem:[%s10266_s5 + $0x2f0] sm:$0xff] }
0x1417   : > { %7561 = vmatprep.subr.mxu0 %v6012_v51 }
0x1418   : > { %7562 = vmatpush3.msra.mxu0 %v6012_v51  ;;  %v6034_v51 = vld [vmem:[%s10266_s5 + $0x2e8] sm:$0xff] }
0x1419   : > { %7563 = vmatprep.subr.mxu0 %v6011_v54 }
0x141a   : > { %7564 = vmatpush3.msra.mxu0 %v6011_v54  ;;  %v6033_v54 = vld [vmem:[%s10266_s5 + $0x2e0] sm:$0xff] }
0x141b   : > { %7565 = vmatprep.subr.mxu0 %v6010_v56 }
0x141c   : > { %7566 = vmatpush3.msra.mxu0 %v6010_v56  ;;  %v6032_v56 = vld [vmem:[%s10266_s5 + $0x2d8] sm:$0xff] }
0x141d   : > { %7567 = vmatprep.subr.mxu0 %v6009_v57 }
0x141e   : > { %7568 = vmatpush3.msra.mxu0 %v6009_v57  ;;  %v6031_v57 = vld [vmem:[%s10266_s5 + $0x2d0] sm:$0xff] }
0x141f   : > { %7569 = vmatprep.subr.mxu0 %v6008_v59 }
0x1420   : > { %7570 = vmatpush3.msra.mxu0 %v6008_v59  ;;  %v6030_v59 = vld [vmem:[%s10266_s5 + $0x2c8] sm:$0xff] }
0x1421   : > { %7571 = vmatprep.subr.mxu0 %v6007_v60 }
0x1422   : > { %7572 = vmatpush3.msra.mxu0 %v6007_v60  ;;  %v6029_v60 = vld [vmem:[%s10266_s5 + $0x2c0] sm:$0xff] }
0x1423   : > { %7573 = vmatprep.subr.mxu0 %v6006_v61 }
0x1424   : > { %7574 = vmatpush3.msra.mxu0 %v6006_v61  ;;  %v6028_v61 = vld [vmem:[%s10266_s5 + $0x2b8] sm:$0xff] }
0x1425   : > { %7575 = vmatprep.subr.mxu0 %v6005_v62 }
0x1426   : > { %7576 = vmatpush3.msra.mxu0 %v6005_v62  ;;  %v6027_v62 = vld [vmem:[%s10266_s5 + $0x2b0] sm:$0xff] }
0x1427   : > { %7578 = vmatmul.mubr.f32.vlgmr.msra.gmra.mxu0 %v9354_v58 }
0x14a7   : > { %v7425_v63 = vpop.f32.mrf.mxu0  ;;  %v7460_v0 = vpop.f32.mrf.mxu1 }
0x14a8   : > { %7496 = vmatprep.subr.msk.mxu1 %vm782_vm0, %v7460_v0 }
0x14a9   : > { %v3178_v3 = vpop.f32.mrf.mxu0  ;;  %v3270_v4 = vpop.f32.mrf.mxu1  ;;  %7497 = vmatpush3.xpose.msk.msra.mxu1 %vm782_vm0, %v7460_v0  ;;  %v6025_v0 = vld [vmem:[%s10266_s5 + $0x2a0] sm:$0xff] }
0x14aa   : > { %7498 = vmatprep.subr.msk.mxu1 %vm782_vm0, %v3270_v4  ;;  %7500 = vmatprep.mubr.msk.f32.mxu1 %vm782_vm0, %v3178_v3  ;;  %v6024_v3 = vld [vmem:[%s10266_s5 + $0x298] sm:$0xff] }
0x14ad   : > { %7499 = vmatpush3.xpose.msk.msra.mxu1 %vm782_vm0, %v3270_v4  ;;  %v6023_v4 = vld [vmem:[%s10266_s5 + $0x290] sm:$0xff] }
0x14b0   : > { %7501 = vmatmul.mubr.msk.f32.vlgmr.msra.gmra.mxu1 %vm782_vm0, %v7425_v63  ;;  %v6026_v63 = vld [vmem:[%s10266_s5 + $0x2a8] sm:$0xff] }
0x14c7   : > { %v7495_v5 = vpop.f32.mrf.mxu0 }
0x14c8   : > { %7503 = vmatprep.subr.mxu1 %v7495_v5 }
0x14c9   : > { %v3362_v6 = vpop.f32.mrf.mxu0  ;;  %7504 = vmatpush3.msra.mxu1 %v7495_v5  ;;  %v6022_v5 = vld [vmem:[%s10266_s5 + $0x288] sm:$0xff] }
0x14ca   : > { %7505 = vmatprep.subr.mxu1 %v3362_v6 }
0x14cb   : > { %7506 = vmatpush3.msra.mxu1 %v3362_v6  ;;  %v6021_v6 = vld [vmem:[%s10266_s5 + $0x280] sm:$0xff] }
0x14cc   : > { %7510 = vmatprep.subr.mxu1 %v6004_v27 }
0x14e7   : > { %v7579_v55 = vpop.f32.mrf.mxu0 }
0x14e8   : > { %7615 = vmatprep.subr.msk.mxu0 %vm782_vm0, %v7579_v55 }
0x14e9   : > { %v3743_v7 = vpop.f32.mrf.mxu0  ;;  %7616 = vmatpush3.xpose.msk.msra.mxu0 %vm782_vm0, %v7579_v55  ;;  %v5988_v55 = vld [vmem:[%s10267_s6 + $0x98] sm:$0xff] }
0x14ea   : > { %7617 = vmatprep.subr.msk.mxu0 %vm782_vm0, %v3743_v7 }
0x14ed   : > { %7618 = vmatpush3.xpose.msk.msra.mxu0 %vm782_vm0, %v3743_v7  ;;  %v5987_v7 = vld [vmem:[%s10267_s6 + $0x90] sm:$0xff] }
0x1570   : > { %v7502_v8 = vpop.f32.mrf.mxu1 }
0x1571   : > { %v3459_v9 = vmul.f32 0.17677669, %v7502_v8  ;;  %v5986_v8 = vld [vmem:[%s10267_s6 + $0x88] sm:$0xff] }
0x1572   : > { %v3449_v12 = vpop.f32.mrf.mxu1 }
0x1573   : > { %v3458_v13 = vmul.f32 0.17677669, %v3449_v12  ;;  %v3463_v14 = vsel %vm872_vm1, %v3459_v9, -inf  ;;  %v6082_v12 = vld [vmem:[%s10265_s4 + $0x378] sm:$0xff] }
0x1574   : > { %3464 = vmax.xlane.f32.xlu1 %v3463_v14 }
0x1575   : > { %v3460_v15 = vsel %vm872_vm1, %v3458_v13, -inf }
0x1576   : > { %3461 = vmax.xlane.f32.xlu0 %v3460_v15  ;;  %v6081_v15 = vld [vmem:[%s10265_s4 + $0x370] sm:$0xff] }
0x15fd   : > { %v3465_v16 = vpop.xlane.xlu1 %3464 }
0x15fe   : > { %v3467_v17 = vsub.f32 %v3459_v9, %v3465_v16  ;;  %v5985_v9 = vld [vmem:[%s10267_s6 + $0x80] sm:$0xff]  ;;  %v6080_v16 = vld [vmem:[%s10265_s4 + $0x368] sm:$0xff] }
0x15ff   : > { %v3462_v18 = vpop.xlane.xlu0 %3461 }
0x1600   : > { %v3470_v19 = vmul.f32 1.442695, %v3467_v17  ;;  %v3466_v20 = vsub.f32 %v3458_v13, %v3462_v18  ;;  %v6079_v17 = vld [vmem:[%s10265_s4 + $0x360] sm:$0xff]  ;;  %v6078_v18 = vld [vmem:[%s10265_s4 + $0x358] sm:$0xff] }
0x1602   : > { %8005 = vpow2.f32 %v3470_v19  ;;  %v3468_v21 = vmul.f32 1.442695, %v3466_v20  ;;  %v6077_v19 = vld [vmem:[%s10265_s4 + $0x350] sm:$0xff]  ;;  %v6076_v20 = vld [vmem:[%s10265_s4 + $0x348] sm:$0xff] }
0x1604   : > { %8007 = vpow2.f32 %v3468_v21  ;;  %v6075_v21 = vld [vmem:[%s10265_s4 + $0x340] sm:$0xff] }
0x160f   : > { %v8006_v22 = vpop.eup %8005 }
0x1610   : > { %v3475_v23 = vsel %vm872_vm1, %v8006_v22, 0.0 }
0x1611   : > { %v8008_v24 = vpop.eup %8007  ;;  %3476 = vadd.xlane.f32.xlu1 %v3475_v23  ;;  %v6073_v23 = vld [vmem:[%s10265_s4 + $0x330] sm:$0xff] }
0x1612   : > { %v3472_v26 = vsel %vm872_vm1, %v8008_v24, 0.0 }
0x1613   : > { %3473 = vadd.xlane.f32.xlu0 %v3472_v26  ;;  %v6071_v26 = vld [vmem:[%s10265_s4 + $0x320] sm:$0xff] }
0x169a   : > { %v3477_v28 = vpop.xlane.xlu1 %3476 }
0x169b   : > { %8009 = vrcp.f32 %v3477_v28  ;;  %v6069_v28 = vld [vmem:[%s10265_s4 + $0x310] sm:$0xff] }
0x169c   : > { %v3474_v30 = vpop.xlane.xlu0 %3473 }
0x169d   : > { %8011 = vrcp.f32 %v3474_v30  ;;  %v6068_v30 = vld [vmem:[%s10265_s4 + $0x308] sm:$0xff] }
0x16a8   : > { %v8010_v2 = vpop.eup %8009 }
0x16a9   : > { %v3481_v33 = vmul.f32 %v8010_v2, %v8006_v22  ;;  %v6074_v22 = vld [vmem:[%s10265_s4 + $0x338] sm:$0xff]  ;;  %v6067_v2 = vld [vmem:[%s10265_s4 + $0x300] sm:$0xff] }
0x16aa   : > { %v8012_v32 = vpop.eup %8011 }
0x16ab   : > { %v3480_v1 = vmul.f32 %v8012_v32, %v8008_v24  ;;  %v6072_v24 = vld [vmem:[%s10265_s4 + $0x328] sm:$0xff] }
0x16ad   : > { %7507 = vmatprep.mubr.msk.f32.mxu1 %vm872_vm1, %v3480_v1 }
0x16ae   : > { %7508 = vmatmul.mubr.msk.f32.vlgmr.msra.gmra.mxu1 %vm872_vm1, %v3481_v33 }
0x16af   : > { %7511 = vmatpush3.msra.mxu1 %v6004_v27  ;;  %7542 = vmatprep.mubr.f32.mxu1 %v9349_v25  ;;  %v6070_v27 = vld [vmem:[%s10265_s4 + $0x318] sm:$0xff] }
0x16b0   : > { %7512 = vmatprep.subr.mxu1 %v6003_v34 }
0x16b1   : > { %7513 = vmatpush3.msra.mxu1 %v6003_v34 }
0x16b2   : > { %7514 = vmatprep.subr.mxu1 %v6002_v35 }
0x16b3   : > { %7515 = vmatpush3.msra.mxu1 %v6002_v35 }
0x16b4   : > { %7516 = vmatprep.subr.mxu1 %v6001_v36 }
0x16b5   : > { %7517 = vmatpush3.msra.mxu1 %v6001_v36 }
0x16b6   : > { %7518 = vmatprep.subr.mxu1 %v6000_v37 }
0x16b7   : > { %7519 = vmatpush3.msra.mxu1 %v6000_v37 }
0x16b8   : > { %7520 = vmatprep.subr.mxu1 %v5999_v38 }
0x16b9   : > { %7521 = vmatpush3.msra.mxu1 %v5999_v38 }
0x16ba   : > { %7522 = vmatprep.subr.mxu1 %v5998_v39 }
0x16bb   : > { %7523 = vmatpush3.msra.mxu1 %v5998_v39 }
0x16bc   : > { %7524 = vmatprep.subr.mxu1 %v5997_v40 }
0x16bd   : > { %7525 = vmatpush3.msra.mxu1 %v5997_v40 }
0x16be   : > { %7526 = vmatprep.subr.mxu1 %v5996_v41 }
0x16bf   : > { %7527 = vmatpush3.msra.mxu1 %v5996_v41 }
0x16c0   : > { %7528 = vmatprep.subr.mxu1 %v5995_v42 }
0x16c1   : > { %7529 = vmatpush3.msra.mxu1 %v5995_v42 }
0x16c2   : > { %7530 = vmatprep.subr.mxu1 %v5994_v43 }
0x16c3   : > { %7531 = vmatpush3.msra.mxu1 %v5994_v43 }
0x16c4   : > { %7532 = vmatprep.subr.mxu1 %v5993_v44 }
0x16c5   : > { %7533 = vmatpush3.msra.mxu1 %v5993_v44 }
0x16c6   : > { %7534 = vmatprep.subr.mxu1 %v5992_v45 }
0x16c7   : > { %7535 = vmatpush3.msra.mxu1 %v5992_v45 }
0x16c8   : > { %7536 = vmatprep.subr.mxu1 %v5991_v46 }
0x16c9   : > { %7537 = vmatpush3.msra.mxu1 %v5991_v46 }
0x16ca   : > { %7538 = vmatprep.subr.mxu1 %v5990_v47 }
0x16cb   : > { %7539 = vmatpush3.msra.mxu1 %v5990_v47 }
0x16cc   : > { %7540 = vmatprep.subr.mxu1 %v5989_v48 }
0x16cd   : > { %7541 = vmatpush3.msra.mxu1 %v5989_v48 }
0x16ce   : > { %7543 = vmatmul.mubr.f32.vlgmr.msra.gmra.mxu1 %v9354_v58  ;;  %7580 = vmatprep.subr.mxu1 %v6036_v49 }
0x16cf   : > { %7581 = vmatpush3.msra.mxu1 %v6036_v49  ;;  %7612 = vmatprep.mubr.f32.mxu1 %v9349_v25 }
0x16d0   : > { %7582 = vmatprep.subr.mxu1 %v6035_v50 }
0x16d1   : > { %7583 = vmatpush3.msra.mxu1 %v6035_v50 }
0x16d2   : > { %7584 = vmatprep.subr.mxu1 %v6034_v51 }
0x16d3   : > { %7585 = vmatpush3.msra.mxu1 %v6034_v51 }
0x16d4   : > { %7586 = vmatprep.subr.mxu1 %v6033_v54 }
0x16d5   : > { %7587 = vmatpush3.msra.mxu1 %v6033_v54 }
0x16d6   : > { %7588 = vmatprep.subr.mxu1 %v6032_v56 }
0x16d7   : > { %7589 = vmatpush3.msra.mxu1 %v6032_v56 }
0x16d8   : > { %7590 = vmatprep.subr.mxu1 %v6031_v57 }
0x16d9   : > { %7591 = vmatpush3.msra.mxu1 %v6031_v57 }
0x16da   : > { %7592 = vmatprep.subr.mxu1 %v6030_v59 }
0x16db   : > { %7593 = vmatpush3.msra.mxu1 %v6030_v59  ;;  %v6046_v59 = vld [vmem:[%s10267_s6 + $0xb8] sm:$0xff] }
0x16dc   : > { %7594 = vmatprep.subr.mxu1 %v6029_v60 }
0x16dd   : > { %7595 = vmatpush3.msra.mxu1 %v6029_v60 }
0x16de   : > { %7596 = vmatprep.subr.mxu1 %v6028_v61 }
0x16df   : > { %7597 = vmatpush3.msra.mxu1 %v6028_v61 }
0x16e0   : > { %7598 = vmatprep.subr.mxu1 %v6027_v62 }
0x16e1   : > { %7599 = vmatpush3.msra.mxu1 %v6027_v62 }
0x16e2   : > { %7600 = vmatprep.subr.mxu1 %v6026_v63 }
0x16e3   : > { %7601 = vmatpush3.msra.mxu1 %v6026_v63 }
0x16e4   : > { %7602 = vmatprep.subr.mxu1 %v6025_v0 }
0x16e5   : > { %7603 = vmatpush3.msra.mxu1 %v6025_v0 }
0x16e6   : > { %7604 = vmatprep.subr.mxu1 %v6024_v3 }
0x16e7   : > { %7605 = vmatpush3.msra.mxu1 %v6024_v3 }
0x16e8   : > { %7606 = vmatprep.subr.mxu1 %v6023_v4 }
0x16e9   : > { %7607 = vmatpush3.msra.mxu1 %v6023_v4  ;;  %v6045_v4 = vld [vmem:[%s10267_s6 + $0xb0] sm:$0xff] }
0x16ea   : > { %7608 = vmatprep.subr.mxu1 %v6022_v5 }
0x16eb   : > { %7609 = vmatpush3.msra.mxu1 %v6022_v5  ;;  %v6044_v5 = vld [vmem:[%s10267_s6 + $0xa8] sm:$0xff] }
0x16ec   : > { %7610 = vmatprep.subr.mxu1 %v6021_v6 }
0x16ed   : > { %7611 = vmatpush3.msra.mxu1 %v6021_v6  ;;  %v6043_v6 = vld [vmem:[%s10267_s6 + $0xa0] sm:$0xff] }
0x16ee   : > { %7613 = vmatmul.mubr.f32.vlgmr.msra.gmra.mxu1 %v9354_v58  ;;  %7640 = vmatprep.subr.mxu1 %v5988_v55 }
0x16ef   : > { %7641 = vmatpush3.msra.mxu1 %v5988_v55  ;;  %v6066_v55 = vld [vmem:[%s10264_s3 + $0x378] sm:$0xff] }
0x16f0   : > { %7642 = vmatprep.subr.mxu1 %v5987_v7 }
0x16f1   : > { %7643 = vmatpush3.msra.mxu1 %v5987_v7 }
0x16f2   : > { %7644 = vmatprep.subr.mxu1 %v5986_v8 }
0x16f3   : > { %7645 = vmatpush3.msra.mxu1 %v5986_v8 }
0x16f4   : > { %7646 = vmatprep.subr.mxu1 %v5985_v9 }
0x16f5   : > { %7647 = vmatpush3.msra.mxu1 %v5985_v9  ;;  %v6065_v9 = vld [vmem:[%s10264_s3 + $0x370] sm:$0xff] }
0x16f6   : > { %7686 = vmatprep.subr.mxu1 %v6082_v12 }
0x176e   : > { %v7509_v13 = vpop.f32.mrf.mxu1 }
0x1770   : > { %v3554_v14 = vpop.f32.mrf.mxu1 }
0x1771   : > { %7648 = vmatprep.mubr.msk.f32.mxu1 %vm782_vm0, %v3554_v14  ;;  %v6062_v14 = vld [vmem:[%s10264_s3 + $0x358] sm:$0xff] }
0x1772   : > { %7649 = vmatmul.mubr.msk.f32.vlgmr.msra.gmra.mxu1 %vm782_vm0, %v7509_v13  ;;  %v6063_v13 = vld [vmem:[%s10264_s3 + $0x360] sm:$0xff] }
0x1773   : > { %7687 = vmatpush3.msra.mxu1 %v6082_v12  ;;  %7718 = vmatprep.mubr.f32.mxu1 %v9349_v25  ;;  %v6064_v12 = vld [vmem:[%s10264_s3 + $0x368] sm:$0xff] }
0x1774   : > { %7688 = vmatprep.subr.mxu1 %v6081_v15 }
0x1775   : > { %7689 = vmatpush3.msra.mxu1 %v6081_v15  ;;  %v6061_v15 = vld [vmem:[%s10264_s3 + $0x350] sm:$0xff] }
0x1776   : > { %7690 = vmatprep.subr.mxu1 %v6080_v16 }
0x1777   : > { %7691 = vmatpush3.msra.mxu1 %v6080_v16  ;;  %v6060_v16 = vld [vmem:[%s10264_s3 + $0x348] sm:$0xff] }
0x1778   : > { %7692 = vmatprep.subr.mxu1 %v6079_v17 }
0x1779   : > { %7693 = vmatpush3.msra.mxu1 %v6079_v17  ;;  %v6059_v17 = vld [vmem:[%s10264_s3 + $0x340] sm:$0xff] }
0x177a   : > { %7694 = vmatprep.subr.mxu1 %v6078_v18 }
0x177b   : > { %7695 = vmatpush3.msra.mxu1 %v6078_v18  ;;  %v6058_v18 = vld [vmem:[%s10264_s3 + $0x338] sm:$0xff] }
0x177c   : > { %7696 = vmatprep.subr.mxu1 %v6077_v19 }
0x177d   : > { %7697 = vmatpush3.msra.mxu1 %v6077_v19  ;;  %v6057_v19 = vld [vmem:[%s10264_s3 + $0x330] sm:$0xff] }
0x177e   : > { %7698 = vmatprep.subr.mxu1 %v6076_v20 }
0x177f   : > { %7699 = vmatpush3.msra.mxu1 %v6076_v20  ;;  %v6056_v20 = vld [vmem:[%s10264_s3 + $0x328] sm:$0xff] }
0x1780   : > { %7700 = vmatprep.subr.mxu1 %v6075_v21 }
0x1781   : > { %7701 = vmatpush3.msra.mxu1 %v6075_v21  ;;  %v6055_v21 = vld [vmem:[%s10264_s3 + $0x320] sm:$0xff] }
0x1782   : > { %7702 = vmatprep.subr.mxu1 %v6074_v22 }
0x1783   : > { %7703 = vmatpush3.msra.mxu1 %v6074_v22  ;;  %v6054_v22 = vld [vmem:[%s10264_s3 + $0x318] sm:$0xff] }
0x1784   : > { %7704 = vmatprep.subr.mxu1 %v6073_v23 }
0x1785   : > { %7705 = vmatpush3.msra.mxu1 %v6073_v23  ;;  %v6053_v23 = vld [vmem:[%s10264_s3 + $0x310] sm:$0xff] }
0x1786   : > { %7706 = vmatprep.subr.mxu1 %v6072_v24 }
0x1787   : > { %7707 = vmatpush3.msra.mxu1 %v6072_v24  ;;  %v6052_v24 = vld [vmem:[%s10264_s3 + $0x308] sm:$0xff] }
0x1788   : > { %7708 = vmatprep.subr.mxu1 %v6071_v26 }
0x1789   : > { %7709 = vmatpush3.msra.mxu1 %v6071_v26  ;;  %v6051_v26 = vld [vmem:[%s10264_s3 + $0x300] sm:$0xff] }
0x178a   : > { %7710 = vmatprep.subr.mxu1 %v6070_v27 }
0x178b   : > { %7711 = vmatpush3.msra.mxu1 %v6070_v27  ;;  %v6098_v27 = vld [vmem:[%s10266_s5 + $0x378] sm:$0xff] }
0x178c   : > { %7712 = vmatprep.subr.mxu1 %v6069_v28 }
0x178d   : > { %7713 = vmatpush3.msra.mxu1 %v6069_v28  ;;  %v6097_v28 = vld [vmem:[%s10266_s5 + $0x370] sm:$0xff] }
0x178e   : > { %v7544_v32 = vpop.f32.mrf.mxu1  ;;  %7714 = vmatprep.subr.mxu1 %v6068_v30 }
0x178f   : > { %7715 = vmatpush3.msra.mxu1 %v6068_v30  ;;  %v6096_v30 = vld [vmem:[%s10266_s5 + $0x368] sm:$0xff] }
0x1790   : > { %v3651_v1 = vpop.f32.mrf.mxu1  ;;  %7716 = vmatprep.subr.mxu1 %v6067_v2 }
0x1791   : > { %7619 = vmatprep.mubr.msk.f32.mxu0 %vm782_vm0, %v3651_v1  ;;  %7717 = vmatpush3.msra.mxu1 %v6067_v2  ;;  %v6095_v2 = vld [vmem:[%s10266_s5 + $0x360] sm:$0xff]  ;;  %v6093_v1 = vld [vmem:[%s10266_s5 + $0x350] sm:$0xff] }
0x1792   : > { %7620 = vmatmul.mubr.msk.f32.vlgmr.msra.gmra.mxu0 %vm782_vm0, %v7544_v32  ;;  %7719 = vmatmul.mubr.f32.vlgmr.msra.gmra.mxu1 %v9354_v58  ;;  %v6094_v32 = vld [vmem:[%s10266_s5 + $0x358] sm:$0xff] }
0x17ae   : > { %v7614_v33 = vpop.f32.mrf.mxu1 }
0x17af   : > { %7622 = vmatprep.subr.mxu0 %v7614_v33 }
0x17b0   : > { %v3835_v34 = vpop.f32.mrf.mxu1  ;;  %7623 = vmatpush3.msra.mxu0 %v7614_v33  ;;  %v6092_v33 = vld [vmem:[%s10266_s5 + $0x348] sm:$0xff] }
0x17b1   : > { %7624 = vmatprep.subr.mxu0 %v3835_v34 }
0x17b2   : > { %7625 = vmatpush3.msra.mxu0 %v3835_v34  ;;  %v6091_v34 = vld [vmem:[%s10266_s5 + $0x340] sm:$0xff] }
0x17b3   : > { %7629 = vmatprep.subr.mxu0 %v6046_v59 }
0x1832   : > { %v9637_v35 = vpop.f32.mrf.mxu1 }
0x1834   : > { %v9639_v36 = vpop.f32.mrf.mxu1 }
0x1852   : > { %v7621_v37 = vpop.f32.mrf.mxu0  ;;  %v7720_v38 = vpop.f32.mrf.mxu1 }
0x1853   : > { %v3932_v39 = vmul.f32 0.17677669, %v7621_v37  ;;  %7756 = vmatprep.subr.msk.mxu1 %vm782_vm0, %v7720_v38  ;;  %v6090_v37 = vld [vmem:[%s10266_s5 + $0x338] sm:$0xff] }
0x1854   : > { %v3922_v40 = vpop.f32.mrf.mxu0  ;;  %v4378_v41 = vpop.f32.mrf.mxu1  ;;  %7757 = vmatpush3.xpose.msk.msra.mxu1 %vm782_vm0, %v7720_v38  ;;  %v6089_v38 = vld [vmem:[%s10266_s5 + $0x330] sm:$0xff] }
0x1855   : > { %v3931_v42 = vmul.f32 0.17677669, %v3922_v40  ;;  %7758 = vmatprep.subr.msk.mxu1 %vm782_vm0, %v4378_v41  ;;  %v3936_v43 = vsel %vm872_vm1, %v3932_v39, -inf  ;;  %v6087_v40 = vld [vmem:[%s10266_s5 + $0x320] sm:$0xff] }
0x1856   : > { %3937 = vmax.xlane.f32.xlu1 %v3936_v43  ;;  %v6084_v43 = vld [vmem:[%s10266_s5 + $0x308] sm:$0xff] }
0x1857   : > { %v3933_v44 = vsel %vm872_vm1, %v3931_v42, -inf }
0x1858   : > { %3934 = vmax.xlane.f32.xlu0 %v3933_v44  ;;  %7759 = vmatpush3.xpose.msk.msra.mxu1 %vm782_vm0, %v4378_v41  ;;  %v6086_v41 = vld [vmem:[%s10266_s5 + $0x318] sm:$0xff]  ;;  %v6083_v44 = vld [vmem:[%s10266_s5 + $0x300] sm:$0xff] }
0x18df   : > { %v3938_v45 = vpop.xlane.xlu1 %3937 }
0x18e0   : > { %v3940_v46 = vsub.f32 %v3932_v39, %v3938_v45  ;;  %v6088_v39 = vld [vmem:[%s10266_s5 + $0x328] sm:$0xff]  ;;  %v6142_v45 = vld [vmem:[%s10265_s4 + $0x3f8] sm:$0xff] }
0x18e1   : > { %v3935_v47 = vpop.xlane.xlu0 %3934 }
0x18e2   : > { %v3943_v48 = vmul.f32 1.442695, %v3940_v46  ;;  %v3939_v49 = vsub.f32 %v3931_v42, %v3935_v47  ;;  %v6085_v42 = vld [vmem:[%s10266_s5 + $0x310] sm:$0xff]  ;;  %v6140_v47 = vld [vmem:[%s10265_s4 + $0x3e8] sm:$0xff] }
0x18e3   : > { %v6141_v46 = vld [vmem:[%s10265_s4 + $0x3f0] sm:$0xff] }
0x18e4   : > { %8013 = vpow2.f32 %v3943_v48  ;;  %v3941_v50 = vmul.f32 1.442695, %v3939_v49  ;;  %v6139_v48 = vld [vmem:[%s10265_s4 + $0x3e0] sm:$0xff]  ;;  %v6138_v49 = vld [vmem:[%s10265_s4 + $0x3d8] sm:$0xff] }
0x18e6   : > { %8015 = vpow2.f32 %v3941_v50  ;;  %v6137_v50 = vld [vmem:[%s10265_s4 + $0x3d0] sm:$0xff] }
0x18f1   : > { %v8014_v51 = vpop.eup %8013 }
0x18f2   : > { %v3948_v54 = vsel %vm872_vm1, %v8014_v51, 0.0 }
0x18f3   : > { %v8016_v56 = vpop.eup %8015  ;;  %3949 = vadd.xlane.f32.xlu1 %v3948_v54  ;;  %v6135_v54 = vld [vmem:[%s10265_s4 + $0x3c0] sm:$0xff] }
0x18f4   : > { %v3945_v57 = vsel %vm872_vm1, %v8016_v56, 0.0 }
0x18f5   : > { %3946 = vadd.xlane.f32.xlu0 %v3945_v57  ;;  %v6133_v57 = vld [vmem:[%s10265_s4 + $0x3b0] sm:$0xff] }
0x197c   : > { %v3950_v60 = vpop.xlane.xlu1 %3949 }
0x197d   : > { %8017 = vrcp.f32 %v3950_v60  ;;  %v6131_v60 = vld [vmem:[%s10265_s4 + $0x3a0] sm:$0xff] }
0x197e   : > { %v3947_v61 = vpop.xlane.xlu0 %3946 }
0x197f   : > { %8019 = vrcp.f32 %v3947_v61  ;;  %v6130_v61 = vld [vmem:[%s10265_s4 + $0x398] sm:$0xff] }
0x198a   : > { %v8018_v62 = vpop.eup %8017 }
0x198b   : > { %v3954_v3 = vmul.f32 %v8018_v62, %v8014_v51  ;;  %v6136_v51 = vld [vmem:[%s10265_s4 + $0x3c8] sm:$0xff]  ;;  %v6129_v62 = vld [vmem:[%s10265_s4 + $0x390] sm:$0xff] }
0x198c   : > { %v8020_v63 = vpop.eup %8019 }
0x198d   : > { %v3953_v0 = vmul.f32 %v8020_v63, %v8016_v56  ;;  %v6134_v56 = vld [vmem:[%s10265_s4 + $0x3b8] sm:$0xff]  ;;  %v6128_v63 = vld [vmem:[%s10265_s4 + $0x388] sm:$0xff] }
0x198f   : > { %7626 = vmatprep.mubr.msk.f32.mxu0 %vm872_vm1, %v3953_v0  ;;  %v6127_v0 = vld [vmem:[%s10265_s4 + $0x380] sm:$0xff] }
0x1990   : > { %7627 = vmatmul.mubr.msk.f32.vlgmr.msra.gmra.mxu0 %vm872_vm1, %v3954_v3 }
0x1991   : > { %7630 = vmatpush3.msra.mxu0 %v6046_v59  ;;  %v6132_v59 = vld [vmem:[%s10265_s4 + $0x3a8] sm:$0xff] }
0x1992   : > { %7631 = vmatprep.subr.mxu0 %v6045_v4 }
0x1993   : > { %7632 = vmatpush3.msra.mxu0 %v6045_v4 }
0x1994   : > { %7633 = vmatprep.subr.mxu0 %v6044_v5 }
0x1995   : > { %7634 = vmatpush3.msra.mxu0 %v6044_v5 }
0x1996   : > { %7635 = vmatprep.subr.mxu0 %v6043_v6 }
0x1997   : > { %7636 = vmatpush3.msra.mxu0 %v6043_v6 }
0x1998   : > { %7651 = vmatprep.subr.mxu0 %v6066_v55 }
0x1a50   : > { %v7628_v7 = vpop.f32.mrf.mxu0 }
0x1a52   : > { %v4027_v8 = vpop.f32.mrf.mxu0 }
0x1a53   : > { %7637 = vmatprep.mubr.msk.f32.mxu0 %vm782_vm0, %v4027_v8 }
0x1a54   : > { %7638 = vmatmul.mubr.msk.f32.vlgmr.msra.gmra.mxu0 %vm782_vm0, %v7628_v7 }
0x1a55   : > { %7652 = vmatpush3.msra.mxu0 %v6066_v55  ;;  %7683 = vmatprep.mubr.f32.mxu0 %v9349_v25 }
0x1a56   : > { %7653 = vmatprep.subr.mxu0 %v6065_v9 }
0x1a57   : > { %7654 = vmatpush3.msra.mxu0 %v6065_v9 }
0x1a58   : > { %7655 = vmatprep.subr.mxu0 %v6064_v12 }
0x1a59   : > { %7656 = vmatpush3.msra.mxu0 %v6064_v12 }
0x1a5a   : > { %7657 = vmatprep.subr.mxu0 %v6063_v13 }
0x1a5b   : > { %7658 = vmatpush3.msra.mxu0 %v6063_v13 }
0x1a5c   : > { %7659 = vmatprep.subr.mxu0 %v6062_v14 }
0x1a5d   : > { %7660 = vmatpush3.msra.mxu0 %v6062_v14 }
0x1a5e   : > { %7661 = vmatprep.subr.mxu0 %v6061_v15 }
0x1a5f   : > { %7662 = vmatpush3.msra.mxu0 %v6061_v15 }
0x1a60   : > { %7663 = vmatprep.subr.mxu0 %v6060_v16 }
0x1a61   : > { %7664 = vmatpush3.msra.mxu0 %v6060_v16 }
0x1a62   : > { %7665 = vmatprep.subr.mxu0 %v6059_v17 }
0x1a63   : > { %7666 = vmatpush3.msra.mxu0 %v6059_v17 }
0x1a64   : > { %7667 = vmatprep.subr.mxu0 %v6058_v18 }
0x1a65   : > { %7668 = vmatpush3.msra.mxu0 %v6058_v18 }
0x1a66   : > { %7669 = vmatprep.subr.mxu0 %v6057_v19 }
0x1a67   : > { %7670 = vmatpush3.msra.mxu0 %v6057_v19 }
0x1a68   : > { %7671 = vmatprep.subr.mxu0 %v6056_v20 }
0x1a69   : > { %7672 = vmatpush3.msra.mxu0 %v6056_v20 }
0x1a6a   : > { %7673 = vmatprep.subr.mxu0 %v6055_v21 }
0x1a6b   : > { %7674 = vmatpush3.msra.mxu0 %v6055_v21 }
0x1a6c   : > { %7675 = vmatprep.subr.mxu0 %v6054_v22 }
0x1a6d   : > { %7676 = vmatpush3.msra.mxu0 %v6054_v22 }
0x1a6e   : > { %7677 = vmatprep.subr.mxu0 %v6053_v23 }
0x1a6f   : > { %7678 = vmatpush3.msra.mxu0 %v6053_v23 }
0x1a70   : > { %7679 = vmatprep.subr.mxu0 %v6052_v24 }
0x1a71   : > { %7680 = vmatpush3.msra.mxu0 %v6052_v24 }
0x1a72   : > { %7681 = vmatprep.subr.mxu0 %v6051_v26 }
0x1a73   : > { %7682 = vmatpush3.msra.mxu0 %v6051_v26 }
0x1a74   : > { %7684 = vmatmul.mubr.f32.vlgmr.msra.gmra.mxu0 %v9354_v58  ;;  %7721 = vmatprep.subr.mxu0 %v6098_v27 }
0x1a75   : > { %7722 = vmatpush3.msra.mxu0 %v6098_v27  ;;  %7753 = vmatprep.mubr.f32.mxu0 %v9349_v25 }
0x1a76   : > { %7723 = vmatprep.subr.mxu0 %v6097_v28 }
0x1a77   : > { %7724 = vmatpush3.msra.mxu0 %v6097_v28 }
0x1a78   : > { %7725 = vmatprep.subr.mxu0 %v6096_v30 }
0x1a79   : > { %7726 = vmatpush3.msra.mxu0 %v6096_v30  ;;  %v6108_v30 = vld [vmem:[%s10267_s6 + $0xd8] sm:$0xff] }
0x1a7a   : > { %7727 = vmatprep.subr.mxu0 %v6095_v2 }
0x1a7b   : > { %7728 = vmatpush3.msra.mxu0 %v6095_v2 }
0x1a7c   : > { %7729 = vmatprep.subr.mxu0 %v6094_v32 }
0x1a7d   : > { %7730 = vmatpush3.msra.mxu0 %v6094_v32 }
0x1a7e   : > { %7731 = vmatprep.subr.mxu0 %v6093_v1 }
0x1a7f   : > { %7732 = vmatpush3.msra.mxu0 %v6093_v1 }
0x1a80   : > { %7733 = vmatprep.subr.mxu0 %v6092_v33 }
0x1a81   : > { %7734 = vmatpush3.msra.mxu0 %v6092_v33 }
0x1a82   : > { %7735 = vmatprep.subr.mxu0 %v6091_v34 }
0x1a83   : > { %7736 = vmatpush3.msra.mxu0 %v6091_v34 }
0x1a84   : > { %7737 = vmatprep.subr.mxu0 %v6090_v37 }
0x1a85   : > { %7738 = vmatpush3.msra.mxu0 %v6090_v37 }
0x1a86   : > { %7739 = vmatprep.subr.mxu0 %v6089_v38 }
0x1a87   : > { %7740 = vmatpush3.msra.mxu0 %v6089_v38  ;;  %v6107_v38 = vld [vmem:[%s10267_s6 + $0xd0] sm:$0xff] }
0x1a88   : > { %7741 = vmatprep.subr.mxu0 %v6088_v39 }
0x1a89   : > { %7742 = vmatpush3.msra.mxu0 %v6088_v39  ;;  %v6106_v39 = vld [vmem:[%s10267_s6 + $0xc8] sm:$0xff] }
0x1a8a   : > { %7743 = vmatprep.subr.mxu0 %v6087_v40 }
0x1a8b   : > { %7744 = vmatpush3.msra.mxu0 %v6087_v40  ;;  %v6105_v40 = vld [vmem:[%s10267_s6 + $0xc0] sm:$0xff] }
0x1a8c   : > { %7745 = vmatprep.subr.mxu0 %v6086_v41 }
0x1a8d   : > { %7746 = vmatpush3.msra.mxu0 %v6086_v41  ;;  %v6126_v41 = vld [vmem:[%s10264_s3 + $0x3f8] sm:$0xff] }
0x1a8e   : > { %7747 = vmatprep.subr.mxu0 %v6085_v42 }
0x1a8f   : > { %7748 = vmatpush3.msra.mxu0 %v6085_v42 }
0x1a90   : > { %7749 = vmatprep.subr.mxu0 %v6084_v43 }
0x1a91   : > { %7750 = vmatpush3.msra.mxu0 %v6084_v43 }
0x1a92   : > { %7751 = vmatprep.subr.mxu0 %v6083_v44 }
0x1a93   : > { %7752 = vmatpush3.msra.mxu0 %v6083_v44  ;;  %v6125_v44 = vld [vmem:[%s10264_s3 + $0x3f0] sm:$0xff] }
0x1a94   : > { %7754 = vmatmul.mubr.f32.vlgmr.msra.gmra.mxu0 %v9354_v58  ;;  %7816 = vmatprep.subr.mxu0 %v6142_v45 }
0x1a95   : > { %7817 = vmatpush3.msra.mxu0 %v6142_v45  ;;  %7848 = vmatprep.mubr.f32.mxu0 %v9349_v25  ;;  %v6124_v45 = vld [vmem:[%s10264_s3 + $0x3e8] sm:$0xff] }
0x1a96   : > { %7818 = vmatprep.subr.mxu0 %v6141_v46 }
0x1a97   : > { %7819 = vmatpush3.msra.mxu0 %v6141_v46  ;;  %v6123_v46 = vld [vmem:[%s10264_s3 + $0x3e0] sm:$0xff] }
0x1a98   : > { %7820 = vmatprep.subr.mxu0 %v6140_v47 }
0x1a99   : > { %7821 = vmatpush3.msra.mxu0 %v6140_v47  ;;  %v6122_v47 = vld [vmem:[%s10264_s3 + $0x3d8] sm:$0xff] }
0x1a9a   : > { %7822 = vmatprep.subr.mxu0 %v6139_v48 }
0x1a9b   : > { %7823 = vmatpush3.msra.mxu0 %v6139_v48  ;;  %v6121_v48 = vld [vmem:[%s10264_s3 + $0x3d0] sm:$0xff] }
0x1a9c   : > { %7824 = vmatprep.subr.mxu0 %v6138_v49 }
0x1a9d   : > { %7825 = vmatpush3.msra.mxu0 %v6138_v49  ;;  %v6120_v49 = vld [vmem:[%s10264_s3 + $0x3c8] sm:$0xff] }
0x1a9e   : > { %7826 = vmatprep.subr.mxu0 %v6137_v50 }
0x1a9f   : > { %7827 = vmatpush3.msra.mxu0 %v6137_v50  ;;  %v6119_v50 = vld [vmem:[%s10264_s3 + $0x3c0] sm:$0xff] }
0x1aa0   : > { %7828 = vmatprep.subr.mxu0 %v6136_v51 }
0x1aa1   : > { %7829 = vmatpush3.msra.mxu0 %v6136_v51  ;;  %v6118_v51 = vld [vmem:[%s10264_s3 + $0x3b8] sm:$0xff] }
0x1aa2   : > { %7830 = vmatprep.subr.mxu0 %v6135_v54 }
0x1aa3   : > { %7831 = vmatpush3.msra.mxu0 %v6135_v54  ;;  %v6117_v54 = vld [vmem:[%s10264_s3 + $0x3b0] sm:$0xff] }
0x1aa4   : > { %7832 = vmatprep.subr.mxu0 %v6134_v56 }
0x1aa5   : > { %7833 = vmatpush3.msra.mxu0 %v6134_v56  ;;  %v6116_v56 = vld [vmem:[%s10264_s3 + $0x3a8] sm:$0xff] }
0x1aa6   : > { %7834 = vmatprep.subr.mxu0 %v6133_v57 }
0x1aa7   : > { %7835 = vmatpush3.msra.mxu0 %v6133_v57  ;;  %v6115_v57 = vld [vmem:[%s10264_s3 + $0x3a0] sm:$0xff] }
0x1aa8   : > { %7836 = vmatprep.subr.mxu0 %v6132_v59 }
0x1aa9   : > { %7837 = vmatpush3.msra.mxu0 %v6132_v59  ;;  %v6114_v59 = vld [vmem:[%s10264_s3 + $0x398] sm:$0xff] }
0x1aaa   : > { %7838 = vmatprep.subr.mxu0 %v6131_v60 }
0x1aab   : > { %7839 = vmatpush3.msra.mxu0 %v6131_v60  ;;  %v6113_v60 = vld [vmem:[%s10264_s3 + $0x390] sm:$0xff] }
0x1aac   : > { %7840 = vmatprep.subr.mxu0 %v6130_v61 }
0x1aad   : > { %7841 = vmatpush3.msra.mxu0 %v6130_v61  ;;  %v6112_v61 = vld [vmem:[%s10264_s3 + $0x388] sm:$0xff] }
0x1aae   : > { %7842 = vmatprep.subr.mxu0 %v6129_v62 }
0x1aaf   : > { %7843 = vmatpush3.msra.mxu0 %v6129_v62  ;;  %v6111_v62 = vld [vmem:[%s10264_s3 + $0x380] sm:$0xff] }
0x1ab0   : > { %7844 = vmatprep.subr.mxu0 %v6128_v63 }
0x1ab1   : > { %7845 = vmatpush3.msra.mxu0 %v6128_v63  ;;  %v6158_v63 = vld [vmem:[%s10266_s5 + $0x3f8] sm:$0xff] }
0x1ab2   : > { %7846 = vmatprep.subr.mxu0 %v6127_v0 }
0x1ab3   : > { %7847 = vmatpush3.msra.mxu0 %v6127_v0  ;;  %v6157_v0 = vld [vmem:[%s10266_s5 + $0x3f0] sm:$0xff] }
0x1ab4   : > { %7849 = vmatmul.mubr.f32.vlgmr.msra.gmra.mxu0 %v9354_v58 }
0x1b14   : > { %v9815_v3 = vpop.f32.mrf.mxu0 }
0x1b16   : > { %v9817_v4 = vpop.f32.mrf.mxu0 }
0x1b34   : > { %v7685_v5 = vpop.f32.mrf.mxu0 }
0x1b36   : > { %v4286_v6 = vpop.f32.mrf.mxu0 }
0x1b37   : > { %7760 = vmatprep.mubr.msk.f32.mxu1 %vm782_vm0, %v4286_v6  ;;  %v6155_v6 = vld [vmem:[%s10266_s5 + $0x3e0] sm:$0xff] }
0x1b38   : > { %7761 = vmatmul.mubr.msk.f32.vlgmr.msra.gmra.mxu1 %vm782_vm0, %v7685_v5  ;;  %v6156_v5 = vld [vmem:[%s10266_s5 + $0x3e8] sm:$0xff] }
0x1b54   : > { %v7755_v55 = vpop.f32.mrf.mxu0 }
0x1b55   : > { %7763 = vmatprep.subr.mxu1 %v7755_v55 }
0x1b56   : > { %v4470_v7 = vpop.f32.mrf.mxu0  ;;  %7764 = vmatpush3.msra.mxu1 %v7755_v55  ;;  %v6154_v55 = vld [vmem:[%s10266_s5 + $0x3d8] sm:$0xff] }
0x1b57   : > { %7765 = vmatprep.subr.mxu1 %v4470_v7 }
0x1b58   : > { %7766 = vmatpush3.msra.mxu1 %v4470_v7  ;;  %v6152_v7 = vld [vmem:[%s10266_s5 + $0x3c8] sm:$0xff] }
0x1b59   : > { %7770 = vmatprep.subr.mxu1 %v6108_v30 }
0x1b74   : > { %v7850_v8 = vpop.f32.mrf.mxu0 }
0x1b75   : > { %7886 = vmatprep.subr.msk.mxu0 %vm782_vm0, %v7850_v8 }
0x1b76   : > { %v4934_v9 = vpop.f32.mrf.mxu0  ;;  %7887 = vmatpush3.xpose.msk.msra.mxu0 %vm782_vm0, %v7850_v8  ;;  %v6151_v8 = vld [vmem:[%s10266_s5 + $0x3c0] sm:$0xff] }
0x1b77   : > { %7888 = vmatprep.subr.msk.mxu0 %vm782_vm0, %v4934_v9 }
0x1b7a   : > { %7889 = vmatpush3.xpose.msk.msra.mxu0 %vm782_vm0, %v4934_v9  ;;  %v6150_v9 = vld [vmem:[%s10266_s5 + $0x3b8] sm:$0xff] }
0x1bf8   : > { %v7762_v12 = vpop.f32.mrf.mxu1 }
0x1bf9   : > { %v4567_v13 = vmul.f32 0.17677669, %v7762_v12  ;;  %v6149_v12 = vld [vmem:[%s10266_s5 + $0x3b0] sm:$0xff] }
0x1bfa   : > { %v4557_v14 = vpop.f32.mrf.mxu1 }
0x1bfb   : > { %v4566_v15 = vmul.f32 0.17677669, %v4557_v14  ;;  %v4571_v16 = vsel %vm872_vm1, %v4567_v13, -inf  ;;  %v6147_v14 = vld [vmem:[%s10266_s5 + $0x3a0] sm:$0xff] }
0x1bfc   : > { %4572 = vmax.xlane.f32.xlu1 %v4571_v16  ;;  %v6145_v16 = vld [vmem:[%s10266_s5 + $0x390] sm:$0xff] }
0x1bfd   : > { %v4568_v17 = vsel %vm872_vm1, %v4566_v15, -inf }
0x1bfe   : > { %4569 = vmax.xlane.f32.xlu0 %v4568_v17  ;;  %v6144_v17 = vld [vmem:[%s10266_s5 + $0x388] sm:$0xff] }
0x1c85   : > { %v4573_v18 = vpop.xlane.xlu1 %4572 }
0x1c86   : > { %v4575_v19 = vsub.f32 %v4567_v13, %v4573_v18  ;;  %v6148_v13 = vld [vmem:[%s10266_s5 + $0x3a8] sm:$0xff]  ;;  %v6143_v18 = vld [vmem:[%s10266_s5 + $0x380] sm:$0xff] }
0x1c87   : > { %v4570_v20 = vpop.xlane.xlu0 %4569 }
0x1c88   : > { %v4578_v21 = vmul.f32 1.442695, %v4575_v19  ;;  %v4574_v22 = vsub.f32 %v4566_v15, %v4570_v20  ;;  %v6146_v15 = vld [vmem:[%s10266_s5 + $0x398] sm:$0xff]  ;;  %v4200_v19 = vadd.f32 %v9637_v35, %v9815_v3 }
0x1c8a   : > { %8021 = vpow2.f32 %v4578_v21  ;;  %v4576_v23 = vmul.f32 1.442695, %v4574_v22  ;;  %v4195_v21 = vadd.f32 %v9639_v36, %v9817_v4 }
0x1c8c   : > { %8023 = vpow2.f32 %v4576_v23 }
0x1c97   : > { %v8022_v24 = vpop.eup %8021 }
0x1c98   : > { %v4583_v26 = vsel %vm872_vm1, %v8022_v24, 0.0 }
0x1c99   : > { %v8024_v27 = vpop.eup %8023  ;;  %4584 = vadd.xlane.f32.xlu1 %v4583_v26 }
0x1c9a   : > { %v4580_v28 = vsel %vm872_vm1, %v8024_v27, 0.0 }
0x1c9b   : > { %4581 = vadd.xlane.f32.xlu0 %v4580_v28 }
0x1d22   : > { %v4585_v2 = vpop.xlane.xlu1 %4584 }
0x1d23   : > { %8025 = vrcp.f32 %v4585_v2 }
0x1d24   : > { %v4582_v32 = vpop.xlane.xlu0 %4581 }
0x1d25   : > { %8027 = vrcp.f32 %v4582_v32 }
0x1d30   : > { %v8026_v1 = vpop.eup %8025 }
0x1d31   : > { %v4589_v37 = vmul.f32 %v8026_v1, %v8022_v24 }
0x1d32   : > { %v8028_v33 = vpop.eup %8027 }
0x1d33   : > { %v4588_v34 = vmul.f32 %v8028_v33, %v8024_v27 }
0x1d35   : > { %7767 = vmatprep.mubr.msk.f32.mxu1 %vm872_vm1, %v4588_v34 }
0x1d36   : > { %7768 = vmatmul.mubr.msk.f32.vlgmr.msra.gmra.mxu1 %vm872_vm1, %v4589_v37 }
0x1d37   : > { %7771 = vmatpush3.msra.mxu1 %v6108_v30 }
0x1d38   : > { %7772 = vmatprep.subr.mxu1 %v6107_v38 }
0x1d39   : > { %7773 = vmatpush3.msra.mxu1 %v6107_v38 }
0x1d3a   : > { %7774 = vmatprep.subr.mxu1 %v6106_v39 }
0x1d3b   : > { %7775 = vmatpush3.msra.mxu1 %v6106_v39 }
0x1d3c   : > { %7776 = vmatprep.subr.mxu1 %v6105_v40 }
0x1d3d   : > { %7777 = vmatpush3.msra.mxu1 %v6105_v40 }
0x1d3e   : > { %7781 = vmatprep.subr.mxu1 %v6126_v41 }
0x1df6   : > { %v7769_v42 = vpop.f32.mrf.mxu1 }
0x1df8   : > { %v4662_v43 = vpop.f32.mrf.mxu1 }
0x1df9   : > { %7778 = vmatprep.mubr.msk.f32.mxu1 %vm782_vm0, %v4662_v43  ;;  %v6168_v43 = vld [vmem:[%s10267_s6 + $0xf8] sm:$0xff] }
0x1dfa   : > { %7779 = vmatmul.mubr.msk.f32.vlgmr.msra.gmra.mxu1 %vm782_vm0, %v7769_v42 }
0x1dfb   : > { %7782 = vmatpush3.msra.mxu1 %v6126_v41  ;;  %7813 = vmatprep.mubr.f32.mxu1 %v9349_v25 }
0x1dfc   : > { %7783 = vmatprep.subr.mxu1 %v6125_v44 }
0x1dfd   : > { %7784 = vmatpush3.msra.mxu1 %v6125_v44 }
0x1dfe   : > { %7785 = vmatprep.subr.mxu1 %v6124_v45 }
0x1dff   : > { %7786 = vmatpush3.msra.mxu1 %v6124_v45 }
0x1e00   : > { %7787 = vmatprep.subr.mxu1 %v6123_v46 }
0x1e01   : > { %7788 = vmatpush3.msra.mxu1 %v6123_v46 }
0x1e02   : > { %7789 = vmatprep.subr.mxu1 %v6122_v47 }
0x1e03   : > { %7790 = vmatpush3.msra.mxu1 %v6122_v47 }
0x1e04   : > { %7791 = vmatprep.subr.mxu1 %v6121_v48 }
0x1e05   : > { %7792 = vmatpush3.msra.mxu1 %v6121_v48 }
0x1e06   : > { %7793 = vmatprep.subr.mxu1 %v6120_v49 }
0x1e07   : > { %7794 = vmatpush3.msra.mxu1 %v6120_v49 }
0x1e08   : > { %7795 = vmatprep.subr.mxu1 %v6119_v50 }
0x1e09   : > { %7796 = vmatpush3.msra.mxu1 %v6119_v50  ;;  %v6167_v50 = vld [vmem:[%s10267_s6 + $0xf0] sm:$0xff] }
0x1e0a   : > { %7797 = vmatprep.subr.mxu1 %v6118_v51 }
0x1e0b   : > { %7798 = vmatpush3.msra.mxu1 %v6118_v51  ;;  %v6166_v51 = vld [vmem:[%s10267_s6 + $0xe8] sm:$0xff] }
0x1e0c   : > { %7799 = vmatprep.subr.mxu1 %v6117_v54 }
0x1e0d   : > { %7800 = vmatpush3.msra.mxu1 %v6117_v54  ;;  %v6165_v54 = vld [vmem:[%s10267_s6 + $0xe0] sm:$0xff] }
0x1e0e   : > { %7801 = vmatprep.subr.mxu1 %v6116_v56 }
0x1e0f   : > { %7802 = vmatpush3.msra.mxu1 %v6116_v56 }
0x1e10   : > { %7803 = vmatprep.subr.mxu1 %v6115_v57 }
0x1e11   : > { %7804 = vmatpush3.msra.mxu1 %v6115_v57 }
0x1e12   : > { %7805 = vmatprep.subr.mxu1 %v6114_v59 }
0x1e13   : > { %7806 = vmatpush3.msra.mxu1 %v6114_v59 }
0x1e14   : > { %7807 = vmatprep.subr.mxu1 %v6113_v60 }
0x1e15   : > { %7808 = vmatpush3.msra.mxu1 %v6113_v60 }
0x1e16   : > { %7809 = vmatprep.subr.mxu1 %v6112_v61 }
0x1e17   : > { %7810 = vmatpush3.msra.mxu1 %v6112_v61 }
0x1e18   : > { %7811 = vmatprep.subr.mxu1 %v6111_v62 }
0x1e19   : > { %7812 = vmatpush3.msra.mxu1 %v6111_v62  ;;  %v6172_v62 = vld [vmem:[%s10268_s7 + $0x1] ss:$0 sm:$0xff] }
0x1e1a   : > { %7814 = vmatmul.mubr.f32.vlgmr.msra.gmra.mxu1 %v9354_v58  ;;  %7851 = vmatprep.subr.mxu1 %v6158_v63 }
0x1e1b   : > { %7852 = vmatpush3.msra.mxu1 %v6158_v63  ;;  %7883 = vmatprep.mubr.f32.mxu1 %v9349_v25  ;;  %v6153_v25 = vld [vmem:[%s10266_s5 + $0x3d0] sm:$0xff] }
0x1e1c   : > { %7853 = vmatprep.subr.mxu1 %v6157_v0 }
0x1e1d   : > { %7854 = vmatpush3.msra.mxu1 %v6157_v0 }
0x1e1e   : > { %7855 = vmatprep.subr.mxu1 %v6156_v5 }
0x1e1f   : > { %7856 = vmatpush3.msra.mxu1 %v6156_v5 }
0x1e20   : > { %7857 = vmatprep.subr.mxu1 %v6155_v6 }
0x1e21   : > { %7858 = vmatpush3.msra.mxu1 %v6155_v6 }
0x1e22   : > { %7859 = vmatprep.subr.mxu1 %v6154_v55 }
0x1e23   : > { %7860 = vmatpush3.msra.mxu1 %v6154_v55 }
0x1e24   : > { %7861 = vmatprep.subr.mxu1 %v6153_v25 }
0x1e25   : > { %7862 = vmatpush3.msra.mxu1 %v6153_v25  ;;  %v6208_v25 = vld [vmem:[%s10271_s10 + $0x1f8] sm:$0xff] }
0x1e26   : > { %7863 = vmatprep.subr.mxu1 %v6152_v7 }
0x1e27   : > { %7864 = vmatpush3.msra.mxu1 %v6152_v7  ;;  %v6205_v7 = vld [vmem:[%s10271_s10 + $0x1e0] sm:$0xff] }
0x1e28   : > { %7865 = vmatprep.subr.mxu1 %v6151_v8 }
0x1e29   : > { %7866 = vmatpush3.msra.mxu1 %v6151_v8  ;;  %v6204_v8 = vld [vmem:[%s10271_s10 + $0x1d8] sm:$0xff] }
0x1e2a   : > { %7867 = vmatprep.subr.mxu1 %v6150_v9 }
0x1e2b   : > { %7868 = vmatpush3.msra.mxu1 %v6150_v9  ;;  %v6203_v9 = vld [vmem:[%s10271_s10 + $0x1d0] sm:$0xff] }
0x1e2c   : > { %7869 = vmatprep.subr.mxu1 %v6149_v12 }
0x1e2d   : > { %7870 = vmatpush3.msra.mxu1 %v6149_v12 }
0x1e2e   : > { %7871 = vmatprep.subr.mxu1 %v6148_v13 }
0x1e2f   : > { %7872 = vmatpush3.msra.mxu1 %v6148_v13 }
0x1e30   : > { %7873 = vmatprep.subr.mxu1 %v6147_v14 }
0x1e31   : > { %7874 = vmatpush3.msra.mxu1 %v6147_v14 }
0x1e32   : > { %7875 = vmatprep.subr.mxu1 %v6146_v15 }
0x1e33   : > { %7876 = vmatpush3.msra.mxu1 %v6146_v15 }
0x1e34   : > { %7877 = vmatprep.subr.mxu1 %v6145_v16 }
0x1e35   : > { %7878 = vmatpush3.msra.mxu1 %v6145_v16 }
0x1e36   : > { %7879 = vmatprep.subr.mxu1 %v6144_v17 }
0x1e37   : > { %7880 = vmatpush3.msra.mxu1 %v6144_v17 }
0x1e38   : > { %7881 = vmatprep.subr.mxu1 %v6143_v18 }
0x1e39   : > { %7882 = vmatpush3.msra.mxu1 %v6143_v18 }
0x1e3a   : > { %7884 = vmatmul.mubr.f32.vlgmr.msra.gmra.mxu1 %v9354_v58 }
0x1eba   : > { %v7780_v20 = vpop.f32.mrf.mxu1 }
0x1ebb   : > { %v9949_v22 = vadd.f32 %v7780_v20, %v4200_v19  ;;  %v6202_v20 = vld [vmem:[%s10271_s10 + $0x1c8] sm:$0xff] }
0x1ebc   : > { %v4748_v23 = vpop.f32.mrf.mxu1 }
0x1ebd   : > { %v9951_v24 = vadd.f32 %v4748_v23, %v4195_v21  ;;  %v6201_v21 = vld [vmem:[%s10271_s10 + $0x1c0] sm:$0xff]  ;;  %v6199_v23 = vld [vmem:[%s10271_s10 + $0x1b0] sm:$0xff] }
0x1eda   : > { %v7815_v26 = vpop.f32.mrf.mxu1 }
0x1edc   : > { %v4842_v27 = vpop.f32.mrf.mxu1 }
0x1edd   : > { %7890 = vmatprep.mubr.msk.f32.mxu0 %vm782_vm0, %v4842_v27  ;;  %v6196_v27 = vld [vmem:[%s10271_s10 + $0x198] sm:$0xff] }
0x1ede   : > { %7891 = vmatmul.mubr.msk.f32.vlgmr.msra.gmra.mxu0 %vm782_vm0, %v7815_v26  ;;  %v6197_v26 = vld [vmem:[%s10271_s10 + $0x1a0] sm:$0xff] }
0x1efa   : > { %v7885_v28 = vpop.f32.mrf.mxu1 }
0x1efb   : > { %7893 = vmatprep.subr.mxu0 %v7885_v28 }
0x1efc   : > { %v5026_v58 = vpop.f32.mrf.mxu1  ;;  %7894 = vmatpush3.msra.mxu0 %v7885_v28  ;;  %v6195_v28 = vld [vmem:[%s10271_s10 + $0x190] sm:$0xff] }
0x1efd   : > { %7895 = vmatprep.subr.mxu0 %v5026_v58 }
0x1efe   : > { %7896 = vmatpush3.msra.mxu0 %v5026_v58  ;;  %v6194_v58 = vld [vmem:[%s10271_s10 + $0x188] sm:$0xff] }
0x1eff   : > { %7900 = vmatprep.subr.mxu0 %v6168_v43 }
0x1f9e   : > { %v7892_v35 = vpop.f32.mrf.mxu0 }
0x1f9f   : > { %v5123_v3 = vmul.f32 0.17677669, %v7892_v35  ;;  %v6193_v35 = vld [vmem:[%s10271_s10 + $0x180] sm:$0xff] }
0x1fa0   : > { %v5113_v36 = vpop.f32.mrf.mxu0 }
0x1fa1   : > { %v5122_v4 = vmul.f32 0.17677669, %v5113_v36  ;;  %v5127_v30 = vsel %vm872_vm1, %v5123_v3, -inf  ;;  %v6191_v36 = vld [vmem:[%s10271_s10 + $0x170] sm:$0xff] }
0x1fa2   : > { %5128 = vmax.xlane.f32.xlu1 %v5127_v30  ;;  %v6189_v30 = vld [vmem:[%s10271_s10 + $0x160] sm:$0xff] }
0x1fa3   : > { %v5124_v2 = vsel %vm872_vm1, %v5122_v4, -inf }
0x1fa4   : > { %5125 = vmax.xlane.f32.xlu0 %v5124_v2  ;;  %v6188_v2 = vld [vmem:[%s10271_s10 + $0x158] sm:$0xff] }
0x202b   : > { %v5129_v32 = vpop.xlane.xlu1 %5128 }
0x202c   : > { %v5131_v1 = vsub.f32 %v5123_v3, %v5129_v32  ;;  %v6192_v3 = vld [vmem:[%s10271_s10 + $0x178] sm:$0xff]  ;;  %v6187_v32 = vld [vmem:[%s10271_s10 + $0x150] sm:$0xff] }
0x202d   : > { %v5126_v33 = vpop.xlane.xlu0 %5125 }
0x202e   : > { %v5134_v34 = vmul.f32 1.442695, %v5131_v1  ;;  %v5130_v37 = vsub.f32 %v5122_v4, %v5126_v33  ;;  %v6190_v4 = vld [vmem:[%s10271_s10 + $0x168] sm:$0xff]  ;;  %v6185_v33 = vld [vmem:[%s10271_s10 + $0x140] sm:$0xff] }
0x202f   : > { %v6186_v1 = vld [vmem:[%s10271_s10 + $0x148] sm:$0xff] }
0x2030   : > { %8029 = vpow2.f32 %v5134_v34  ;;  %v5132_v38 = vmul.f32 1.442695, %v5130_v37  ;;  %v6184_v34 = vld [vmem:[%s10271_s10 + $0x138] sm:$0xff]  ;;  %v6183_v37 = vld [vmem:[%s10271_s10 + $0x130] sm:$0xff] }
0x2032   : > { %8031 = vpow2.f32 %v5132_v38  ;;  %v6182_v38 = vld [vmem:[%s10271_s10 + $0x128] sm:$0xff] }
0x203d   : > { %v8030_v39 = vpop.eup %8029 }
0x203e   : > { %v5139_v40 = vsel %vm872_vm1, %v8030_v39, 0.0 }
0x203f   : > { %v8032_v41 = vpop.eup %8031  ;;  %5140 = vadd.xlane.f32.xlu1 %v5139_v40  ;;  %v6180_v40 = vld [vmem:[%s10271_s10 + $0x118] sm:$0xff] }
0x2040   : > { %v5136_v42 = vsel %vm872_vm1, %v8032_v41, 0.0 }
0x2041   : > { %5137 = vadd.xlane.f32.xlu0 %v5136_v42  ;;  %v6178_v42 = vld [vmem:[%s10271_s10 + $0x108] sm:$0xff] }
0x20c8   : > { %v5141_v44 = vpop.xlane.xlu1 %5140 }
0x20c9   : > { %8033 = vrcp.f32 %v5141_v44 }
0x20ca   : > { %v5138_v45 = vpop.xlane.xlu0 %5137 }
0x20cb   : > { %8035 = vrcp.f32 %v5138_v45 }
0x20d6   : > { %v8034_v46 = vpop.eup %8033 }
0x20d7   : > { %v5145_v49 = vmul.f32 %v8034_v46, %v8030_v39  ;;  %v6181_v39 = vld [vmem:[%s10271_s10 + $0x120] sm:$0xff] }
0x20d8   : > { %v8036_v47 = vpop.eup %8035 }
0x20d9   : > { %v5144_v48 = vmul.f32 %v8036_v47, %v8032_v41  ;;  %v6179_v41 = vld [vmem:[%s10271_s10 + $0x110] sm:$0xff] }
0x20db   : > { %7897 = vmatprep.mubr.msk.f32.mxu0 %vm872_vm1, %v5144_v48 }
0x20dc   : > { %7898 = vmatmul.mubr.msk.f32.vlgmr.msra.gmra.mxu0 %vm872_vm1, %v5145_v49 }
0x20dd   : > { %7901 = vmatpush3.msra.mxu0 %v6168_v43  ;;  %v6177_v43 = vld [vmem:[%s10271_s10 + $0x100] sm:$0xff] }
0x20de   : > { %7902 = vmatprep.subr.mxu0 %v6167_v50 }
0x20df   : > { %7903 = vmatpush3.msra.mxu0 %v6167_v50 }
0x20e0   : > { %7904 = vmatprep.subr.mxu0 %v6166_v51 }
0x20e1   : > { %7905 = vmatpush3.msra.mxu0 %v6166_v51 }
0x20e2   : > { %7906 = vmatprep.subr.mxu0 %v6165_v54 }
0x20e3   : > { %7907 = vmatpush3.msra.mxu0 %v6165_v54 }
0x20e4   : > { %5415 = vmatprep.subr.mxu0 %v6208_v25  ;;  %v6240_v25 = vld [vmem:[%s10273_s12 + $0x1f0] sm:$0xff] }
0x219c   : > { %v7899_v56 = vpop.f32.mrf.mxu0 }
0x219e   : > { %v5218_v57 = vpop.f32.mrf.mxu0 }
0x219f   : > { %7908 = vmatprep.mubr.msk.f32.mxu0 %vm782_vm0, %v5218_v57  ;;  %v6175_v57 = vld [vmem:[%s10269_s8 + $0x1] ss:$0 sm:$0xff] }
0x21a0   : > { %7909 = vmatmul.mubr.msk.f32.vlgmr.msra.gmra.mxu0 %vm782_vm0, %v7899_v56 }
0x21a1   : > { %5479 = vmatprep.mubr.f32.mxu0 %v8113_v52 }
0x2260   : > { %v7910_v59 = vpop.f32.mrf.mxu0 }
0x2261   : > { %v5314_v60 = vadd.f32 %v7910_v59, %v9949_v22  ;;  %v6200_v22 = vld [vmem:[%s10271_s10 + $0x1b8] sm:$0xff] }
0x2262   : > { %v5304_v61 = vpop.f32.mrf.mxu0 }
0x2263   : > { %v5316_v63 = vadd.f32 %v5314_v60, %v9230_v53  ;;  %v5313_v0 = vadd.f32 %v5304_v61, %v9951_v24  ;;  %v6207_v53 = vld [vmem:[%s10271_s10 + $0x1f0] sm:$0xff]  ;;  %v6198_v24 = vld [vmem:[%s10271_s10 + $0x1a8] sm:$0xff]  ;;  %v6176_v60 = vld [vmem:[%s10270_s9 + $0x1] ss:$0 sm:$0xff] }
0x2264   : > { %5416 = vmatpush1.msra.mxu0 %v6207_v53  ;;  %v6239_v53 = vld [vmem:[%s10273_s12 + $0x1e8] sm:$0xff] }
0x2265   : > { %v5315_v5 = vadd.f32 %v5313_v0, %v9226_v10  ;;  %v9983_v6 = vadd.f32 %v6172_v62, %v5316_v63  ;;  %v6206_v10 = vld [vmem:[%s10271_s10 + $0x1e8] sm:$0xff]  ;;  %v6241_v0 = vld [vmem:[%s10273_s12 + $0x1f8] sm:$0xff] }
0x2266   : > { %5417 = vmatprep.subr.mxu0 %v6206_v10  ;;  %6833 = vmatprep.subr.mxu1 %v6241_v0  ;;  %v6223_v10 = vld [vmem:[%s10273_s12 + $0x168] sm:$0xff] }
0x2267   : > { %5333 = vadd.xlane.f32.xlu1 %v9983_v6  ;;  %v9986_v55 = vadd.f32 %v6172_v62, %v5315_v5  ;;  %5418 = vmatpush1.msra.mxu0 %v6205_v7  ;;  %v6225_v5 = vld [vmem:[%s10273_s12 + $0x178] sm:$0xff]  ;;  %v6238_v7 = vld [vmem:[%s10273_s12 + $0x1e0] sm:$0xff] }
0x2268   : > { %5419 = vmatprep.subr.mxu0 %v6204_v8  ;;  %6834 = vmatpush3.msra.mxu1 %v6225_v5  ;;  %v6222_v8 = vld [vmem:[%s10273_s12 + $0x160] sm:$0xff] }
0x2269   : > { %5331 = vadd.xlane.f32.xlu0 %v9986_v55  ;;  %5420 = vmatpush1.msra.mxu0 %v6203_v9  ;;  %v6237_v9 = vld [vmem:[%s10273_s12 + $0x1d8] sm:$0xff] }
0x226a   : > { %5421 = vmatprep.subr.mxu0 %v6202_v20  ;;  %6835 = vmatprep.subr.mxu1 %v6240_v25  ;;  %v6217_v20 = vld [vmem:[%s10273_s12 + $0x138] sm:$0xff] }
0x226b   : > { %5422 = vmatpush1.msra.mxu0 %v6201_v21  ;;  %v6232_v21 = vld [vmem:[%s10273_s12 + $0x1b0] sm:$0xff] }
0x226c   : > { %5423 = vmatprep.subr.mxu0 %v6200_v22  ;;  %v6216_v22 = vld [vmem:[%s10273_s12 + $0x130] sm:$0xff] }
0x226d   : > { %5424 = vmatpush1.msra.mxu0 %v6199_v23  ;;  %v6231_v23 = vld [vmem:[%s10273_s12 + $0x1a8] sm:$0xff] }
0x226e   : > { %5425 = vmatprep.subr.mxu0 %v6198_v24  ;;  %v6215_v24 = vld [vmem:[%s10273_s12 + $0x128] sm:$0xff] }
0x226f   : > { %5426 = vmatpush1.msra.mxu0 %v6197_v26  ;;  %v6230_v26 = vld [vmem:[%s10273_s12 + $0x1a0] sm:$0xff] }
0x2270   : > { %5427 = vmatprep.subr.mxu0 %v6196_v27  ;;  %v6214_v27 = vld [vmem:[%s10273_s12 + $0x120] sm:$0xff] }
0x2271   : > { %5428 = vmatpush1.msra.mxu0 %v6195_v28  ;;  %v6229_v28 = vld [vmem:[%s10273_s12 + $0x198] sm:$0xff] }
0x2272   : > { %5429 = vmatprep.subr.mxu0 %v6194_v58  ;;  %v6213_v58 = vld [vmem:[%s10273_s12 + $0x118] sm:$0xff] }
0x2273   : > { %5430 = vmatpush1.msra.mxu0 %v6193_v35  ;;  %v6228_v35 = vld [vmem:[%s10273_s12 + $0x190] sm:$0xff] }
0x2274   : > { %5431 = vmatprep.subr.mxu0 %v6192_v3  ;;  %v6212_v3 = vld [vmem:[%s10273_s12 + $0x110] sm:$0xff] }
0x2275   : > { %5432 = vmatpush1.msra.mxu0 %v6191_v36  ;;  %v6227_v36 = vld [vmem:[%s10273_s12 + $0x188] sm:$0xff] }
0x2276   : > { %5433 = vmatprep.subr.mxu0 %v6190_v4  ;;  %v6211_v4 = vld [vmem:[%s10273_s12 + $0x108] sm:$0xff] }
0x2277   : > { %5434 = vmatpush1.msra.mxu0 %v6189_v30  ;;  %v6226_v30 = vld [vmem:[%s10273_s12 + $0x180] sm:$0xff] }
0x2278   : > { %5435 = vmatprep.subr.mxu0 %v6188_v2  ;;  %v6210_v2 = vld [vmem:[%s10273_s12 + $0x100] sm:$0xff] }
0x2279   : > { %5436 = vmatpush1.msra.mxu0 %v6187_v32  ;;  %v6209_v32 = vld [vmem:[%s10272_s11 + $0x2] sm:$0x3] }
0x227a   : > { %5437 = vmatprep.subr.mxu0 %v6186_v1  ;;  %v5408_v1 = vrot.slane %v6209_v32, %v2814_v29 }
0x227b   : > { %5438 = vmatpush1.msra.mxu0 %v6185_v33  ;;  %v5412_v33 = vrot.slane %v6209_v32, %v2818_v31 }
0x227c   : > { %5439 = vmatprep.subr.mxu0 %v6184_v34 }
0x227d   : > { %5440 = vmatpush1.msra.mxu0 %v6183_v37 }
0x227e   : > { %5441 = vmatprep.subr.mxu0 %v6182_v38 }
0x227f   : > { %5442 = vmatpush1.msra.mxu0 %v6181_v39 }
0x2280   : > { %5443 = vmatprep.subr.mxu0 %v6180_v40 }
0x2281   : > { %5444 = vmatpush1.msra.mxu0 %v6179_v41 }
0x2282   : > { %5445 = vmatprep.subr.mxu0 %v6178_v42 }
0x2283   : > { %5446 = vmatpush1.msra.mxu0 %v6177_v43 }
0x22f0   : > { %v5334_v12 = vpop.xlane.xlu1 %5333 }
0x22f1   : > { %v5336_v13 = vmul.f32 0.0078125, %v5334_v12  ;;  %v6221_v12 = vld [vmem:[%s10273_s12 + $0x158] sm:$0xff] }
0x22f2   : > { %v5332_v14 = vpop.xlane.xlu0 %5331 }
0x22f3   : > { %v10008_v15 = vsub.f32 %v9983_v6, %v5336_v13  ;;  %v5335_v16 = vmul.f32 0.0078125, %v5332_v14  ;;  %v6236_v13 = vld [vmem:[%s10273_s12 + $0x1d0] sm:$0xff] }
0x22f4   : > { %v6220_v14 = vld [vmem:[%s10273_s12 + $0x150] sm:$0xff] }
0x22f5   : > { %v10011_v17 = vsub.f32 %v9986_v55, %v5335_v16  ;;  %v5340_v18 = vmul.f32 %v10008_v15, %v10008_v15  ;;  %v6219_v16 = vld [vmem:[%s10273_s12 + $0x148] sm:$0xff] }
0x22f7   : > { %5343 = vadd.xlane.f32.xlu1 %v5340_v18  ;;  %v5339_v19 = vmul.f32 %v10011_v17, %v10011_v17  ;;  %v6218_v18 = vld [vmem:[%s10273_s12 + $0x140] sm:$0xff] }
0x22f9   : > { %5341 = vadd.xlane.f32.xlu0 %v5339_v19  ;;  %v6233_v19 = vld [vmem:[%s10273_s12 + $0x1b8] sm:$0xff] }
0x2380   : > { %v5344_v44 = vpop.xlane.xlu1 %5343 }
0x2381   : > { %v5346_v45 = vmul.f32 0.0078125, %v5344_v44 }
0x2382   : > { %v5342_v46 = vpop.xlane.xlu0 %5341 }
0x2383   : > { %v5348_v47 = vadd.f32 1e-05, %v5346_v45  ;;  %v5345_v48 = vmul.f32 0.0078125, %v5342_v46 }
0x2385   : > { %8037 = vrsqrt.f32 %v5348_v47  ;;  %v5347_v49 = vadd.f32 1e-05, %v5345_v48 }
0x2387   : > { %8039 = vrsqrt.f32 %v5347_v49 }
0x2392   : > { %v8038_v50 = vpop.eup %8037 }
0x2393   : > { %v5352_v56 = vmul.f32 %v8038_v50, %v10008_v15  ;;  %v6235_v15 = vld [vmem:[%s10273_s12 + $0x1c8] sm:$0xff] }
0x2394   : > { %v8040_v51 = vpop.eup %8039 }
0x2395   : > { %v5351_v54 = vmul.f32 %v8040_v51, %v10011_v17  ;;  %v5360_v62 = vmul.f32 %v6175_v57, %v5352_v56  ;;  %v6234_v17 = vld [vmem:[%s10273_s12 + $0x1c0] sm:$0xff] }
0x2397   : > { %v5359_v59 = vmul.f32 %v6175_v57, %v5351_v54  ;;  %v5368_v63 = vadd.f32 %v6176_v60, %v5360_v62 }
0x2399   : > { %v5367_v61 = vadd.f32 %v6176_v60, %v5359_v59 }
0x239b   : > { %5480 = vmatmul.mubr.f32.vlgmr.msra.gmra.mxu0 %v5367_v61 }
0x239c   : > { %5485 = vmatprep.mubr.f32.mxu0 %v8113_v52  ;;  %v6224_v52 = vld [vmem:[%s10273_s12 + $0x170] sm:$0xff] }
0x239d   : > { %6836 = vmatpush3.msra.mxu1 %v6224_v52 }
0x239e   : > { %6837 = vmatprep.subr.mxu1 %v6239_v53 }
0x239f   : > { %5486 = vmatmul.mubr.f32.gmra.mxu0 %v5368_v63  ;;  %6838 = vmatpush3.msra.mxu1 %v6223_v10 }
0x23a0   : > { %6839 = vmatprep.subr.mxu1 %v6238_v7 }
0x23a1   : > { %6840 = vmatpush3.msra.mxu1 %v6222_v8 }
0x23a2   : > { %6841 = vmatprep.subr.mxu1 %v6237_v9 }
0x23a3   : > { %6842 = vmatpush3.msra.mxu1 %v6221_v12 }
0x23a4   : > { %6843 = vmatprep.subr.mxu1 %v6236_v13 }
0x23a5   : > { %6844 = vmatpush3.msra.mxu1 %v6220_v14 }
0x23a6   : > { %6845 = vmatprep.subr.mxu1 %v6235_v15 }
0x23a7   : > { %6846 = vmatpush3.msra.mxu1 %v6219_v16 }
0x23a8   : > { %6847 = vmatprep.subr.mxu1 %v6234_v17 }
0x23a9   : > { %6848 = vmatpush3.msra.mxu1 %v6218_v18 }
0x23aa   : > { %6849 = vmatprep.subr.mxu1 %v6233_v19 }
0x23ab   : > { %6850 = vmatpush3.msra.mxu1 %v6217_v20 }
0x23ac   : > { %6851 = vmatprep.subr.mxu1 %v6232_v21 }
0x23ad   : > { %6852 = vmatpush3.msra.mxu1 %v6216_v22 }
0x23ae   : > { %6853 = vmatprep.subr.mxu1 %v6231_v23  ;;  %v6243_v23 = vld [vmem:[%s10274_s13 + $0x1] ss:$0 sm:$0xff] }
0x23af   : > { %6854 = vmatpush3.msra.mxu1 %v6215_v24 }
0x23b0   : > { %6855 = vmatprep.subr.mxu1 %v6230_v26 }
0x23b1   : > { %6856 = vmatpush3.msra.mxu1 %v6214_v27 }
0x23b2   : > { %6857 = vmatprep.subr.mxu1 %v6229_v28 }
0x23b3   : > { %6858 = vmatpush3.msra.mxu1 %v6213_v58 }
0x23b4   : > { %6859 = vmatprep.subr.mxu1 %v6228_v35 }
0x23b5   : > { %6860 = vmatpush3.msra.mxu1 %v6212_v3 }
0x23b6   : > { %6861 = vmatprep.subr.mxu1 %v6227_v36 }
0x23b7   : > { %6862 = vmatpush3.msra.mxu1 %v6211_v4 }
0x23b8   : > { %6863 = vmatprep.subr.mxu1 %v6226_v30 }
0x23b9   : > { %6864 = vmatpush3.msra.mxu1 %v6210_v2 }
0x245b   : > { %v5481_v34 = vpop.f32.mrf.mxu0 }
0x245c   : > { %v5482_v37 = vadd.f32 %v5481_v34, %v5408_v1 }
0x245d   : > { %v5483_v38 = vpop.f32.mrf.mxu0 }
0x245e   : > { %v5496_v39 = vmul.f32 0.044715, %v5482_v37  ;;  %v5484_v40 = vadd.f32 %v5483_v38, %v5412_v33  ;;  %v5492_v8 = vmul.f32 0.5, %v5482_v37 }
0x245f   : > { %v5487_v41 = vpop.f32.mrf.mxu0 }
0x2460   : > { %v5500_v42 = vmul.f32 %v5496_v39, %v5482_v37  ;;  %v5497_v43 = vmul.f32 0.044715, %v5484_v40  ;;  %v5488_v44 = vadd.f32 %v5487_v41, %v5408_v1  ;;  %v5493_v53 = vmul.f32 0.5, %v5484_v40 }
0x2461   : > { %v5489_v45 = vpop.f32.mrf.mxu0 }
0x2462   : > { %v5504_v46 = vmul.f32 %v5500_v42, %v5482_v37  ;;  %v5501_v47 = vmul.f32 %v5497_v43, %v5484_v40  ;;  %v5498_v48 = vmul.f32 0.044715, %v5488_v44  ;;  %v5490_v49 = vadd.f32 %v5489_v45, %v5412_v33 }
0x2463   : > { %v5494_v17 = vmul.f32 0.5, %v5488_v44 }
0x2464   : > { %v5508_v50 = vadd.f32 %v5504_v46, %v5482_v37  ;;  %v5502_v51 = vmul.f32 %v5498_v48, %v5488_v44  ;;  %v5499_v29 = vmul.f32 0.044715, %v5490_v49  ;;  %v5505_v54 = vmul.f32 %v5501_v47, %v5484_v40 }
0x2465   : > { %v5495_v15 = vmul.f32 0.5, %v5490_v49 }
0x2466   : > { %v5503_v11 = vmul.f32 %v5499_v29, %v5490_v49  ;;  %v5509_v31 = vadd.f32 %v5505_v54, %v5484_v40  ;;  %v5512_v56 = vmul.f32 0.7978846, %v5508_v50  ;;  %v5506_v57 = vmul.f32 %v5502_v51, %v5488_v44 }
0x2468   : > { %v5513_v59 = vmul.f32 0.7978846, %v5509_v31  ;;  %8041 = vtanh.f32 %v5512_v56  ;;  %v5507_v60 = vmul.f32 %v5503_v11, %v5490_v49  ;;  %v5510_v61 = vadd.f32 %v5506_v57, %v5488_v44 }
0x246a   : > { %8043 = vtanh.f32 %v5513_v59  ;;  %v5511_v62 = vadd.f32 %v5507_v60, %v5490_v49  ;;  %v5514_v63 = vmul.f32 0.7978846, %v5510_v61 }
0x246c   : > { %v5515_v0 = vmul.f32 0.7978846, %v5511_v62  ;;  %8045 = vtanh.f32 %v5514_v63 }
0x246e   : > { %8047 = vtanh.f32 %v5515_v0 }
0x2475   : > { %v8042_v5 = vpop.eup %8041 }
0x2476   : > { %v5520_v52 = vadd.f32 1.0, %v8042_v5 }
0x2477   : > { %v8044_v25 = vpop.eup %8043 }
0x2478   : > { %v5521_v10 = vadd.f32 1.0, %v8044_v25  ;;  %v5524_v13 = vmul.f32 %v5520_v52, %v5492_v8 }
0x2479   : > { %v8046_v7 = vpop.eup %8045 }
0x247a   : > { %v5525_v9 = vmul.f32 %v5521_v10, %v5493_v53  ;;  %v5522_v14 = vadd.f32 1.0, %v8046_v7 }
0x247b   : > { %v8048_v12 = vpop.eup %8047 }
0x247c   : > { %5625 = vmatprep.mubr.f32.mxu1 %v5525_v9  ;;  %v5523_v16 = vadd.f32 1.0, %v8048_v12  ;;  %v5526_v19 = vmul.f32 %v5522_v14, %v5494_v17 }
0x247d   : > { %5626 = vmatmul.mubr.f32.vlgmr.msra.gmra.mxu1 %v5524_v13 }
0x247e   : > { %v5527_v18 = vmul.f32 %v5523_v16, %v5495_v15 }
0x2480   : > { %5630 = vmatprep.mubr.f32.mxu1 %v5527_v18 }
0x2481   : > { %5631 = vmatmul.mubr.f32.gmra.mxu1 %v5526_v19 }
0x253d   : > { %v6865_v20 = vpop.f32.mrf.mxu1 }
0x253f   : > { %v6866_v21 = vpop.f32.mrf.mxu1 }
0x2540   : > { %v6867_v22 = vadd.f32 %v6866_v21, %v6865_v20 }
0x2541   : > { %v6868_v24 = vpop.f32.mrf.mxu1 }
0x2542   : > { %v5636_v26 = vadd.f32 %v6867_v22, %v9986_v55 }
0x2543   : > { %v6869_v27 = vpop.f32.mrf.mxu1 }
0x2544   : > { %v5646_v28 = vadd.f32 %v6243_v23, %v5636_v26  ;;  %v6870_v58 = vadd.f32 %v6869_v27, %v6868_v24 }
0x2546   : > { %5648 = vst [vmem:[%s460_s21] sm:$0xff] %v5646_v28  ;;  %v5637_v35 = vadd.f32 %v6870_v58, %v9983_v6 }
0x2548   : > { %v5647_v3 = vadd.f32 %v6243_v23, %v5637_v35 }
0x254a   : > { %5649 = vst [vmem:[%s460_s21 + $0x8] sm:$0xff] %v5647_v3 }
0x254b   : > { %8064 = shalt.err (!%p8061_p3)
}
0x254c   : > { %s8065_s15 = scalar_lea.hbm %s10219_s28, 256  ;;  %s8069_s18 = scalar_lea.hbm %s10275_s14, 512 }
0x254d   : > { %p8066_p4 = scmp.ne.s32.totalorder %s10219_s28, %s8065_s15  ;;  %p8070_p9 = scmp.lt.s32.totalorder %s10219_s28, %s10275_s14 }
0x254e   : > { %p8071_p10 = scmp.lt.s32.totalorder %s8069_s18, %s8065_s15 }
0x254f   : > { %p8067_p7 = pnand %p8066_p4, %p8230_p5 }
0x2550   : > { %p8072_p11 = por %p8071_p10, %p8070_p9 }
0x2551   : > { %p8068_p8 = pneg %p8067_p7 }
0x2553   : > { %p8073_p12 = pnand %p8072_p11, %p8068_p8 }
0x2555   : > { %8076 = shalt.err (!%p8073_p12)
}
0x2556   : > { %s8115_s19 = smov 128   ;;  %s8116_s22 = smov 8  }
0x2557   : > { %7911 = dma.vmem_to_hbm [thread:$0]  (%p8230_p5), %s10214_s25, 256, %s10219_s28, %s10221_s0, %s8115_s19, %s8115_s19, %s8116_s22  }
0x2558 PF: > { %p7917_p13 = scmp.ge.s32.totalorder %s8111_s16, 2  ;;  %s5679_s20 = sand.u32 1, %s8099_s29  }
0x2559   : > { %s5680_s15 = scalar_lea.sflag [#allocation3], %s5679_s20 }
0x255a   : > { %p7914_p0 = pnand %p7917_p13, %p8234_p6 }
0x255c   : > { %p7915_p1 = pneg %p7914_p0 }
0x255e   : > { %8094 = dma.done.wait (%p7915_p1), %s5680_s15, 256  }
0x255f   : > { %8096 = vsyncadd (%p7915_p1), %s5680_s15, 4294967040  ;;  %s10286_s16 = sld [smem:[#allocation6_spill]]  ;;  %s10289_s29 = smov %s8103_s30 }
0x2560   : > { %s10287_s21 = sld [smem:[#allocation5_spill]] }
0x2561   : > { %s10288_s15 = sld [smem:[#allocation7_spill]] }
0x2565   : > { %p24_p2 = scmp.ge.s32.totalorder %s10286_s16, 4  }
0x2566   : > { %s10290_s30 = smov %s10287_s21 }
0x2567   :  { %26 = sbr.rel (!%p24_p2) target bundleno = 5 (0x5), region = 148 }
0x256c   :  { %5685 = vsyncpa [#allocation3], 1 }
0x256d   :  { %5687 = vsyncpa [#allocation3 + $0x1], 1 }

</bundles_post_ra>
